<compile_context>
chip_gen: v5e
topology: v5e:2x2
jax: 0.10.0
libtpu: 0.0.40
codegen_flags: <defaults>
</compile_context>

<pallas_src>
import functools

import numpy as np
import jax
import jax.numpy as jnp
from jax.experimental import pallas as pl
from jax.experimental.pallas import tpu as pltpu

KSIZE = 4
STRIDE = 2
N_TAPS = KSIZE * KSIZE
BN_EPS = 1e-5
LRELU_ALPHA = 0.2
LANE = 128


def _round_up(x, m):
    return (x + m - 1) // m * m


def _conv_out(size):
    return (size - KSIZE) // STRIDE + 1


# ---------------------------------------------------------------------------
# Single fused Pallas kernel:
#   conv1+BN+LReLU -> (in-VMEM im2col) -> conv2+BN+LReLU -> (im2col) -> conv3.
# Activations live in a lane-dense (C, P) layout the whole time.
# ---------------------------------------------------------------------------
def _critic_fused_kernel(p1_ref, w1_ref, w2_ref, w3_ref, idx2_ref, idx3_ref,
                         bn_ref, out_ref, *, n1, n2, alpha, eps):
    f32 = jnp.float32
    bf16 = jnp.bfloat16

    c1 = w1_ref.shape[0]
    c2 = w2_ref.shape[0]
    p1_pad = p1_ref.shape[1]
    p2_pad = idx2_ref.shape[1]

    # Packed per-channel params (single small DMA); columns:
    #   0: gamma1, 1: beta1, 2: gamma2, 3: beta2, 4: conv3 bias (row 0).
    gamma1 = bn_ref[0:c1, 0:1]
    beta1 = bn_ref[0:c1, 1:2]
    gamma2 = bn_ref[0:c2, 2:3]
    beta2 = bn_ref[0:c2, 3:4]
    b3 = bn_ref[0:1, 4:5]

    def bn_lrelu(y, n_real, gamma, beta):
        # Training-mode BatchNorm2d (biased batch stats) + LeakyReLU(alpha) in
        # (C, P) layout: statistics are a lane reduction.  Pad columns of `y`
        # are exactly zero *before* BN (zero patches, no conv bias), so summing
        # over all lanes and dividing by the TRUE column count is exact.
        inv_n = 1.0 / float(n_real)
        mean = jnp.sum(y, axis=1, keepdims=True) * inv_n
        ex2 = jnp.sum(y * y, axis=1, keepdims=True) * inv_n
        var = jnp.maximum(ex2 - mean * mean, 0.0)
        y = (y - mean) * jax.lax.rsqrt(var + eps)
        y = y * gamma + beta
        return jnp.maximum(y, alpha * y)   # LeakyReLU, alpha in (0, 1)

    def im2col_via_mxu(src, idx_ref, src_pad):
        # Gather columns of `src` (C, src_pad) into a (N_TAPS*C, P_out_pad)
        # patch matrix.  The 0/1 selection masks are generated in-register
        # from a lane iota vs. a tiny int32 index row — nothing large comes
        # from HBM.  Index -1 (pad sentinel) selects nothing, so pad columns
        # of the patch matrix stay exactly zero (keeps BN stats exact) and
        # post-BN garbage in the source's pad columns is never selected.
        row_iota = jax.lax.broadcasted_iota(jnp.int32, (src_pad, 1), 0)
        taps = []
        for t in range(N_TAPS):          # static unroll — keep LLO visibility
            sel = jnp.where(row_iota == idx_ref[t:t + 1, :], 1.0, 0.0)
            sel = sel.astype(src.dtype)
            taps.append(jnp.dot(src, sel, preferred_element_type=f32))
        return jnp.concatenate(taps, axis=0)

    # ---- block 1: conv as one matmul on prebuilt patches, BN + LReLU -------
    y1 = jnp.dot(w1_ref[...], p1_ref[...], preferred_element_type=f32)  # (c1, p1_pad)
    y1 = bn_lrelu(y1, n1, gamma1, beta1)

    # ---- block 2: in-kernel im2col, then ONE K = 16*c1 (=128) matmul -------
    patches2 = im2col_via_mxu(y1, idx2_ref, p1_pad).astype(bf16)        # (16*c1, p2_pad)
    y2 = jnp.dot(w2_ref[...], patches2, preferred_element_type=f32)     # (c2, p2_pad)
    y2 = bn_lrelu(y2, n2, gamma2, beta2)

    # ---- block 3: in-kernel im2col, ONE K = 16*c2 (=256) matmul in f32 -----
    patches3 = im2col_via_mxu(y2, idx3_ref, p2_pad)                     # (16*c2, p3_pad) f32
    y3 = jnp.dot(w3_ref[...], patches3, preferred_element_type=f32)     # (1, p3_pad)
    out_ref[...] = (y3 + b3).astype(out_ref.dtype)


# ---------------------------------------------------------------------------
# Host-side preparation: weights rearranged for (C, P) matmuls + tiny int32
# gather-index tables (replace the old HBM selection matrices).
# ---------------------------------------------------------------------------
def _gather_indices(batch, h_in, w_in, h_out, w_out, p_out_pad):
    """idx[t, (b*h_out+ho)*w_out+wo] = flat column (b, s*ho+kh, s*wo+kw) of the
    (C, P_in) activation; -1 marks padded output columns (select nothing)."""
    idx = np.full((N_TAPS, p_out_pad), -1, np.int32)
    for kh in range(KSIZE):
        for kw in range(KSIZE):
            t = kh * KSIZE + kw
            for b in range(batch):
                for ho in range(h_out):
                    for wo in range(w_out):
                        po = (b * h_out + ho) * w_out + wo
                        pi = (b * h_in + STRIDE * ho + kh) * w_in + (STRIDE * wo + kw)
                        idx[t, po] = pi
    return idx


def init_critic_params(key, im_chan=1, hidden_dim=8):
    c1, c2 = hidden_dim, hidden_dim * 2
    k1, k2, k3, kb = jax.random.split(key, 4)
    # PyTorch Conv2d weight layout: (Cout, Cin, kh, kw).
    w1 = 0.05 * jax.random.normal(k1, (c1, im_chan, KSIZE, KSIZE), jnp.float32)
    w2 = 0.05 * jax.random.normal(k2, (c2, c1, KSIZE, KSIZE), jnp.float32)
    w3 = 0.05 * jax.random.normal(k3, (1, c2, KSIZE, KSIZE), jnp.float32)
    b3 = 0.05 * jax.random.normal(kb, (1, 1), jnp.float32)
    # Conv biases of blocks 1/2 are intentionally omitted: a per-channel bias
    # added before training-mode BatchNorm cancels exactly in the mean
    # subtraction (zero numerical change).
    return dict(w1=w1, w2=w2, w3=w3, b3=b3,
                gamma1=jnp.ones((c1,), jnp.float32),
                beta1=jnp.zeros((c1,), jnp.float32),
                gamma2=jnp.ones((c2,), jnp.float32),
                beta2=jnp.zeros((c2,), jnp.float32))


def prepare_critic(params, batch, im_chan, height, width):
    c1 = params["w1"].shape[0]
    c2 = params["w2"].shape[0]
    h1, w1s = _conv_out(height), _conv_out(width)
    h2, w2s = _conv_out(h1), _conv_out(w1s)
    h3, w3s = _conv_out(h2), _conv_out(w2s)
    p1, p2, p3 = batch * h1 * w1s, batch * h2 * w2s, batch * h3 * w3s
    p1p, p2p, p3p = _round_up(p1, LANE), _round_up(p2, LANE), _round_up(p3, LANE)

    # Weights in (C_out, contraction) layout for lane-dense (C, P) matmuls.
    #   w1: (c1, Cin*16),  column order (cin, kh, kw) — matches p1 rows.
    #   w2: (c2, 16*c1),   column order (tap, c1)     — matches patches2 rows.
    #   w3: (1, 16*c2) f32, column order (tap, c2)    — matches patches3 rows.
    w1k = params["w1"].reshape(c1, im_chan * N_TAPS).astype(jnp.bfloat16)
    w2k = jnp.transpose(params["w2"], (0, 2, 3, 1)).reshape(
        c2, N_TAPS * c1).astype(jnp.bfloat16)
    w3k = jnp.transpose(params["w3"], (0, 2, 3, 1)).reshape(
        1, N_TAPS * c2).astype(jnp.float32)

    idx2 = jnp.asarray(_gather_indices(batch, h1, w1s, h2, w2s, p2p))
    idx3 = jnp.asarray(_gather_indices(batch, h2, w2s, h3, w3s, p3p))

    # Coalesce the five tiny per-channel params into one packed array.
    bn = jnp.zeros((c2, 8), jnp.float32)
    bn = bn.at[:c1, 0].set(params["gamma1"].reshape(-1))
    bn = bn.at[:c1, 1].set(params["beta1"].reshape(-1))
    bn = bn.at[:c2, 2].set(params["gamma2"].reshape(-1))
    bn = bn.at[:c2, 3].set(params["beta2"].reshape(-1))
    bn = bn.at[0, 4].set(params["b3"].reshape(-1)[0])

    arrays = dict(w1=w1k, w2=w2k, w3=w3k, idx2=idx2, idx3=idx3, bn=bn)
    geom = dict(batch=batch, im_chan=im_chan, c1=c1, c2=c2,
                p1=p1, p2=p2, p3=p3, p1p=p1p, p2p=p2p, p3p=p3p)
    return arrays, geom


# ---------------------------------------------------------------------------
# Block-1 im2col, transposed to (Cin*16, P1) so the kernel's layer-1 matmul is
# lane-dense.  Stays in plain (jit-fused) JAX: x is only a few KiB and the
# patch matrix is tens of KiB, far cheaper than an in-kernel gather over the
# raw N*H*W pixel grid.
# ---------------------------------------------------------------------------
def _im2col_T(x):
    n, c, h, w = x.shape
    ho, wo = _conv_out(h), _conv_out(w)
    taps = []
    for i in range(KSIZE):
        for j in range(KSIZE):
            taps.append(x[:, :, i:i + STRIDE * (ho - 1) + 1:STRIDE,
                              j:j + STRIDE * (wo - 1) + 1:STRIDE])
    p = jnp.stack(taps, axis=2)                              # (N, C, 16, Ho, Wo)
    p = p.transpose(1, 2, 0, 3, 4).reshape(c * N_TAPS, n * ho * wo)
    return p                                                 # rows (cin, kh, kw)


def critic_forward(arrays, geom, x):
    p1 = _im2col_T(x)
    p1 = jnp.pad(p1, ((0, 0), (0, geom["p1p"] - geom["p1"]))).astype(jnp.bfloat16)

    kernel = functools.partial(_critic_fused_kernel,
                               n1=geom["p1"], n2=geom["p2"],
                               alpha=LRELU_ALPHA, eps=BN_EPS)

    inputs = (p1, arrays["w1"], arrays["w2"], arrays["w3"],
              arrays["idx2"], arrays["idx3"], arrays["bn"])

    def full(shape):
        zeros = (0,) * len(shape)
        return pl.BlockSpec(shape, lambda i, z=zeros: z)

    c1, c2 = geom["c1"], geom["c2"]
    flops = 2 * (c1 * geom["im_chan"] * N_TAPS * geom["p1"]
                 + N_TAPS * c1 * geom["p1p"] * geom["p2p"]      # im2col gather 2
                 + c2 * N_TAPS * c1 * geom["p2p"]                # block-2 matmul
                 + N_TAPS * c2 * geom["p2p"] * geom["p3p"]       # im2col gather 3
                 + N_TAPS * c2 * geom["p3p"])                    # block-3 matmul
    bytes_accessed = int(sum(int(np.prod(a.shape)) * a.dtype.itemsize
                             for a in inputs) + geom["p3p"] * 4)
    cost = pl.CostEstimate(flops=int(flops), transcendentals=2 * (c1 + c2),
                           bytes_accessed=bytes_accessed)

    # Whole problem (< 1 MiB) lives in VMEM for a single grid step.
    # TODO(synk): for large batches, add a leading "parallel" grid axis over
    # batch tiles (shards across v7x's two TensorCores); BN stats are
    # batch-global, so that needs a two-pass / cross-core reduction and the
    # tile budget re-derived against 64 MiB VMEM per core.
    out = pl.pallas_call(
        kernel,
        out_shape=jax.ShapeDtypeStruct((1, geom["p3p"]), jnp.float32),
        grid=(1,),
        in_specs=[full(a.shape) for a in inputs],
        out_specs=full((1, geom["p3p"])),
        compiler_params=pltpu.CompilerParams(
            dimension_semantics=("arbitrary",)),
        cost_estimate=cost,
    )(*inputs)

    # Valid lanes are ordered (n, h3, w3); matches PyTorch `view(len(x), -1)`.
    return out[0, :geom["p3"]].reshape(geom["batch"], -1)


if __name__ == "__main__":
    key = jax.random.PRNGKey(0)
    k_x, k_p = jax.random.split(key)

    # MNIST-like spatial size so the three stride-2 convs reduce 28->13->5->1.
    batch, im_chan, height, width = 2, 1, 28, 28
    hidden_dim = 8

    x = jax.random.normal(k_x, (batch, im_chan, height, width), jnp.float32)
    params = init_critic_params(k_p, im_chan=im_chan, hidden_dim=hidden_dim)
    arrays, geom = prepare_critic(params, batch, im_chan, height, width)

    fwd = jax.jit(lambda a, xx: critic_forward(a, geom, xx))
    out = jax.block_until_ready(fwd(arrays, x))

    assert out.shape == (batch, 1), out.shape
    assert bool(jnp.all(jnp.isfinite(out))), "non-finite output"
    print("KERNEL_OK")
</pallas_src>

<mosaic_0001>
module attributes {stable_mosaic.version = 11 : i64} {
  func.func @_critic_fused_kernel(%arg0: i32, %arg1: memref<16x384xbf16, #tpu.memory_space<vmem>>, %arg2: memref<8x16xbf16, #tpu.memory_space<vmem>>, %arg3: memref<16x128xbf16, #tpu.memory_space<vmem>>, %arg4: memref<1x256xf32, #tpu.memory_space<vmem>>, %arg5: memref<16x128xi32, #tpu.memory_space<vmem>>, %arg6: memref<16x128xi32, #tpu.memory_space<vmem>>, %arg7: memref<16x8xf32, #tpu.memory_space<vmem>>, %arg8: memref<1x128xf32, #tpu.memory_space<vmem>>) attributes {dimension_semantics = [#tpu.dimension_semantics<arbitrary>], iteration_bounds = array<i64: 1>, scalar_prefetch = 0 : i64, scratch_operands = 0 : i64, tpu.core_type = #tpu.core_type<tc>, window_params = [{pipeline_mode = #tpu.pipeline_mode<synchronous>, transform_indices = @transform_0, window_bounds = array<i64: 16, 384>}, {pipeline_mode = #tpu.pipeline_mode<synchronous>, transform_indices = @transform_1, window_bounds = array<i64: 8, 16>}, {pipeline_mode = #tpu.pipeline_mode<synchronous>, transform_indices = @transform_2, window_bounds = array<i64: 16, 128>}, {pipeline_mode = #tpu.pipeline_mode<synchronous>, transform_indices = @transform_3, window_bounds = array<i64: 1, 256>}, {pipeline_mode = #tpu.pipeline_mode<synchronous>, transform_indices = @transform_4, window_bounds = array<i64: 16, 128>}, {pipeline_mode = #tpu.pipeline_mode<synchronous>, transform_indices = @transform_5, window_bounds = array<i64: 16, 128>}, {pipeline_mode = #tpu.pipeline_mode<synchronous>, transform_indices = @transform_6, window_bounds = array<i64: 16, 8>}, {pipeline_mode = #tpu.pipeline_mode<synchronous>, transform_indices = @transform_7, window_bounds = array<i64: 1, 128>}]} {
    %c0 = arith.constant 0 : index
    %c0_0 = arith.constant 0 : index
    %0 = vector.load %arg7[%c0, %c0_0] : memref<16x8xf32, #tpu.memory_space<vmem>>, vector<8x1xf32>
    %c0_1 = arith.constant 0 : index
    %c1 = arith.constant 1 : index
    %1 = vector.load %arg7[%c0_1, %c1] : memref<16x8xf32, #tpu.memory_space<vmem>>, vector<8x1xf32>
    %c0_2 = arith.constant 0 : index
    %c2 = arith.constant 2 : index
    %2 = vector.load %arg7[%c0_2, %c2] : memref<16x8xf32, #tpu.memory_space<vmem>>, vector<16x1xf32>
    %c0_3 = arith.constant 0 : index
    %c3 = arith.constant 3 : index
    %3 = vector.load %arg7[%c0_3, %c3] : memref<16x8xf32, #tpu.memory_space<vmem>>, vector<16x1xf32>
    %c0_4 = arith.constant 0 : index
    %c4 = arith.constant 4 : index
    %4 = vector.load %arg7[%c0_4, %c4] : memref<16x8xf32, #tpu.memory_space<vmem>>, vector<1x1xf32>
    %c0_5 = arith.constant 0 : index
    %c0_6 = arith.constant 0 : index
    %5 = vector.load %arg2[%c0_5, %c0_6] : memref<8x16xbf16, #tpu.memory_space<vmem>>, vector<8x16xbf16>
    %c0_7 = arith.constant 0 : index
    %c0_8 = arith.constant 0 : index
    %6 = vector.load %arg1[%c0_7, %c0_8] : memref<16x384xbf16, #tpu.memory_space<vmem>>, vector<16x384xbf16>
    %cst = arith.constant dense<0.000000e+00> : vector<8x384xf32>
    %7 = tpu.matmul %5, %6, %cst {dimension_numbers = #tpu.dot_dimension_numbers<[1], [0], [0], [1], [0, 0, 1, 1], [], []>} : vector<8x16xbf16>, vector<16x384xbf16>, vector<8x384xf32> -> vector<8x384xf32>
    %cst_9 = arith.constant dense<0.000000e+00> : vector<8xf32>
    %8 = vector.multi_reduction <add>, %7, %cst_9 [1] : vector<8x384xf32> to vector<8xf32>
    %9 = vector.shape_cast %8 : vector<8xf32> to vector<8x1xf32>
    %cst_10 = arith.constant 2.958580e-03 : f32
    %10 = vector.broadcast %cst_10 : f32 to vector<8x1xf32>
    %11 = arith.mulf %9, %10 : vector<8x1xf32>
    %12 = arith.mulf %7, %7 : vector<8x384xf32>
    %cst_11 = arith.constant dense<0.000000e+00> : vector<8xf32>
    %13 = vector.multi_reduction <add>, %12, %cst_11 [1] : vector<8x384xf32> to vector<8xf32>
    %14 = vector.shape_cast %13 : vector<8xf32> to vector<8x1xf32>
    %cst_12 = arith.constant 2.958580e-03 : f32
    %15 = vector.broadcast %cst_12 : f32 to vector<8x1xf32>
    %16 = arith.mulf %14, %15 : vector<8x1xf32>
    %17 = arith.mulf %11, %11 : vector<8x1xf32>
    %18 = arith.subf %16, %17 : vector<8x1xf32>
    %cst_13 = arith.constant 0.000000e+00 : f32
    %19 = vector.broadcast %cst_13 : f32 to vector<8x1xf32>
    %20 = arith.maximumf %18, %19 : vector<8x1xf32>
    %21 = vector.broadcast %11 : vector<8x1xf32> to vector<8x384xf32>
    %22 = arith.subf %7, %21 : vector<8x384xf32>
    %cst_14 = arith.constant 9.99999974E-6 : f32
    %23 = vector.broadcast %cst_14 : f32 to vector<8x1xf32>
    %24 = arith.addf %20, %23 : vector<8x1xf32>
    %25 = math.rsqrt %24 : vector<8x1xf32>
    %26 = vector.broadcast %25 : vector<8x1xf32> to vector<8x384xf32>
    %27 = arith.mulf %22, %26 : vector<8x384xf32>
    %28 = vector.broadcast %0 : vector<8x1xf32> to vector<8x384xf32>
    %29 = arith.mulf %27, %28 : vector<8x384xf32>
    %30 = vector.broadcast %1 : vector<8x1xf32> to vector<8x384xf32>
    %31 = arith.addf %29, %30 : vector<8x384xf32>
    %cst_15 = arith.constant 2.000000e-01 : f32
    %32 = vector.broadcast %cst_15 : f32 to vector<8x384xf32>
    %33 = arith.mulf %32, %31 : vector<8x384xf32>
    %34 = arith.maximumf %31, %33 : vector<8x384xf32>
    %35 = tpu.iota {dimensions = array<i32: 0>} : vector<384x1xi32>
    %c0_16 = arith.constant 0 : index
    %c0_17 = arith.constant 0 : index
    %36 = vector.load %arg5[%c0_16, %c0_17] : memref<16x128xi32, #tpu.memory_space<vmem>>, vector<1x128xi32>
    %37 = vector.broadcast %35 : vector<384x1xi32> to vector<384x128xi32>
    %38 = vector.broadcast %36 : vector<1x128xi32> to vector<384x128xi32>
    %39 = arith.cmpi eq, %37, %38 : vector<384x128xi32>
    %cst_18 = arith.constant 1.000000e+00 : f32
    %cst_19 = arith.constant 0.000000e+00 : f32
    %40 = vector.broadcast %cst_18 : f32 to vector<384x128xf32>
    %41 = vector.broadcast %cst_19 : f32 to vector<384x128xf32>
    %42 = arith.select %39, %40, %41 : vector<384x128xi1>, vector<384x128xf32>
    %cst_20 = arith.constant dense<0.000000e+00> : vector<8x128xf32>
    %43 = tpu.matmul %34, %42, %cst_20 {dimension_numbers = #tpu.dot_dimension_numbers<[1], [0], [0], [1], [0, 0, 1, 1], [], []>} : vector<8x384xf32>, vector<384x128xf32>, vector<8x128xf32> -> vector<8x128xf32>
    %c1_21 = arith.constant 1 : index
    %c0_22 = arith.constant 0 : index
    %44 = vector.load %arg5[%c1_21, %c0_22] : memref<16x128xi32, #tpu.memory_space<vmem>>, vector<1x128xi32>
    %45 = vector.broadcast %35 : vector<384x1xi32> to vector<384x128xi32>
    %46 = vector.broadcast %44 : vector<1x128xi32> to vector<384x128xi32>
    %47 = arith.cmpi eq, %45, %46 : vector<384x128xi32>
    %cst_23 = arith.constant 1.000000e+00 : f32
    %cst_24 = arith.constant 0.000000e+00 : f32
    %48 = vector.broadcast %cst_23 : f32 to vector<384x128xf32>
    %49 = vector.broadcast %cst_24 : f32 to vector<384x128xf32>
    %50 = arith.select %47, %48, %49 : vector<384x128xi1>, vector<384x128xf32>
    %cst_25 = arith.constant dense<0.000000e+00> : vector<8x128xf32>
    %51 = tpu.matmul %34, %50, %cst_25 {dimension_numbers = #tpu.dot_dimension_numbers<[1], [0], [0], [1], [0, 0, 1, 1], [], []>} : vector<8x384xf32>, vector<384x128xf32>, vector<8x128xf32> -> vector<8x128xf32>
    %c2_26 = arith.constant 2 : index
    %c0_27 = arith.constant 0 : index
    %52 = vector.load %arg5[%c2_26, %c0_27] : memref<16x128xi32, #tpu.memory_space<vmem>>, vector<1x128xi32>
    %53 = vector.broadcast %35 : vector<384x1xi32> to vector<384x128xi32>
    %54 = vector.broadcast %52 : vector<1x128xi32> to vector<384x128xi32>
    %55 = arith.cmpi eq, %53, %54 : vector<384x128xi32>
    %cst_28 = arith.constant 1.000000e+00 : f32
    %cst_29 = arith.constant 0.000000e+00 : f32
    %56 = vector.broadcast %cst_28 : f32 to vector<384x128xf32>
    %57 = vector.broadcast %cst_29 : f32 to vector<384x128xf32>
    %58 = arith.select %55, %56, %57 : vector<384x128xi1>, vector<384x128xf32>
    %cst_30 = arith.constant dense<0.000000e+00> : vector<8x128xf32>
    %59 = tpu.matmul %34, %58, %cst_30 {dimension_numbers = #tpu.dot_dimension_numbers<[1], [0], [0], [1], [0, 0, 1, 1], [], []>} : vector<8x384xf32>, vector<384x128xf32>, vector<8x128xf32> -> vector<8x128xf32>
    %c3_31 = arith.constant 3 : index
    %c0_32 = arith.constant 0 : index
    %60 = vector.load %arg5[%c3_31, %c0_32] : memref<16x128xi32, #tpu.memory_space<vmem>>, vector<1x128xi32>
    %61 = vector.broadcast %35 : vector<384x1xi32> to vector<384x128xi32>
    %62 = vector.broadcast %60 : vector<1x128xi32> to vector<384x128xi32>
    %63 = arith.cmpi eq, %61, %62 : vector<384x128xi32>
    %cst_33 = arith.constant 1.000000e+00 : f32
    %cst_34 = arith.constant 0.000000e+00 : f32
    %64 = vector.broadcast %cst_33 : f32 to vector<384x128xf32>
    %65 = vector.broadcast %cst_34 : f32 to vector<384x128xf32>
    %66 = arith.select %63, %64, %65 : vector<384x128xi1>, vector<384x128xf32>
    %cst_35 = arith.constant dense<0.000000e+00> : vector<8x128xf32>
    %67 = tpu.matmul %34, %66, %cst_35 {dimension_numbers = #tpu.dot_dimension_numbers<[1], [0], [0], [1], [0, 0, 1, 1], [], []>} : vector<8x384xf32>, vector<384x128xf32>, vector<8x128xf32> -> vector<8x128xf32>
    %c4_36 = arith.constant 4 : index
    %c0_37 = arith.constant 0 : index
    %68 = vector.load %arg5[%c4_36, %c0_37] : memref<16x128xi32, #tpu.memory_space<vmem>>, vector<1x128xi32>
    %69 = vector.broadcast %35 : vector<384x1xi32> to vector<384x128xi32>
    %70 = vector.broadcast %68 : vector<1x128xi32> to vector<384x128xi32>
    %71 = arith.cmpi eq, %69, %70 : vector<384x128xi32>
    %cst_38 = arith.constant 1.000000e+00 : f32
    %cst_39 = arith.constant 0.000000e+00 : f32
    %72 = vector.broadcast %cst_38 : f32 to vector<384x128xf32>
    %73 = vector.broadcast %cst_39 : f32 to vector<384x128xf32>
    %74 = arith.select %71, %72, %73 : vector<384x128xi1>, vector<384x128xf32>
    %cst_40 = arith.constant dense<0.000000e+00> : vector<8x128xf32>
    %75 = tpu.matmul %34, %74, %cst_40 {dimension_numbers = #tpu.dot_dimension_numbers<[1], [0], [0], [1], [0, 0, 1, 1], [], []>} : vector<8x384xf32>, vector<384x128xf32>, vector<8x128xf32> -> vector<8x128xf32>
    %c5 = arith.constant 5 : index
    %c0_41 = arith.constant 0 : index
    %76 = vector.load %arg5[%c5, %c0_41] : memref<16x128xi32, #tpu.memory_space<vmem>>, vector<1x128xi32>
    %77 = vector.broadcast %35 : vector<384x1xi32> to vector<384x128xi32>
    %78 = vector.broadcast %76 : vector<1x128xi32> to vector<384x128xi32>
    %79 = arith.cmpi eq, %77, %78 : vector<384x128xi32>
    %cst_42 = arith.constant 1.000000e+00 : f32
    %cst_43 = arith.constant 0.000000e+00 : f32
    %80 = vector.broadcast %cst_42 : f32 to vector<384x128xf32>
    %81 = vector.broadcast %cst_43 : f32 to vector<384x128xf32>
    %82 = arith.select %79, %80, %81 : vector<384x128xi1>, vector<384x128xf32>
    %cst_44 = arith.constant dense<0.000000e+00> : vector<8x128xf32>
    %83 = tpu.matmul %34, %82, %cst_44 {dimension_numbers = #tpu.dot_dimension_numbers<[1], [0], [0], [1], [0, 0, 1, 1], [], []>} : vector<8x384xf32>, vector<384x128xf32>, vector<8x128xf32> -> vector<8x128xf32>
    %c6 = arith.constant 6 : index
    %c0_45 = arith.constant 0 : index
    %84 = vector.load %arg5[%c6, %c0_45] : memref<16x128xi32, #tpu.memory_space<vmem>>, vector<1x128xi32>
    %85 = vector.broadcast %35 : vector<384x1xi32> to vector<384x128xi32>
    %86 = vector.broadcast %84 : vector<1x128xi32> to vector<384x128xi32>
    %87 = arith.cmpi eq, %85, %86 : vector<384x128xi32>
    %cst_46 = arith.constant 1.000000e+00 : f32
    %cst_47 = arith.constant 0.000000e+00 : f32
    %88 = vector.broadcast %cst_46 : f32 to vector<384x128xf32>
    %89 = vector.broadcast %cst_47 : f32 to vector<384x128xf32>
    %90 = arith.select %87, %88, %89 : vector<384x128xi1>, vector<384x128xf32>
    %cst_48 = arith.constant dense<0.000000e+00> : vector<8x128xf32>
    %91 = tpu.matmul %34, %90, %cst_48 {dimension_numbers = #tpu.dot_dimension_numbers<[1], [0], [0], [1], [0, 0, 1, 1], [], []>} : vector<8x384xf32>, vector<384x128xf32>, vector<8x128xf32> -> vector<8x128xf32>
    %c7 = arith.constant 7 : index
    %c0_49 = arith.constant 0 : index
    %92 = vector.load %arg5[%c7, %c0_49] : memref<16x128xi32, #tpu.memory_space<vmem>>, vector<1x128xi32>
    %93 = vector.broadcast %35 : vector<384x1xi32> to vector<384x128xi32>
    %94 = vector.broadcast %92 : vector<1x128xi32> to vector<384x128xi32>
    %95 = arith.cmpi eq, %93, %94 : vector<384x128xi32>
    %cst_50 = arith.constant 1.000000e+00 : f32
    %cst_51 = arith.constant 0.000000e+00 : f32
    %96 = vector.broadcast %cst_50 : f32 to vector<384x128xf32>
    %97 = vector.broadcast %cst_51 : f32 to vector<384x128xf32>
    %98 = arith.select %95, %96, %97 : vector<384x128xi1>, vector<384x128xf32>
    %cst_52 = arith.constant dense<0.000000e+00> : vector<8x128xf32>
    %99 = tpu.matmul %34, %98, %cst_52 {dimension_numbers = #tpu.dot_dimension_numbers<[1], [0], [0], [1], [0, 0, 1, 1], [], []>} : vector<8x384xf32>, vector<384x128xf32>, vector<8x128xf32> -> vector<8x128xf32>
    %c8 = arith.constant 8 : index
    %c0_53 = arith.constant 0 : index
    %100 = vector.load %arg5[%c8, %c0_53] : memref<16x128xi32, #tpu.memory_space<vmem>>, vector<1x128xi32>
    %101 = vector.broadcast %35 : vector<384x1xi32> to vector<384x128xi32>
    %102 = vector.broadcast %100 : vector<1x128xi32> to vector<384x128xi32>
    %103 = arith.cmpi eq, %101, %102 : vector<384x128xi32>
    %cst_54 = arith.constant 1.000000e+00 : f32
    %cst_55 = arith.constant 0.000000e+00 : f32
    %104 = vector.broadcast %cst_54 : f32 to vector<384x128xf32>
    %105 = vector.broadcast %cst_55 : f32 to vector<384x128xf32>
    %106 = arith.select %103, %104, %105 : vector<384x128xi1>, vector<384x128xf32>
    %cst_56 = arith.constant dense<0.000000e+00> : vector<8x128xf32>
    %107 = tpu.matmul %34, %106, %cst_56 {dimension_numbers = #tpu.dot_dimension_numbers<[1], [0], [0], [1], [0, 0, 1, 1], [], []>} : vector<8x384xf32>, vector<384x128xf32>, vector<8x128xf32> -> vector<8x128xf32>
    %c9 = arith.constant 9 : index
    %c0_57 = arith.constant 0 : index
    %108 = vector.load %arg5[%c9, %c0_57] : memref<16x128xi32, #tpu.memory_space<vmem>>, vector<1x128xi32>
    %109 = vector.broadcast %35 : vector<384x1xi32> to vector<384x128xi32>
    %110 = vector.broadcast %108 : vector<1x128xi32> to vector<384x128xi32>
    %111 = arith.cmpi eq, %109, %110 : vector<384x128xi32>
    %cst_58 = arith.constant 1.000000e+00 : f32
    %cst_59 = arith.constant 0.000000e+00 : f32
    %112 = vector.broadcast %cst_58 : f32 to vector<384x128xf32>
    %113 = vector.broadcast %cst_59 : f32 to vector<384x128xf32>
    %114 = arith.select %111, %112, %113 : vector<384x128xi1>, vector<384x128xf32>
    %cst_60 = arith.constant dense<0.000000e+00> : vector<8x128xf32>
    %115 = tpu.matmul %34, %114, %cst_60 {dimension_numbers = #tpu.dot_dimension_numbers<[1], [0], [0], [1], [0, 0, 1, 1], [], []>} : vector<8x384xf32>, vector<384x128xf32>, vector<8x128xf32> -> vector<8x128xf32>
    %c10 = arith.constant 10 : index
    %c0_61 = arith.constant 0 : index
    %116 = vector.load %arg5[%c10, %c0_61] : memref<16x128xi32, #tpu.memory_space<vmem>>, vector<1x128xi32>
    %117 = vector.broadcast %35 : vector<384x1xi32> to vector<384x128xi32>
    %118 = vector.broadcast %116 : vector<1x128xi32> to vector<384x128xi32>
    %119 = arith.cmpi eq, %117, %118 : vector<384x128xi32>
    %cst_62 = arith.constant 1.000000e+00 : f32
    %cst_63 = arith.constant 0.000000e+00 : f32
    %120 = vector.broadcast %cst_62 : f32 to vector<384x128xf32>
    %121 = vector.broadcast %cst_63 : f32 to vector<384x128xf32>
    %122 = arith.select %119, %120, %121 : vector<384x128xi1>, vector<384x128xf32>
    %cst_64 = arith.constant dense<0.000000e+00> : vector<8x128xf32>
    %123 = tpu.matmul %34, %122, %cst_64 {dimension_numbers = #tpu.dot_dimension_numbers<[1], [0], [0], [1], [0, 0, 1, 1], [], []>} : vector<8x384xf32>, vector<384x128xf32>, vector<8x128xf32> -> vector<8x128xf32>
    %c11 = arith.constant 11 : index
    %c0_65 = arith.constant 0 : index
    %124 = vector.load %arg5[%c11, %c0_65] : memref<16x128xi32, #tpu.memory_space<vmem>>, vector<1x128xi32>
    %125 = vector.broadcast %35 : vector<384x1xi32> to vector<384x128xi32>
    %126 = vector.broadcast %124 : vector<1x128xi32> to vector<384x128xi32>
    %127 = arith.cmpi eq, %125, %126 : vector<384x128xi32>
    %cst_66 = arith.constant 1.000000e+00 : f32
    %cst_67 = arith.constant 0.000000e+00 : f32
    %128 = vector.broadcast %cst_66 : f32 to vector<384x128xf32>
    %129 = vector.broadcast %cst_67 : f32 to vector<384x128xf32>
    %130 = arith.select %127, %128, %129 : vector<384x128xi1>, vector<384x128xf32>
    %cst_68 = arith.constant dense<0.000000e+00> : vector<8x128xf32>
    %131 = tpu.matmul %34, %130, %cst_68 {dimension_numbers = #tpu.dot_dimension_numbers<[1], [0], [0], [1], [0, 0, 1, 1], [], []>} : vector<8x384xf32>, vector<384x128xf32>, vector<8x128xf32> -> vector<8x128xf32>
    %c12 = arith.constant 12 : index
    %c0_69 = arith.constant 0 : index
    %132 = vector.load %arg5[%c12, %c0_69] : memref<16x128xi32, #tpu.memory_space<vmem>>, vector<1x128xi32>
    %133 = vector.broadcast %35 : vector<384x1xi32> to vector<384x128xi32>
    %134 = vector.broadcast %132 : vector<1x128xi32> to vector<384x128xi32>
    %135 = arith.cmpi eq, %133, %134 : vector<384x128xi32>
    %cst_70 = arith.constant 1.000000e+00 : f32
    %cst_71 = arith.constant 0.000000e+00 : f32
    %136 = vector.broadcast %cst_70 : f32 to vector<384x128xf32>
    %137 = vector.broadcast %cst_71 : f32 to vector<384x128xf32>
    %138 = arith.select %135, %136, %137 : vector<384x128xi1>, vector<384x128xf32>
    %cst_72 = arith.constant dense<0.000000e+00> : vector<8x128xf32>
    %139 = tpu.matmul %34, %138, %cst_72 {dimension_numbers = #tpu.dot_dimension_numbers<[1], [0], [0], [1], [0, 0, 1, 1], [], []>} : vector<8x384xf32>, vector<384x128xf32>, vector<8x128xf32> -> vector<8x128xf32>
    %c13 = arith.constant 13 : index
    %c0_73 = arith.constant 0 : index
    %140 = vector.load %arg5[%c13, %c0_73] : memref<16x128xi32, #tpu.memory_space<vmem>>, vector<1x128xi32>
    %141 = vector.broadcast %35 : vector<384x1xi32> to vector<384x128xi32>
    %142 = vector.broadcast %140 : vector<1x128xi32> to vector<384x128xi32>
    %143 = arith.cmpi eq, %141, %142 : vector<384x128xi32>
    %cst_74 = arith.constant 1.000000e+00 : f32
    %cst_75 = arith.constant 0.000000e+00 : f32
    %144 = vector.broadcast %cst_74 : f32 to vector<384x128xf32>
    %145 = vector.broadcast %cst_75 : f32 to vector<384x128xf32>
    %146 = arith.select %143, %144, %145 : vector<384x128xi1>, vector<384x128xf32>
    %cst_76 = arith.constant dense<0.000000e+00> : vector<8x128xf32>
    %147 = tpu.matmul %34, %146, %cst_76 {dimension_numbers = #tpu.dot_dimension_numbers<[1], [0], [0], [1], [0, 0, 1, 1], [], []>} : vector<8x384xf32>, vector<384x128xf32>, vector<8x128xf32> -> vector<8x128xf32>
    %c14 = arith.constant 14 : index
    %c0_77 = arith.constant 0 : index
    %148 = vector.load %arg5[%c14, %c0_77] : memref<16x128xi32, #tpu.memory_space<vmem>>, vector<1x128xi32>
    %149 = vector.broadcast %35 : vector<384x1xi32> to vector<384x128xi32>
    %150 = vector.broadcast %148 : vector<1x128xi32> to vector<384x128xi32>
    %151 = arith.cmpi eq, %149, %150 : vector<384x128xi32>
    %cst_78 = arith.constant 1.000000e+00 : f32
    %cst_79 = arith.constant 0.000000e+00 : f32
    %152 = vector.broadcast %cst_78 : f32 to vector<384x128xf32>
    %153 = vector.broadcast %cst_79 : f32 to vector<384x128xf32>
    %154 = arith.select %151, %152, %153 : vector<384x128xi1>, vector<384x128xf32>
    %cst_80 = arith.constant dense<0.000000e+00> : vector<8x128xf32>
    %155 = tpu.matmul %34, %154, %cst_80 {dimension_numbers = #tpu.dot_dimension_numbers<[1], [0], [0], [1], [0, 0, 1, 1], [], []>} : vector<8x384xf32>, vector<384x128xf32>, vector<8x128xf32> -> vector<8x128xf32>
    %c15 = arith.constant 15 : index
    %c0_81 = arith.constant 0 : index
    %156 = vector.load %arg5[%c15, %c0_81] : memref<16x128xi32, #tpu.memory_space<vmem>>, vector<1x128xi32>
    %157 = vector.broadcast %35 : vector<384x1xi32> to vector<384x128xi32>
    %158 = vector.broadcast %156 : vector<1x128xi32> to vector<384x128xi32>
    %159 = arith.cmpi eq, %157, %158 : vector<384x128xi32>
    %cst_82 = arith.constant 1.000000e+00 : f32
    %cst_83 = arith.constant 0.000000e+00 : f32
    %160 = vector.broadcast %cst_82 : f32 to vector<384x128xf32>
    %161 = vector.broadcast %cst_83 : f32 to vector<384x128xf32>
    %162 = arith.select %159, %160, %161 : vector<384x128xi1>, vector<384x128xf32>
    %cst_84 = arith.constant dense<0.000000e+00> : vector<8x128xf32>
    %163 = tpu.matmul %34, %162, %cst_84 {dimension_numbers = #tpu.dot_dimension_numbers<[1], [0], [0], [1], [0, 0, 1, 1], [], []>} : vector<8x384xf32>, vector<384x128xf32>, vector<8x128xf32> -> vector<8x128xf32>
    %164 = tpu.concatenate %43, %51, %59, %67, %75, %83, %91, %99, %107, %115, %123, %131, %139, %147, %155, %163 in 0 : vector<8x128xf32>, vector<8x128xf32>, vector<8x128xf32>, vector<8x128xf32>, vector<8x128xf32>, vector<8x128xf32>, vector<8x128xf32>, vector<8x128xf32>, vector<8x128xf32>, vector<8x128xf32>, vector<8x128xf32>, vector<8x128xf32>, vector<8x128xf32>, vector<8x128xf32>, vector<8x128xf32>, vector<8x128xf32> -> vector<128x128xf32>
    %165 = arith.truncf %164 : vector<128x128xf32> to vector<128x128xbf16>
    %c0_85 = arith.constant 0 : index
    %c0_86 = arith.constant 0 : index
    %166 = vector.load %arg3[%c0_85, %c0_86] : memref<16x128xbf16, #tpu.memory_space<vmem>>, vector<16x128xbf16>
    %cst_87 = arith.constant dense<0.000000e+00> : vector<16x128xf32>
    %167 = tpu.matmul %166, %165, %cst_87 {dimension_numbers = #tpu.dot_dimension_numbers<[1], [0], [0], [1], [0, 0, 1, 1], [], []>} : vector<16x128xbf16>, vector<128x128xbf16>, vector<16x128xf32> -> vector<16x128xf32>
    %cst_88 = arith.constant dense<0.000000e+00> : vector<16xf32>
    %168 = vector.multi_reduction <add>, %167, %cst_88 [1] : vector<16x128xf32> to vector<16xf32>
    %169 = vector.shape_cast %168 : vector<16xf32> to vector<16x1xf32>
    %cst_89 = arith.constant 2.000000e-02 : f32
    %170 = vector.broadcast %cst_89 : f32 to vector<16x1xf32>
    %171 = arith.mulf %169, %170 : vector<16x1xf32>
    %172 = arith.mulf %167, %167 : vector<16x128xf32>
    %cst_90 = arith.constant dense<0.000000e+00> : vector<16xf32>
    %173 = vector.multi_reduction <add>, %172, %cst_90 [1] : vector<16x128xf32> to vector<16xf32>
    %174 = vector.shape_cast %173 : vector<16xf32> to vector<16x1xf32>
    %cst_91 = arith.constant 2.000000e-02 : f32
    %175 = vector.broadcast %cst_91 : f32 to vector<16x1xf32>
    %176 = arith.mulf %174, %175 : vector<16x1xf32>
    %177 = arith.mulf %171, %171 : vector<16x1xf32>
    %178 = arith.subf %176, %177 : vector<16x1xf32>
    %cst_92 = arith.constant 0.000000e+00 : f32
    %179 = vector.broadcast %cst_92 : f32 to vector<16x1xf32>
    %180 = arith.maximumf %178, %179 : vector<16x1xf32>
    %181 = vector.broadcast %171 : vector<16x1xf32> to vector<16x128xf32>
    %182 = arith.subf %167, %181 : vector<16x128xf32>
    %cst_93 = arith.constant 9.99999974E-6 : f32
    %183 = vector.broadcast %cst_93 : f32 to vector<16x1xf32>
    %184 = arith.addf %180, %183 : vector<16x1xf32>
    %185 = math.rsqrt %184 : vector<16x1xf32>
    %186 = vector.broadcast %185 : vector<16x1xf32> to vector<16x128xf32>
    %187 = arith.mulf %182, %186 : vector<16x128xf32>
    %188 = vector.broadcast %2 : vector<16x1xf32> to vector<16x128xf32>
    %189 = arith.mulf %187, %188 : vector<16x128xf32>
    %190 = vector.broadcast %3 : vector<16x1xf32> to vector<16x128xf32>
    %191 = arith.addf %189, %190 : vector<16x128xf32>
    %cst_94 = arith.constant 2.000000e-01 : f32
    %192 = vector.broadcast %cst_94 : f32 to vector<16x128xf32>
    %193 = arith.mulf %192, %191 : vector<16x128xf32>
    %194 = arith.maximumf %191, %193 : vector<16x128xf32>
    %195 = tpu.iota {dimensions = array<i32: 0>} : vector<128x1xi32>
    %c0_95 = arith.constant 0 : index
    %c0_96 = arith.constant 0 : index
    %196 = vector.load %arg6[%c0_95, %c0_96] : memref<16x128xi32, #tpu.memory_space<vmem>>, vector<1x128xi32>
    %197 = vector.broadcast %195 : vector<128x1xi32> to vector<128x128xi32>
    %198 = vector.broadcast %196 : vector<1x128xi32> to vector<128x128xi32>
    %199 = arith.cmpi eq, %197, %198 : vector<128x128xi32>
    %cst_97 = arith.constant 1.000000e+00 : f32
    %cst_98 = arith.constant 0.000000e+00 : f32
    %200 = vector.broadcast %cst_97 : f32 to vector<128x128xf32>
    %201 = vector.broadcast %cst_98 : f32 to vector<128x128xf32>
    %202 = arith.select %199, %200, %201 : vector<128x128xi1>, vector<128x128xf32>
    %cst_99 = arith.constant dense<0.000000e+00> : vector<16x128xf32>
    %203 = tpu.matmul %194, %202, %cst_99 {dimension_numbers = #tpu.dot_dimension_numbers<[1], [0], [0], [1], [0, 0, 1, 1], [], []>} : vector<16x128xf32>, vector<128x128xf32>, vector<16x128xf32> -> vector<16x128xf32>
    %c1_100 = arith.constant 1 : index
    %c0_101 = arith.constant 0 : index
    %204 = vector.load %arg6[%c1_100, %c0_101] : memref<16x128xi32, #tpu.memory_space<vmem>>, vector<1x128xi32>
    %205 = vector.broadcast %195 : vector<128x1xi32> to vector<128x128xi32>
    %206 = vector.broadcast %204 : vector<1x128xi32> to vector<128x128xi32>
    %207 = arith.cmpi eq, %205, %206 : vector<128x128xi32>
    %cst_102 = arith.constant 1.000000e+00 : f32
    %cst_103 = arith.constant 0.000000e+00 : f32
    %208 = vector.broadcast %cst_102 : f32 to vector<128x128xf32>
    %209 = vector.broadcast %cst_103 : f32 to vector<128x128xf32>
    %210 = arith.select %207, %208, %209 : vector<128x128xi1>, vector<128x128xf32>
    %cst_104 = arith.constant dense<0.000000e+00> : vector<16x128xf32>
    %211 = tpu.matmul %194, %210, %cst_104 {dimension_numbers = #tpu.dot_dimension_numbers<[1], [0], [0], [1], [0, 0, 1, 1], [], []>} : vector<16x128xf32>, vector<128x128xf32>, vector<16x128xf32> -> vector<16x128xf32>
    %c2_105 = arith.constant 2 : index
    %c0_106 = arith.constant 0 : index
    %212 = vector.load %arg6[%c2_105, %c0_106] : memref<16x128xi32, #tpu.memory_space<vmem>>, vector<1x128xi32>
    %213 = vector.broadcast %195 : vector<128x1xi32> to vector<128x128xi32>
    %214 = vector.broadcast %212 : vector<1x128xi32> to vector<128x128xi32>
    %215 = arith.cmpi eq, %213, %214 : vector<128x128xi32>
    %cst_107 = arith.constant 1.000000e+00 : f32
    %cst_108 = arith.constant 0.000000e+00 : f32
    %216 = vector.broadcast %cst_107 : f32 to vector<128x128xf32>
    %217 = vector.broadcast %cst_108 : f32 to vector<128x128xf32>
    %218 = arith.select %215, %216, %217 : vector<128x128xi1>, vector<128x128xf32>
    %cst_109 = arith.constant dense<0.000000e+00> : vector<16x128xf32>
    %219 = tpu.matmul %194, %218, %cst_109 {dimension_numbers = #tpu.dot_dimension_numbers<[1], [0], [0], [1], [0, 0, 1, 1], [], []>} : vector<16x128xf32>, vector<128x128xf32>, vector<16x128xf32> -> vector<16x128xf32>
    %c3_110 = arith.constant 3 : index
    %c0_111 = arith.constant 0 : index
    %220 = vector.load %arg6[%c3_110, %c0_111] : memref<16x128xi32, #tpu.memory_space<vmem>>, vector<1x128xi32>
    %221 = vector.broadcast %195 : vector<128x1xi32> to vector<128x128xi32>
    %222 = vector.broadcast %220 : vector<1x128xi32> to vector<128x128xi32>
    %223 = arith.cmpi eq, %221, %222 : vector<128x128xi32>
    %cst_112 = arith.constant 1.000000e+00 : f32
    %cst_113 = arith.constant 0.000000e+00 : f32
    %224 = vector.broadcast %cst_112 : f32 to vector<128x128xf32>
    %225 = vector.broadcast %cst_113 : f32 to vector<128x128xf32>
    %226 = arith.select %223, %224, %225 : vector<128x128xi1>, vector<128x128xf32>
    %cst_114 = arith.constant dense<0.000000e+00> : vector<16x128xf32>
    %227 = tpu.matmul %194, %226, %cst_114 {dimension_numbers = #tpu.dot_dimension_numbers<[1], [0], [0], [1], [0, 0, 1, 1], [], []>} : vector<16x128xf32>, vector<128x128xf32>, vector<16x128xf32> -> vector<16x128xf32>
    %c4_115 = arith.constant 4 : index
    %c0_116 = arith.constant 0 : index
    %228 = vector.load %arg6[%c4_115, %c0_116] : memref<16x128xi32, #tpu.memory_space<vmem>>, vector<1x128xi32>
    %229 = vector.broadcast %195 : vector<128x1xi32> to vector<128x128xi32>
    %230 = vector.broadcast %228 : vector<1x128xi32> to vector<128x128xi32>
    %231 = arith.cmpi eq, %229, %230 : vector<128x128xi32>
    %cst_117 = arith.constant 1.000000e+00 : f32
    %cst_118 = arith.constant 0.000000e+00 : f32
    %232 = vector.broadcast %cst_117 : f32 to vector<128x128xf32>
    %233 = vector.broadcast %cst_118 : f32 to vector<128x128xf32>
    %234 = arith.select %231, %232, %233 : vector<128x128xi1>, vector<128x128xf32>
    %cst_119 = arith.constant dense<0.000000e+00> : vector<16x128xf32>
    %235 = tpu.matmul %194, %234, %cst_119 {dimension_numbers = #tpu.dot_dimension_numbers<[1], [0], [0], [1], [0, 0, 1, 1], [], []>} : vector<16x128xf32>, vector<128x128xf32>, vector<16x128xf32> -> vector<16x128xf32>
    %c5_120 = arith.constant 5 : index
    %c0_121 = arith.constant 0 : index
    %236 = vector.load %arg6[%c5_120, %c0_121] : memref<16x128xi32, #tpu.memory_space<vmem>>, vector<1x128xi32>
    %237 = vector.broadcast %195 : vector<128x1xi32> to vector<128x128xi32>
    %238 = vector.broadcast %236 : vector<1x128xi32> to vector<128x128xi32>
    %239 = arith.cmpi eq, %237, %238 : vector<128x128xi32>
    %cst_122 = arith.constant 1.000000e+00 : f32
    %cst_123 = arith.constant 0.000000e+00 : f32
    %240 = vector.broadcast %cst_122 : f32 to vector<128x128xf32>
    %241 = vector.broadcast %cst_123 : f32 to vector<128x128xf32>
    %242 = arith.select %239, %240, %241 : vector<128x128xi1>, vector<128x128xf32>
    %cst_124 = arith.constant dense<0.000000e+00> : vector<16x128xf32>
    %243 = tpu.matmul %194, %242, %cst_124 {dimension_numbers = #tpu.dot_dimension_numbers<[1], [0], [0], [1], [0, 0, 1, 1], [], []>} : vector<16x128xf32>, vector<128x128xf32>, vector<16x128xf32> -> vector<16x128xf32>
    %c6_125 = arith.constant 6 : index
    %c0_126 = arith.constant 0 : index
    %244 = vector.load %arg6[%c6_125, %c0_126] : memref<16x128xi32, #tpu.memory_space<vmem>>, vector<1x128xi32>
    %245 = vector.broadcast %195 : vector<128x1xi32> to vector<128x128xi32>
    %246 = vector.broadcast %244 : vector<1x128xi32> to vector<128x128xi32>
    %247 = arith.cmpi eq, %245, %246 : vector<128x128xi32>
    %cst_127 = arith.constant 1.000000e+00 : f32
    %cst_128 = arith.constant 0.000000e+00 : f32
    %248 = vector.broadcast %cst_127 : f32 to vector<128x128xf32>
    %249 = vector.broadcast %cst_128 : f32 to vector<128x128xf32>
    %250 = arith.select %247, %248, %249 : vector<128x128xi1>, vector<128x128xf32>
    %cst_129 = arith.constant dense<0.000000e+00> : vector<16x128xf32>
    %251 = tpu.matmul %194, %250, %cst_129 {dimension_numbers = #tpu.dot_dimension_numbers<[1], [0], [0], [1], [0, 0, 1, 1], [], []>} : vector<16x128xf32>, vector<128x128xf32>, vector<16x128xf32> -> vector<16x128xf32>
    %c7_130 = arith.constant 7 : index
    %c0_131 = arith.constant 0 : index
    %252 = vector.load %arg6[%c7_130, %c0_131] : memref<16x128xi32, #tpu.memory_space<vmem>>, vector<1x128xi32>
    %253 = vector.broadcast %195 : vector<128x1xi32> to vector<128x128xi32>
    %254 = vector.broadcast %252 : vector<1x128xi32> to vector<128x128xi32>
    %255 = arith.cmpi eq, %253, %254 : vector<128x128xi32>
    %cst_132 = arith.constant 1.000000e+00 : f32
    %cst_133 = arith.constant 0.000000e+00 : f32
    %256 = vector.broadcast %cst_132 : f32 to vector<128x128xf32>
    %257 = vector.broadcast %cst_133 : f32 to vector<128x128xf32>
    %258 = arith.select %255, %256, %257 : vector<128x128xi1>, vector<128x128xf32>
    %cst_134 = arith.constant dense<0.000000e+00> : vector<16x128xf32>
    %259 = tpu.matmul %194, %258, %cst_134 {dimension_numbers = #tpu.dot_dimension_numbers<[1], [0], [0], [1], [0, 0, 1, 1], [], []>} : vector<16x128xf32>, vector<128x128xf32>, vector<16x128xf32> -> vector<16x128xf32>
    %c8_135 = arith.constant 8 : index
    %c0_136 = arith.constant 0 : index
    %260 = vector.load %arg6[%c8_135, %c0_136] : memref<16x128xi32, #tpu.memory_space<vmem>>, vector<1x128xi32>
    %261 = vector.broadcast %195 : vector<128x1xi32> to vector<128x128xi32>
    %262 = vector.broadcast %260 : vector<1x128xi32> to vector<128x128xi32>
    %263 = arith.cmpi eq, %261, %262 : vector<128x128xi32>
    %cst_137 = arith.constant 1.000000e+00 : f32
    %cst_138 = arith.constant 0.000000e+00 : f32
    %264 = vector.broadcast %cst_137 : f32 to vector<128x128xf32>
    %265 = vector.broadcast %cst_138 : f32 to vector<128x128xf32>
    %266 = arith.select %263, %264, %265 : vector<128x128xi1>, vector<128x128xf32>
    %cst_139 = arith.constant dense<0.000000e+00> : vector<16x128xf32>
    %267 = tpu.matmul %194, %266, %cst_139 {dimension_numbers = #tpu.dot_dimension_numbers<[1], [0], [0], [1], [0, 0, 1, 1], [], []>} : vector<16x128xf32>, vector<128x128xf32>, vector<16x128xf32> -> vector<16x128xf32>
    %c9_140 = arith.constant 9 : index
    %c0_141 = arith.constant 0 : index
    %268 = vector.load %arg6[%c9_140, %c0_141] : memref<16x128xi32, #tpu.memory_space<vmem>>, vector<1x128xi32>
    %269 = vector.broadcast %195 : vector<128x1xi32> to vector<128x128xi32>
    %270 = vector.broadcast %268 : vector<1x128xi32> to vector<128x128xi32>
    %271 = arith.cmpi eq, %269, %270 : vector<128x128xi32>
    %cst_142 = arith.constant 1.000000e+00 : f32
    %cst_143 = arith.constant 0.000000e+00 : f32
    %272 = vector.broadcast %cst_142 : f32 to vector<128x128xf32>
    %273 = vector.broadcast %cst_143 : f32 to vector<128x128xf32>
    %274 = arith.select %271, %272, %273 : vector<128x128xi1>, vector<128x128xf32>
    %cst_144 = arith.constant dense<0.000000e+00> : vector<16x128xf32>
    %275 = tpu.matmul %194, %274, %cst_144 {dimension_numbers = #tpu.dot_dimension_numbers<[1], [0], [0], [1], [0, 0, 1, 1], [], []>} : vector<16x128xf32>, vector<128x128xf32>, vector<16x128xf32> -> vector<16x128xf32>
    %c10_145 = arith.constant 10 : index
    %c0_146 = arith.constant 0 : index
    %276 = vector.load %arg6[%c10_145, %c0_146] : memref<16x128xi32, #tpu.memory_space<vmem>>, vector<1x128xi32>
    %277 = vector.broadcast %195 : vector<128x1xi32> to vector<128x128xi32>
    %278 = vector.broadcast %276 : vector<1x128xi32> to vector<128x128xi32>
    %279 = arith.cmpi eq, %277, %278 : vector<128x128xi32>
    %cst_147 = arith.constant 1.000000e+00 : f32
    %cst_148 = arith.constant 0.000000e+00 : f32
    %280 = vector.broadcast %cst_147 : f32 to vector<128x128xf32>
    %281 = vector.broadcast %cst_148 : f32 to vector<128x128xf32>
    %282 = arith.select %279, %280, %281 : vector<128x128xi1>, vector<128x128xf32>
    %cst_149 = arith.constant dense<0.000000e+00> : vector<16x128xf32>
    %283 = tpu.matmul %194, %282, %cst_149 {dimension_numbers = #tpu.dot_dimension_numbers<[1], [0], [0], [1], [0, 0, 1, 1], [], []>} : vector<16x128xf32>, vector<128x128xf32>, vector<16x128xf32> -> vector<16x128xf32>
    %c11_150 = arith.constant 11 : index
    %c0_151 = arith.constant 0 : index
    %284 = vector.load %arg6[%c11_150, %c0_151] : memref<16x128xi32, #tpu.memory_space<vmem>>, vector<1x128xi32>
    %285 = vector.broadcast %195 : vector<128x1xi32> to vector<128x128xi32>
    %286 = vector.broadcast %284 : vector<1x128xi32> to vector<128x128xi32>
    %287 = arith.cmpi eq, %285, %286 : vector<128x128xi32>
    %cst_152 = arith.constant 1.000000e+00 : f32
    %cst_153 = arith.constant 0.000000e+00 : f32
    %288 = vector.broadcast %cst_152 : f32 to vector<128x128xf32>
    %289 = vector.broadcast %cst_153 : f32 to vector<128x128xf32>
    %290 = arith.select %287, %288, %289 : vector<128x128xi1>, vector<128x128xf32>
    %cst_154 = arith.constant dense<0.000000e+00> : vector<16x128xf32>
    %291 = tpu.matmul %194, %290, %cst_154 {dimension_numbers = #tpu.dot_dimension_numbers<[1], [0], [0], [1], [0, 0, 1, 1], [], []>} : vector<16x128xf32>, vector<128x128xf32>, vector<16x128xf32> -> vector<16x128xf32>
    %c12_155 = arith.constant 12 : index
    %c0_156 = arith.constant 0 : index
    %292 = vector.load %arg6[%c12_155, %c0_156] : memref<16x128xi32, #tpu.memory_space<vmem>>, vector<1x128xi32>
    %293 = vector.broadcast %195 : vector<128x1xi32> to vector<128x128xi32>
    %294 = vector.broadcast %292 : vector<1x128xi32> to vector<128x128xi32>
    %295 = arith.cmpi eq, %293, %294 : vector<128x128xi32>
    %cst_157 = arith.constant 1.000000e+00 : f32
    %cst_158 = arith.constant 0.000000e+00 : f32
    %296 = vector.broadcast %cst_157 : f32 to vector<128x128xf32>
    %297 = vector.broadcast %cst_158 : f32 to vector<128x128xf32>
    %298 = arith.select %295, %296, %297 : vector<128x128xi1>, vector<128x128xf32>
    %cst_159 = arith.constant dense<0.000000e+00> : vector<16x128xf32>
    %299 = tpu.matmul %194, %298, %cst_159 {dimension_numbers = #tpu.dot_dimension_numbers<[1], [0], [0], [1], [0, 0, 1, 1], [], []>} : vector<16x128xf32>, vector<128x128xf32>, vector<16x128xf32> -> vector<16x128xf32>
    %c13_160 = arith.constant 13 : index
    %c0_161 = arith.constant 0 : index
    %300 = vector.load %arg6[%c13_160, %c0_161] : memref<16x128xi32, #tpu.memory_space<vmem>>, vector<1x128xi32>
    %301 = vector.broadcast %195 : vector<128x1xi32> to vector<128x128xi32>
    %302 = vector.broadcast %300 : vector<1x128xi32> to vector<128x128xi32>
    %303 = arith.cmpi eq, %301, %302 : vector<128x128xi32>
    %cst_162 = arith.constant 1.000000e+00 : f32
    %cst_163 = arith.constant 0.000000e+00 : f32
    %304 = vector.broadcast %cst_162 : f32 to vector<128x128xf32>
    %305 = vector.broadcast %cst_163 : f32 to vector<128x128xf32>
    %306 = arith.select %303, %304, %305 : vector<128x128xi1>, vector<128x128xf32>
    %cst_164 = arith.constant dense<0.000000e+00> : vector<16x128xf32>
    %307 = tpu.matmul %194, %306, %cst_164 {dimension_numbers = #tpu.dot_dimension_numbers<[1], [0], [0], [1], [0, 0, 1, 1], [], []>} : vector<16x128xf32>, vector<128x128xf32>, vector<16x128xf32> -> vector<16x128xf32>
    %c14_165 = arith.constant 14 : index
    %c0_166 = arith.constant 0 : index
    %308 = vector.load %arg6[%c14_165, %c0_166] : memref<16x128xi32, #tpu.memory_space<vmem>>, vector<1x128xi32>
    %309 = vector.broadcast %195 : vector<128x1xi32> to vector<128x128xi32>
    %310 = vector.broadcast %308 : vector<1x128xi32> to vector<128x128xi32>
    %311 = arith.cmpi eq, %309, %310 : vector<128x128xi32>
    %cst_167 = arith.constant 1.000000e+00 : f32
    %cst_168 = arith.constant 0.000000e+00 : f32
    %312 = vector.broadcast %cst_167 : f32 to vector<128x128xf32>
    %313 = vector.broadcast %cst_168 : f32 to vector<128x128xf32>
    %314 = arith.select %311, %312, %313 : vector<128x128xi1>, vector<128x128xf32>
    %cst_169 = arith.constant dense<0.000000e+00> : vector<16x128xf32>
    %315 = tpu.matmul %194, %314, %cst_169 {dimension_numbers = #tpu.dot_dimension_numbers<[1], [0], [0], [1], [0, 0, 1, 1], [], []>} : vector<16x128xf32>, vector<128x128xf32>, vector<16x128xf32> -> vector<16x128xf32>
    %c15_170 = arith.constant 15 : index
    %c0_171 = arith.constant 0 : index
    %316 = vector.load %arg6[%c15_170, %c0_171] : memref<16x128xi32, #tpu.memory_space<vmem>>, vector<1x128xi32>
    %317 = vector.broadcast %195 : vector<128x1xi32> to vector<128x128xi32>
    %318 = vector.broadcast %316 : vector<1x128xi32> to vector<128x128xi32>
    %319 = arith.cmpi eq, %317, %318 : vector<128x128xi32>
    %cst_172 = arith.constant 1.000000e+00 : f32
    %cst_173 = arith.constant 0.000000e+00 : f32
    %320 = vector.broadcast %cst_172 : f32 to vector<128x128xf32>
    %321 = vector.broadcast %cst_173 : f32 to vector<128x128xf32>
    %322 = arith.select %319, %320, %321 : vector<128x128xi1>, vector<128x128xf32>
    %cst_174 = arith.constant dense<0.000000e+00> : vector<16x128xf32>
    %323 = tpu.matmul %194, %322, %cst_174 {dimension_numbers = #tpu.dot_dimension_numbers<[1], [0], [0], [1], [0, 0, 1, 1], [], []>} : vector<16x128xf32>, vector<128x128xf32>, vector<16x128xf32> -> vector<16x128xf32>
    %324 = tpu.concatenate %203, %211, %219, %227, %235, %243, %251, %259, %267, %275, %283, %291, %299, %307, %315, %323 in 0 : vector<16x128xf32>, vector<16x128xf32>, vector<16x128xf32>, vector<16x128xf32>, vector<16x128xf32>, vector<16x128xf32>, vector<16x128xf32>, vector<16x128xf32>, vector<16x128xf32>, vector<16x128xf32>, vector<16x128xf32>, vector<16x128xf32>, vector<16x128xf32>, vector<16x128xf32>, vector<16x128xf32>, vector<16x128xf32> -> vector<256x128xf32>
    %c0_175 = arith.constant 0 : index
    %c0_176 = arith.constant 0 : index
    %325 = vector.load %arg4[%c0_175, %c0_176] : memref<1x256xf32, #tpu.memory_space<vmem>>, vector<1x256xf32>
    %cst_177 = arith.constant dense<0.000000e+00> : vector<1x128xf32>
    %326 = tpu.matmul %325, %324, %cst_177 {dimension_numbers = #tpu.dot_dimension_numbers<[1], [0], [0], [1], [0, 0, 1, 1], [], []>} : vector<1x256xf32>, vector<256x128xf32>, vector<1x128xf32> -> vector<1x128xf32>
    %327 = vector.broadcast %4 : vector<1x1xf32> to vector<1x128xf32>
    %328 = arith.addf %326, %327 : vector<1x128xf32>
    %c0_178 = arith.constant 0 : index
    %c0_179 = arith.constant 0 : index
    %329 = vector.load %arg8[%c0_178, %c0_179] : memref<1x128xf32, #tpu.memory_space<vmem>>, vector<1x128xf32>
    tpu.vector_store %arg8[%c0_178, %c0_179], %328 {strides = array<i32>} : memref<1x128xf32, #tpu.memory_space<vmem>>, vector<1x128xf32>,
    return
  }
  func.func @transform_0(%arg0: i32) -> (i32, i32) {
    %c0_i32 = arith.constant 0 : i32
    %c0_i32_0 = arith.constant 0 : i32
    %c0_i32_1 = arith.constant 0 : i32
    return %c0_i32, %c0_i32_0 : i32, i32
  }
  func.func @transform_1(%arg0: i32) -> (i32, i32) {
    %c0_i32 = arith.constant 0 : i32
    %c0_i32_0 = arith.constant 0 : i32
    %c0_i32_1 = arith.constant 0 : i32
    return %c0_i32, %c0_i32_0 : i32, i32
  }
  func.func @transform_2(%arg0: i32) -> (i32, i32) {
    %c0_i32 = arith.constant 0 : i32
    %c0_i32_0 = arith.constant 0 : i32
    %c0_i32_1 = arith.constant 0 : i32
    return %c0_i32, %c0_i32_0 : i32, i32
  }
  func.func @transform_3(%arg0: i32) -> (i32, i32) {
    %c0_i32 = arith.constant 0 : i32
    %c0_i32_0 = arith.constant 0 : i32
    %c0_i32_1 = arith.constant 0 : i32
    return %c0_i32, %c0_i32_0 : i32, i32
  }
  func.func @transform_4(%arg0: i32) -> (i32, i32) {
    %c0_i32 = arith.constant 0 : i32
    %c0_i32_0 = arith.constant 0 : i32
    %c0_i32_1 = arith.constant 0 : i32
    return %c0_i32, %c0_i32_0 : i32, i32
  }
  func.func @transform_5(%arg0: i32) -> (i32, i32) {
    %c0_i32 = arith.constant 0 : i32
    %c0_i32_0 = arith.constant 0 : i32
    %c0_i32_1 = arith.constant 0 : i32
    return %c0_i32, %c0_i32_0 : i32, i32
  }
  func.func @transform_6(%arg0: i32) -> (i32, i32) {
    %c0_i32 = arith.constant 0 : i32
    %c0_i32_0 = arith.constant 0 : i32
    %c0_i32_1 = arith.constant 0 : i32
    return %c0_i32, %c0_i32_0 : i32, i32
  }
  func.func @transform_7(%arg0: i32) -> (i32, i32) {
    %c0_i32 = arith.constant 0 : i32
    %c0_i32_0 = arith.constant 0 : i32
    %c0_i32_1 = arith.constant 0 : i32
    return %c0_i32, %c0_i32_0 : i32, i32
  }
}

</mosaic_0001>

<bundles_post_ra>
// kernel: _lambda_.1
= control target key start
LH: loop header
LB: loop body
LE: loop exit
PB: predicated region body
PF: predicated region fallthrough
CT: control target
= control target key end

     0   :  { %vm51_vm0 = vcmask 130048   ;;  %v148_v11 = vlaneseq  ;;  %v4909_v12 = vmov 0   ;;  %v8737_v24 = vmov 1.0   ;;  %s8729_s0 = inlined_call_operand.vmem [shape: bf16[16,384], index: 0, kind: input, shape index: {}]   ;;  %s8730_s1 = inlined_call_operand.vmem [shape: bf16[8,16], index: 1, kind: input, shape index: {}]   ;;  %s8731_s4 = inlined_call_operand.vmem [shape: s32[16,128], index: 4, kind: input, shape index: {}]   ;;  %s8732_s6 = inlined_call_operand.vmem [shape: f32[16,8], index: 6, kind: input, shape index: {}]   ;;  %s8733_s2 = inlined_call_operand.vmem [shape: bf16[16,128], index: 2, kind: input, shape index: {}]   ;;  %s8734_s5 = inlined_call_operand.vmem [shape: s32[16,128], index: 5, kind: input, shape index: {}]   ;;  %s8735_s3 = inlined_call_operand.vmem [shape: f32[1,256], index: 3, kind: input, shape index: {}]   ;;  %s8736_s7 = inlined_call_operand.vmem [shape: f32[1,128], index: 7, kind: output, shape index: {}]  }
   0x1   :  { %v3796_v0 = vld [vmem:[%s8729_s0] sm:$0xf]  ;;  %v4838_v1 = vld [vmem:[%s8729_s0 + $0x8] sm:$0xf0]  ;;  %v4837_v2 = vld [vmem:[%s8729_s0 + $0x4] sm:$0xf]  ;;  %4863 = vset.pattern.permute.xlu1 %v4909_v12 }
   0x2   :  { %v3797_v3 = vor.u32 %v4838_v1, %v3796_v0  ;;  %v3798_v4 = vld [vmem:[%s8729_s0 + $0xc] sm:$0xf0]  ;;  %v3804_v5 = vld [vmem:[%s8729_s0 + $0x8] sm:$0xf]  ;;  %v4839_v6 = vld [vmem:[%s8729_s0 + $0x10] sm:$0xf0] }
   0x3   :  { %v3801_v7 = vor.u32 %v4837_v2, %v3798_v4  ;;  %v3805_v8 = vor.u32 %v4839_v6, %v3804_v5  ;;  %v30_v9 = vld [vmem:[%s8730_s1] sm:$0xf]  ;;  %v4979_v13 = vshrl.u32 %v148_v11, 7  ;;  %v4911_v29 = vmov 1  }
   0x4   :  { %62 = vmatpush.bf16.msra.mxu0 %v3797_v3  ;;  %v27_v10 = vld [vmem:[%s8732_s6] sm:$0xff] }
   0x5   :  { %75 = vmatpush.bf16.msra.mxu1 %v3801_v7  ;;  %88 = vmatpush.bf16.msra.mxu2 %v3805_v8  ;;  %8765 = vst [vmem:[#allocation2_spill] sm:$0xff] %v4979_v13  ;;  %v4984_v14 = vld [vmem:[%s8731_s4] ss:$0 sm:$0xff]  ;;  %v4989_v15 = vld [vmem:[%s8731_s4 + $0x1] ss:$0 sm:$0xff]  ;;  %v4992_v16 = vadd.s32 120, %v4979_v13 }
   0x6   :  { %129 = vperm.xlu1 %4863, %v27_v10   ;;  %v4995_v17 = vadd.s32 248, %v4979_v13  ;;  %v4998_v18 = vadd.s32 376, %v4979_v13  ;;  %v5001_v19 = vadd.s32 112, %v4979_v13  ;;  %v5004_v20 = vadd.s32 240, %v4979_v13 }
   0x7   :  { %3806 = vmatmul.msk.bf16.vlgmr.msra.gmra.mxu0 %vm51_vm0, %v30_v9  ;;  %v5007_v21 = vadd.s32 368, %v4979_v13  ;;  %v5010_v22 = vadd.s32 104, %v4979_v13  ;;  %v5013_v23 = vadd.s32 232, %v4979_v13  ;;  %vm214_vm1 = vcmp.eq.s32.totalorder %v4992_v16, %v4984_v14 }
   0x8   :  { %3807 = vmatmul.msk.bf16.vlgmr.msra.gmra.mxu1 %vm51_vm0, %v30_v9  ;;  %3808 = vmatmul.msk.bf16.vlgmr.msra.gmra.mxu2 %vm51_vm0, %v30_v9  ;;  %vm230_vm2 = vcmp.eq.s32.totalorder %v4995_v17, %v4984_v14  ;;  %vm246_vm3 = vcmp.eq.s32.totalorder %v4998_v18, %v4984_v14  ;;  %vm372_vm4 = vcmp.eq.s32.totalorder %v4992_v16, %v4989_v15  ;;  %v5032_v25 = vadd.s32 360, %v4979_v13 }
   0x9   :  { %3809 = vmatpush.msk.msra.mxu3 %vm214_vm1, %v8737_v24  ;;  %3825 = vmatpush.msk.msrb.mxu0 %vm230_vm2, %v8737_v24  ;;  %vm213_vm5 = vcmp.eq.s32.totalorder %v5001_v19, %v4984_v14  ;;  %vm229_vm6 = vcmp.eq.s32.totalorder %v5004_v20, %v4984_v14  ;;  %vm245_vm7 = vcmp.eq.s32.totalorder %v5007_v21, %v4984_v14  ;;  %v5039_v26 = vadd.s32 96, %v4979_v13 }
   0xa   :  { %3841 = vmatpush.msk.msrb.mxu1 %vm246_vm3, %v8737_v24  ;;  %3857 = vmatpush.msk.msrb.mxu2 %vm372_vm4, %v8737_v24  ;;  %vm371_vm8 = vcmp.eq.s32.totalorder %v5001_v19, %v4989_v15  ;;  %vm212_vm9 = vcmp.eq.s32.totalorder %v5010_v22, %v4984_v14  ;;  %vm228_vm10 = vcmp.eq.s32.totalorder %v5013_v23, %v4984_v14  ;;  %v5048_v27 = vadd.s32 224, %v4979_v13 }
   0xb   :  { %3810 = vmatpush.msk.msra.mxu3 %vm213_vm5, %v8737_v24  ;;  %3826 = vmatpush.msk.msrb.mxu0 %vm229_vm6, %v8737_v24  ;;  %v5051_v28 = vadd.s32 352, %v4979_v13  ;;  %vm244_vm11 = vcmp.eq.s32.totalorder %v5032_v25, %v4984_v14  ;;  %vm370_vm12 = vcmp.eq.s32.totalorder %v5010_v22, %v4989_v15  ;;  %v5059_v30 = vadd.s32 88, %v4979_v13 }
   0xc   :  { %3842 = vmatpush.msk.msrb.mxu1 %vm245_vm7, %v8737_v24  ;;  %v5062_v31 = vadd.s32 216, %v4979_v13  ;;  %3858 = vmatpush.msk.msrb.mxu2 %vm371_vm8, %v8737_v24  ;;  %vm211_vm13 = vcmp.eq.s32.totalorder %v5039_v26, %v4984_v14  ;;  %vm227_vm14 = vcmp.eq.s32.totalorder %v5048_v27, %v4984_v14  ;;  %v5073_v32 = vadd.s32 344, %v4979_v13 }
   0xd   :  { %v5076_v33 = vadd.s32 80, %v4979_v13  ;;  %3811 = vmatpush.msk.msra.mxu3 %vm212_vm9, %v8737_v24  ;;  %3827 = vmatpush.msk.msrb.mxu0 %vm228_vm10, %v8737_v24  ;;  %vm243_vm15 = vcmp.eq.s32.totalorder %v5051_v28, %v4984_v14  ;;  %vm369_vm0 = vcmp.eq.s32.totalorder %v5039_v26, %v4989_v15  ;;  %v5091_v34 = vadd.s32 208, %v4979_v13 }
   0xe   :  { %4864 = vset.pattern.permute.xlu1 %v4911_v29  ;;  %3843 = vmatpush.msk.msrb.mxu1 %vm244_vm11, %v8737_v24  ;;  %vm210_vm1 = vcmp.eq.s32.totalorder %v5059_v30, %v4984_v14  ;;  %vm226_vm2 = vcmp.eq.s32.totalorder %v5062_v31, %v4984_v14  ;;  %vm368_vm3 = vcmp.eq.s32.totalorder %v5059_v30, %v4989_v15  ;;  %v5102_v35 = vadd.s32 336, %v4979_v13 }
   0xf   :  { %136 = vperm.xlu1 %4864, %v27_v10   ;;  %3859 = vmatpush.msk.msrb.mxu2 %vm370_vm12, %v8737_v24  ;;  %vm242_vm4 = vcmp.eq.s32.totalorder %v5073_v32, %v4984_v14  ;;  %v5117_v37 = vadd.s32 72, %v4979_v13  ;;  %v5120_v38 = vadd.s32 200, %v4979_v13  ;;  %v5123_v39 = vadd.s32 328, %v4979_v13 }
  0x10   :  { %3812 = vmatpush.msk.msra.mxu3 %vm211_vm13, %v8737_v24  ;;  %3828 = vmatpush.msk.msrb.mxu0 %vm227_vm14, %v8737_v24  ;;  %vm209_vm5 = vcmp.eq.s32.totalorder %v5076_v33, %v4984_v14  ;;  %vm225_vm6 = vcmp.eq.s32.totalorder %v5091_v34, %v4984_v14  ;;  %v5140_v41 = vadd.s32 64, %v4979_v13  ;;  %v5143_v42 = vadd.s32 192, %v4979_v13 }
  0x11   :  { %3844 = vmatpush.msk.msrb.mxu1 %vm243_vm15, %v8737_v24  ;;  %3860 = vmatpush.msk.msrb.mxu2 %vm369_vm0, %v8737_v24  ;;  %vm241_vm7 = vcmp.eq.s32.totalorder %v5102_v35, %v4984_v14  ;;  %vm367_vm8 = vcmp.eq.s32.totalorder %v5076_v33, %v4989_v15  ;;  %v5158_v43 = vadd.s32 320, %v4979_v13  ;;  %vm208_vm9 = vcmp.eq.s32.totalorder %v5117_v37, %v4984_v14 }
  0x12   :  { %3813 = vmatpush.msk.msra.mxu3 %vm210_vm1, %v8737_v24  ;;  %3829 = vmatpush.msk.msrb.mxu0 %vm226_vm2, %v8737_v24  ;;  %vm224_vm10 = vcmp.eq.s32.totalorder %v5120_v38, %v4984_v14  ;;  %v5173_v44 = vadd.s32 56, %v4979_v13  ;;  %vm240_vm11 = vcmp.eq.s32.totalorder %v5123_v39, %v4984_v14  ;;  %vm366_vm12 = vcmp.eq.s32.totalorder %v5117_v37, %v4989_v15 }
  0x13   :  { %3845 = vmatpush.msk.msrb.mxu1 %vm242_vm4, %v8737_v24  ;;  %3861 = vmatpush.msk.msrb.mxu2 %vm368_vm3, %v8737_v24  ;;  %v5184_v46 = vadd.s32 184, %v4979_v13  ;;  %vm207_vm13 = vcmp.eq.s32.totalorder %v5140_v41, %v4984_v14  ;;  %vm223_vm14 = vcmp.eq.s32.totalorder %v5143_v42, %v4984_v14  ;;  %v5193_v47 = vadd.s32 312, %v4979_v13 }
  0x14   :  { %3814 = vmatpush.msk.msra.mxu3 %vm209_vm5, %v8737_v24  ;;  %3830 = vmatpush.msk.msrb.mxu0 %vm225_vm6, %v8737_v24  ;;  %vm239_vm15 = vcmp.eq.s32.totalorder %v5158_v43, %v4984_v14  ;;  %vm365_vm0 = vcmp.eq.s32.totalorder %v5140_v41, %v4989_v15  ;;  %vm206_vm1 = vcmp.eq.s32.totalorder %v5173_v44, %v4984_v14  ;;  %v5229_v58 = vadd.s32 48, %v4979_v13 }
  0x15   :  { %3846 = vmatpush.msk.msrb.mxu1 %vm241_vm7, %v8737_v24  ;;  %3862 = vmatpush.msk.msrb.mxu2 %vm367_vm8, %v8737_v24  ;;  %vm222_vm2 = vcmp.eq.s32.totalorder %v5184_v46, %v4984_v14  ;;  %vm238_vm3 = vcmp.eq.s32.totalorder %v5193_v47, %v4984_v14  ;;  %vm364_vm4 = vcmp.eq.s32.totalorder %v5173_v44, %v4989_v15  ;;  %v5232_v59 = vadd.s32 176, %v4979_v13 }
  0x16   :  { %3815 = vmatpush.msk.msra.mxu3 %vm208_vm9, %v8737_v24  ;;  %3831 = vmatpush.msk.msrb.mxu0 %vm224_vm10, %v8737_v24  ;;  %v5235_v60 = vadd.s32 304, %v4979_v13  ;;  %vm205_vm5 = vcmp.eq.s32.totalorder %v5229_v58, %v4984_v14  ;;  %vm363_vm8 = vcmp.eq.s32.totalorder %v5229_v58, %v4989_v15  ;;  %v5248_v61 = vadd.s32 40, %v4979_v13 }
  0x17   :  { %3847 = vmatpush.msk.msrb.mxu1 %vm240_vm11, %v8737_v24  ;;  %3863 = vmatpush.msk.msrb.mxu2 %vm366_vm12, %v8737_v24  ;;  %vm221_vm6 = vcmp.eq.s32.totalorder %v5232_v59, %v4984_v14  ;;  %v5251_v62 = vadd.s32 168, %v4979_v13  ;;  %v5254_v63 = vadd.s32 296, %v4979_v13  ;;  %v5257_v0 = vadd.s32 32, %v4979_v13 }
  0x18   :  { %3816 = vmatpush.msk.msra.mxu3 %vm207_vm13, %v8737_v24  ;;  %3832 = vmatpush.msk.msrb.mxu0 %vm223_vm14, %v8737_v24  ;;  %vm237_vm7 = vcmp.eq.s32.totalorder %v5235_v60, %v4984_v14  ;;  %v5262_v1 = vadd.s32 160, %v4979_v13  ;;  %v5265_v2 = vadd.s32 288, %v4979_v13  ;;  %v5268_v3 = vadd.s32 24, %v4979_v13 }
  0x19   :  { %3848 = vmatpush.msk.msrb.mxu1 %vm239_vm15, %v8737_v24  ;;  %3864 = vmatpush.msk.msrb.mxu2 %vm365_vm0, %v8737_v24  ;;  %v5271_v4 = vadd.s32 152, %v4979_v13  ;;  %vm204_vm9 = vcmp.eq.s32.totalorder %v5248_v61, %v4984_v14  ;;  %vm220_vm10 = vcmp.eq.s32.totalorder %v5251_v62, %v4984_v14  ;;  %vm236_vm11 = vcmp.eq.s32.totalorder %v5254_v63, %v4984_v14 }
  0x1a   :  { %3817 = vmatpush.msk.msra.mxu3 %vm206_vm1, %v8737_v24  ;;  %3833 = vmatpush.msk.msrb.mxu0 %vm222_vm2, %v8737_v24  ;;  %vm362_vm12 = vcmp.eq.s32.totalorder %v5248_v61, %v4989_v15  ;;  %vm203_vm13 = vcmp.eq.s32.totalorder %v5257_v0, %v4984_v14  ;;  %vm219_vm14 = vcmp.eq.s32.totalorder %v5262_v1, %v4984_v14  ;;  %v5290_v5 = vadd.s32 280, %v4979_v13 }
  0x1b   :  { %3849 = vmatpush.msk.msrb.mxu1 %vm238_vm3, %v8737_v24  ;;  %3865 = vmatpush.msk.msrb.mxu2 %vm364_vm4, %v8737_v24  ;;  %vm235_vm15 = vcmp.eq.s32.totalorder %v5265_v2, %v4984_v14  ;;  %vm361_vm0 = vcmp.eq.s32.totalorder %v5257_v0, %v4989_v15  ;;  %vm202_vm1 = vcmp.eq.s32.totalorder %v5268_v3, %v4984_v14  ;;  %v5307_v6 = vadd.s32 16, %v4979_v13 }
  0x1c   :  { %3818 = vmatpush.msk.msra.mxu3 %vm205_vm5, %v8737_v24  ;;  %3834 = vmatpush.msk.msrb.mxu0 %vm221_vm6, %v8737_v24  ;;  %vm218_vm2 = vcmp.eq.s32.totalorder %v5271_v4, %v4984_v14  ;;  %vm234_vm3 = vcmp.eq.s32.totalorder %v5290_v5, %v4984_v14  ;;  %vm360_vm4 = vcmp.eq.s32.totalorder %v5268_v3, %v4989_v15  ;;  %v5310_v7 = vadd.s32 144, %v4979_v13 }
  0x1d   :  { %3850 = vmatpush.msk.msrb.mxu1 %vm237_vm7, %v8737_v24  ;;  %3866 = vmatpush.msk.msrb.mxu2 %vm363_vm8, %v8737_v24  ;;  %8766 = vst [vmem:[#allocation3_spill] sm:$0xff] %v5307_v6  ;;  %v5315_v8 = vadd.s32 272, %v4979_v13  ;;  %vm201_vm5 = vcmp.eq.s32.totalorder %v5307_v6, %v4984_v14  ;;  %vm359_vm7 = vcmp.eq.s32.totalorder %v5307_v6, %v4989_v15  ;;  %v5326_v9 = vadd.s32 8, %v4979_v13 }
  0x1e   :  { %3819 = vmatpush.msk.msra.mxu3 %vm204_vm9, %v8737_v24  ;;  %3835 = vmatpush.msk.msrb.mxu0 %vm220_vm10, %v8737_v24  ;;  %8767 = vst [vmem:[#allocation4_spill] sm:$0xff] %v5310_v7  ;;  %vm217_vm6 = vcmp.eq.s32.totalorder %v5310_v7, %v4984_v14  ;;  %v5333_v10 = vadd.s32 136, %v4979_v13  ;;  %v5336_v11 = vadd.s32 264, %v4979_v13  ;;  %v5345_v12 = vadd.s32 128, %v4979_v13 }
  0x1f   :  { %3851 = vmatpush.msk.msrb.mxu1 %vm236_vm11, %v8737_v24  ;;  %3867 = vmatpush.msk.msrb.mxu2 %vm362_vm12, %v8737_v24  ;;  %8768 = vst [vmem:[#allocation5_spill] sm:$0xff] %v5326_v9  ;;  %vm233_vm8 = vcmp.eq.s32.totalorder %v5315_v8, %v4984_v14  ;;  %vm200_vm9 = vcmp.eq.s32.totalorder %v5326_v9, %v4984_v14  ;;  %v5348_v29 = vadd.s32 256, %v4979_v13 }
  0x20   :  { %3820 = vmatpush.msk.msra.mxu3 %vm203_vm13, %v8737_v24  ;;  %3836 = vmatpush.msk.msrb.mxu0 %vm219_vm14, %v8737_v24  ;;  %8769 = vst [vmem:[#allocation6_spill] sm:$0xff] %v5333_v10  ;;  %vm358_vm10 = vcmp.eq.s32.totalorder %v5326_v9, %v4989_v15  ;;  %vm216_vm11 = vcmp.eq.s32.totalorder %v5333_v10, %v4984_v14 }
  0x21   :  { %3852 = vmatpush.msk.msrb.mxu1 %vm235_vm15, %v8737_v24  ;;  %3868 = vmatpush.msk.msrb.mxu2 %vm361_vm0, %v8737_v24  ;;  %8770 = vst [vmem:[#allocation7_spill] sm:$0xff] %v5336_v11  ;;  %vm232_vm12 = vcmp.eq.s32.totalorder %v5336_v11, %v4984_v14  ;;  %vm199_vm13 = vcmp.eq.s32.totalorder %v4979_v13, %v4984_v14 }
  0x22   :  { %3821 = vmatpush.msk.msra.mxu3 %vm202_vm1, %v8737_v24  ;;  %3837 = vmatpush.msk.msrb.mxu0 %vm218_vm2, %v8737_v24  ;;  %8771 = vst [vmem:[#allocation8_spill] sm:$0xff] %v5345_v12  ;;  %vm215_vm14 = vcmp.eq.s32.totalorder %v5345_v12, %v4984_v14  ;;  %vm231_vm15 = vcmp.eq.s32.totalorder %v5348_v29, %v4984_v14 }
  0x23   :  { %3853 = vmatpush.msk.msrb.mxu1 %vm234_vm3, %v8737_v24  ;;  %3869 = vmatpush.msk.msrb.mxu2 %vm360_vm4, %v8737_v24  ;;  %8772 = vst [vmem:[#allocation9_spill] sm:$0xff] %v5348_v29  ;;  %vm357_vm0 = vcmp.eq.s32.totalorder %v4979_v13, %v4989_v15  ;;  %vm388_vm1 = vcmp.eq.s32.totalorder %v4995_v17, %v4989_v15 }
  0x24   :  { %3822 = vmatpush.msk.msra.mxu3 %vm201_vm5, %v8737_v24  ;;  %3838 = vmatpush.msk.msrb.mxu0 %vm217_vm6, %v8737_v24  ;;  %vm404_vm2 = vcmp.eq.s32.totalorder %v4998_v18, %v4989_v15  ;;  %vm387_vm5 = vcmp.eq.s32.totalorder %v5004_v20, %v4989_v15  ;;  %vm403_vm6 = vcmp.eq.s32.totalorder %v5007_v21, %v4989_v15 }
  0x25   :  { %3854 = vmatpush.msk.msrb.mxu1 %vm233_vm8, %v8737_v24  ;;  %3870 = vmatpush.msk.msrb.mxu2 %vm359_vm7, %v8737_v24 }
  0x26   :  { %3823 = vmatpush.msk.msra.mxu3 %vm200_vm9, %v8737_v24  ;;  %3839 = vmatpush.msk.msrb.mxu0 %vm216_vm11, %v8737_v24  ;;  %vm386_vm9 = vcmp.eq.s32.totalorder %v5013_v23, %v4989_v15 }
  0x27   :  { %3855 = vmatpush.msk.msrb.mxu1 %vm232_vm12, %v8737_v24  ;;  %3871 = vmatpush.msk.msrb.mxu2 %vm358_vm10, %v8737_v24  ;;  %vm402_vm10 = vcmp.eq.s32.totalorder %v5032_v25, %v4989_v15 }
  0x28   :  { %3824 = vmatpush.msk.msra.mxu3 %vm199_vm13, %v8737_v24  ;;  %3840 = vmatpush.msk.msrb.mxu0 %vm215_vm14, %v8737_v24  ;;  %vm385_vm13 = vcmp.eq.s32.totalorder %v5048_v27, %v4989_v15  ;;  %vm401_vm14 = vcmp.eq.s32.totalorder %v5051_v28, %v4989_v15 }
  0x29   :  { %3856 = vmatpush.msk.msrb.mxu1 %vm231_vm15, %v8737_v24  ;;  %3872 = vmatpush.msk.msrb.mxu2 %vm357_vm0, %v8737_v24 }
  0x2a   :  { %3873 = vmatpush.msk.msrb.mxu3 %vm388_vm1, %v8737_v24  ;;  %3889 = vmatpush.msk.msra.mxu0 %vm404_vm2, %v8737_v24  ;;  %vm384_vm1 = vcmp.eq.s32.totalorder %v5062_v31, %v4989_v15  ;;  %vm400_vm2 = vcmp.eq.s32.totalorder %v5073_v32, %v4989_v15 }
  0x2c   :  { %3874 = vmatpush.msk.msrb.mxu3 %vm387_vm5, %v8737_v24  ;;  %3890 = vmatpush.msk.msra.mxu0 %vm403_vm6, %v8737_v24  ;;  %vm383_vm5 = vcmp.eq.s32.totalorder %v5091_v34, %v4989_v15  ;;  %vm399_vm6 = vcmp.eq.s32.totalorder %v5102_v35, %v4989_v15 }
  0x2e   :  { %3875 = vmatpush.msk.msrb.mxu3 %vm386_vm9, %v8737_v24  ;;  %3891 = vmatpush.msk.msra.mxu0 %vm402_vm10, %v8737_v24  ;;  %vm382_vm9 = vcmp.eq.s32.totalorder %v5120_v38, %v4989_v15  ;;  %vm398_vm10 = vcmp.eq.s32.totalorder %v5123_v39, %v4989_v15 }
  0x30   :  { %3876 = vmatpush.msk.msrb.mxu3 %vm385_vm13, %v8737_v24  ;;  %3892 = vmatpush.msk.msra.mxu0 %vm401_vm14, %v8737_v24  ;;  %vm381_vm13 = vcmp.eq.s32.totalorder %v5143_v42, %v4989_v15  ;;  %vm397_vm14 = vcmp.eq.s32.totalorder %v5158_v43, %v4989_v15 }
  0x32   :  { %3877 = vmatpush.msk.msrb.mxu3 %vm384_vm1, %v8737_v24  ;;  %3893 = vmatpush.msk.msra.mxu0 %vm400_vm2, %v8737_v24  ;;  %vm380_vm1 = vcmp.eq.s32.totalorder %v5184_v46, %v4989_v15  ;;  %vm396_vm2 = vcmp.eq.s32.totalorder %v5193_v47, %v4989_v15 }
  0x34   :  { %3878 = vmatpush.msk.msrb.mxu3 %vm383_vm5, %v8737_v24  ;;  %3894 = vmatpush.msk.msra.mxu0 %vm399_vm6, %v8737_v24  ;;  %vm379_vm5 = vcmp.eq.s32.totalorder %v5232_v59, %v4989_v15  ;;  %vm395_vm6 = vcmp.eq.s32.totalorder %v5235_v60, %v4989_v15 }
  0x36   :  { %3879 = vmatpush.msk.msrb.mxu3 %vm382_vm9, %v8737_v24  ;;  %3895 = vmatpush.msk.msra.mxu0 %vm398_vm10, %v8737_v24  ;;  %vm378_vm9 = vcmp.eq.s32.totalorder %v5251_v62, %v4989_v15  ;;  %vm394_vm10 = vcmp.eq.s32.totalorder %v5254_v63, %v4989_v15 }
  0x38   :  { %3880 = vmatpush.msk.msrb.mxu3 %vm381_vm13, %v8737_v24  ;;  %3896 = vmatpush.msk.msra.mxu0 %vm397_vm14, %v8737_v24  ;;  %vm377_vm13 = vcmp.eq.s32.totalorder %v5262_v1, %v4989_v15  ;;  %vm393_vm14 = vcmp.eq.s32.totalorder %v5265_v2, %v4989_v15 }
  0x3a   :  { %3881 = vmatpush.msk.msrb.mxu3 %vm380_vm1, %v8737_v24  ;;  %3897 = vmatpush.msk.msra.mxu0 %vm396_vm2, %v8737_v24  ;;  %vm376_vm1 = vcmp.eq.s32.totalorder %v5271_v4, %v4989_v15  ;;  %vm392_vm2 = vcmp.eq.s32.totalorder %v5290_v5, %v4989_v15 }
  0x3c   :  { %3882 = vmatpush.msk.msrb.mxu3 %vm379_vm5, %v8737_v24  ;;  %3898 = vmatpush.msk.msra.mxu0 %vm395_vm6, %v8737_v24  ;;  %vm375_vm5 = vcmp.eq.s32.totalorder %v5310_v7, %v4989_v15  ;;  %vm391_vm6 = vcmp.eq.s32.totalorder %v5315_v8, %v4989_v15 }
  0x3e   :  { %3883 = vmatpush.msk.msrb.mxu3 %vm378_vm9, %v8737_v24  ;;  %3899 = vmatpush.msk.msra.mxu0 %vm394_vm10, %v8737_v24  ;;  %vm374_vm9 = vcmp.eq.s32.totalorder %v5333_v10, %v4989_v15  ;;  %vm390_vm10 = vcmp.eq.s32.totalorder %v5336_v11, %v4989_v15 }
  0x40   :  { %3884 = vmatpush.msk.msrb.mxu3 %vm377_vm13, %v8737_v24  ;;  %3900 = vmatpush.msk.msra.mxu0 %vm393_vm14, %v8737_v24  ;;  %vm373_vm13 = vcmp.eq.s32.totalorder %v5345_v12, %v4989_v15  ;;  %vm389_vm14 = vcmp.eq.s32.totalorder %v5348_v29, %v4989_v15 }
  0x42   :  { %3885 = vmatpush.msk.msrb.mxu3 %vm376_vm1, %v8737_v24  ;;  %3901 = vmatpush.msk.msra.mxu0 %vm392_vm2, %v8737_v24 }
  0x44   :  { %3886 = vmatpush.msk.msrb.mxu3 %vm375_vm5, %v8737_v24  ;;  %3902 = vmatpush.msk.msra.mxu0 %vm391_vm6, %v8737_v24 }
  0x46   :  { %3887 = vmatpush.msk.msrb.mxu3 %vm374_vm9, %v8737_v24  ;;  %3903 = vmatpush.msk.msra.mxu0 %vm390_vm10, %v8737_v24 }
  0x48   :  { %3888 = vmatpush.msk.msrb.mxu3 %vm373_vm13, %v8737_v24  ;;  %3904 = vmatpush.msk.msra.mxu0 %vm389_vm14, %v8737_v24 }
  0x84   :  { %v5104_v36 = vpop.f32.mrf.mxu0 }
  0x85   :  { %v5125_v40 = vpop.f32.mrf.mxu1  ;;  %v99_v48 = vmul.f32 %v5104_v36, %v5104_v36 }
  0x86   :  { %v94_v45 = vadd.f32 %v5125_v40, %v5104_v36  ;;  %v100_v49 = vmul.f32 %v5125_v40, %v5125_v40 }
  0x88   :  { %v102_v55 = vadd.f32 %v100_v49, %v99_v48 }
  0x8b   :  { %v5205_v50 = vpop.f32.mrf.mxu2 }
  0x8c   :  { %v66_v51 = vpop.f32.mrf.mxu0  ;;  %v95_v52 = vadd.f32 %v94_v45, %v5205_v50  ;;  %v101_v54 = vmul.f32 %v5205_v50, %v5205_v50  ;;  %v5359_v45 = vld [vmem:[%s8731_s4 + $0x2] ss:$0 sm:$0xff] }
  0x8d   :  { %v79_v53 = vpop.f32.mrf.mxu1  ;;  %vm530_vm3 = vcmp.eq.s32.totalorder %v4992_v16, %v5359_v45  ;;  %vm546_vm4 = vcmp.eq.s32.totalorder %v4995_v17, %v5359_v45  ;;  %vm529_vm7 = vcmp.eq.s32.totalorder %v5001_v19, %v5359_v45  ;;  %vm545_vm8 = vcmp.eq.s32.totalorder %v5004_v20, %v5359_v45 }
  0x8e   :  { %96 = vadd.xlane.f32.xlu0 %v95_v52  ;;  %v103_v57 = vadd.f32 %v102_v55, %v101_v54  ;;  %3905 = vmatpush.msk.msra.mxu1 %vm530_vm3, %v8737_v24  ;;  %vm528_vm11 = vcmp.eq.s32.totalorder %v5010_v22, %v5359_v45  ;;  %vm544_vm12 = vcmp.eq.s32.totalorder %v5013_v23, %v5359_v45 }
  0x8f   :  { %3921 = vmatpush.msk.msra.mxu2 %vm546_vm4, %v8737_v24  ;;  %vm527_vm15 = vcmp.eq.s32.totalorder %v5039_v26, %v5359_v45  ;;  %vm543_vm0 = vcmp.eq.s32.totalorder %v5048_v27, %v5359_v45  ;;  %vm526_vm3 = vcmp.eq.s32.totalorder %v5059_v30, %v5359_v45  ;;  %vm542_vm4 = vcmp.eq.s32.totalorder %v5062_v31, %v5359_v45 }
  0x90   :  { %3906 = vmatpush.msk.msra.mxu1 %vm529_vm7, %v8737_v24  ;;  %vm525_vm7 = vcmp.eq.s32.totalorder %v5076_v33, %v5359_v45 }
  0x91   :  { %3922 = vmatpush.msk.msra.mxu2 %vm545_vm8, %v8737_v24  ;;  %vm541_vm8 = vcmp.eq.s32.totalorder %v5091_v34, %v5359_v45 }
  0x92   :  { %3907 = vmatpush.msk.msra.mxu1 %vm528_vm11, %v8737_v24  ;;  %vm524_vm11 = vcmp.eq.s32.totalorder %v5117_v37, %v5359_v45 }
  0x93   :  { %v92_v56 = vpop.f32.mrf.mxu2  ;;  %3923 = vmatpush.msk.msra.mxu2 %vm544_vm12, %v8737_v24  ;;  %vm540_vm12 = vcmp.eq.s32.totalorder %v5120_v38, %v5359_v45 }
  0x94   :  { %3908 = vmatpush.msk.msra.mxu1 %vm527_vm15, %v8737_v24  ;;  %vm523_vm15 = vcmp.eq.s32.totalorder %v5140_v41, %v5359_v45 }
  0x95   :  { %3924 = vmatpush.msk.msra.mxu2 %vm543_vm0, %v8737_v24  ;;  %vm539_vm0 = vcmp.eq.s32.totalorder %v5143_v42, %v5359_v45 }
  0x96   :  { %104 = vadd.xlane.f32.xlu0 %v103_v57  ;;  %3909 = vmatpush.msk.msra.mxu1 %vm526_vm3, %v8737_v24  ;;  %vm522_vm3 = vcmp.eq.s32.totalorder %v5173_v44, %v5359_v45 }
  0x97   :  { %3925 = vmatpush.msk.msra.mxu2 %vm542_vm4, %v8737_v24  ;;  %vm538_vm4 = vcmp.eq.s32.totalorder %v5184_v46, %v5359_v45 }
  0x98   :  { %3910 = vmatpush.msk.msra.mxu1 %vm525_vm7, %v8737_v24  ;;  %vm521_vm7 = vcmp.eq.s32.totalorder %v5229_v58, %v5359_v45 }
  0x99   :  { %3926 = vmatpush.msk.msra.mxu2 %vm541_vm8, %v8737_v24  ;;  %vm537_vm8 = vcmp.eq.s32.totalorder %v5232_v59, %v5359_v45 }
  0x9a   :  { %3911 = vmatpush.msk.msra.mxu1 %vm524_vm11, %v8737_v24  ;;  %vm520_vm11 = vcmp.eq.s32.totalorder %v5248_v61, %v5359_v45 }
  0x9b   :  { %3927 = vmatpush.msk.msra.mxu2 %vm540_vm12, %v8737_v24  ;;  %vm536_vm12 = vcmp.eq.s32.totalorder %v5251_v62, %v5359_v45 }
  0x9c   :  { %3912 = vmatpush.msk.msra.mxu1 %vm523_vm15, %v8737_v24  ;;  %vm519_vm15 = vcmp.eq.s32.totalorder %v5257_v0, %v5359_v45 }
  0x9d   :  { %3928 = vmatpush.msk.msra.mxu2 %vm539_vm0, %v8737_v24  ;;  %vm535_vm0 = vcmp.eq.s32.totalorder %v5262_v1, %v5359_v45 }
  0x9e   :  { %3913 = vmatpush.msk.msra.mxu1 %vm522_vm3, %v8737_v24  ;;  %vm518_vm3 = vcmp.eq.s32.totalorder %v5268_v3, %v5359_v45 }
  0x9f   :  { %3929 = vmatpush.msk.msra.mxu2 %vm538_vm4, %v8737_v24  ;;  %vm534_vm4 = vcmp.eq.s32.totalorder %v5271_v4, %v5359_v45 }
  0xa0   :  { %3914 = vmatpush.msk.msra.mxu1 %vm521_vm7, %v8737_v24  ;;  %vm517_vm7 = vcmp.eq.s32.totalorder %v5307_v6, %v5359_v45 }
  0xa1   :  { %3930 = vmatpush.msk.msra.mxu2 %vm537_vm8, %v8737_v24  ;;  %vm533_vm8 = vcmp.eq.s32.totalorder %v5310_v7, %v5359_v45 }
  0xa2   :  { %3915 = vmatpush.msk.msra.mxu1 %vm520_vm11, %v8737_v24  ;;  %vm516_vm11 = vcmp.eq.s32.totalorder %v5326_v9, %v5359_v45 }
  0xa3   :  { %3931 = vmatpush.msk.msra.mxu2 %vm536_vm12, %v8737_v24  ;;  %vm532_vm12 = vcmp.eq.s32.totalorder %v5333_v10, %v5359_v45 }
  0xa4   :  { %3916 = vmatpush.msk.msra.mxu1 %vm519_vm15, %v8737_v24  ;;  %vm515_vm15 = vcmp.eq.s32.totalorder %v4979_v13, %v5359_v45 }
  0xa5   :  { %3932 = vmatpush.msk.msra.mxu2 %vm535_vm0, %v8737_v24  ;;  %vm531_vm0 = vcmp.eq.s32.totalorder %v5345_v12, %v5359_v45 }
  0xa6   :  { %3917 = vmatpush.msk.msra.mxu1 %vm518_vm3, %v8737_v24 }
  0xa7   :  { %3933 = vmatpush.msk.msra.mxu2 %vm534_vm4, %v8737_v24  ;;  %vm562_vm4 = vcmp.eq.s32.totalorder %v4998_v18, %v5359_v45 }
  0xa8   :  { %3918 = vmatpush.msk.msra.mxu1 %vm517_vm7, %v8737_v24 }
  0xa9   :  { %3934 = vmatpush.msk.msra.mxu2 %vm533_vm8, %v8737_v24  ;;  %vm561_vm8 = vcmp.eq.s32.totalorder %v5007_v21, %v5359_v45 }
  0xaa   :  { %3919 = vmatpush.msk.msra.mxu1 %vm516_vm11, %v8737_v24 }
  0xab   :  { %3935 = vmatpush.msk.msra.mxu2 %vm532_vm12, %v8737_v24  ;;  %vm560_vm12 = vcmp.eq.s32.totalorder %v5032_v25, %v5359_v45 }
  0xac   :  { %3920 = vmatpush.msk.msra.mxu1 %vm515_vm15, %v8737_v24 }
  0xad   :  { %3936 = vmatpush.msk.msra.mxu2 %vm531_vm0, %v8737_v24  ;;  %vm559_vm0 = vcmp.eq.s32.totalorder %v5051_v28, %v5359_v45 }
 0x101   :  { %v97_v14 = vpop.xlane.xlu0 %96 }
 0x102   :  { %v5512_v48 = vmul.f32 0.00295858, %v97_v14  ;;  %v130_v14 = vpop.permute.xlu1 %129 }
 0x104   :  { %v107_v51 = vmul.f32 %v5512_v48, %v5512_v48  ;;  %v112_v24 = vsub.f32 %v5205_v50, %v5512_v48 }
 0x109   :  { %v105_v49 = vpop.xlane.xlu0 %104 }
 0x10a   :  { %v106_v52 = vmul.f32 0.00295858, %v105_v49  ;;  %v137_v10 = vpop.permute.xlu1 %136 }
 0x10c   :  { %v108_v53 = vsub.f32 %v106_v52, %v107_v51 }
 0x10e   :  { %v109_v54 = vmax.f32 %v108_v53, 0.0  ;;  %v110_v53 = vsub.f32 %v5104_v36, %v5512_v48  ;;  %v5582_v36 = vld [vmem:[%s8731_s4 + $0x3] ss:$0 sm:$0xff] }
 0x10f   :  { %vm688_vm5 = vcmp.eq.s32.totalorder %v4992_v16, %v5582_v36  ;;  %vm704_vm6 = vcmp.eq.s32.totalorder %v4995_v17, %v5582_v36  ;;  %vm720_vm7 = vcmp.eq.s32.totalorder %v4998_v18, %v5582_v36  ;;  %vm687_vm9 = vcmp.eq.s32.totalorder %v5001_v19, %v5582_v36 }
 0x110   :  { %v113_v55 = vadd.f32 1e-05, %v109_v54  ;;  %v111_v54 = vsub.f32 %v5125_v40, %v5512_v48  ;;  %vm703_vm10 = vcmp.eq.s32.totalorder %v5004_v20, %v5582_v36  ;;  %vm719_vm11 = vcmp.eq.s32.totalorder %v5007_v21, %v5582_v36 }
 0x111   :  { %vm686_vm13 = vcmp.eq.s32.totalorder %v5010_v22, %v5582_v36  ;;  %vm702_vm14 = vcmp.eq.s32.totalorder %v5013_v23, %v5582_v36  ;;  %vm718_vm15 = vcmp.eq.s32.totalorder %v5032_v25, %v5582_v36 }
 0x112   :  { %4902 = vrsqrt.f32 %v113_v55  ;;  %vm120_vm2 = vweird.f32 %v113_v55 }
 0x118   :  { %v4903_v15 = vpop.eup %4902 }
 0x119   :  { %v115_v56 = vmul.f32 %v4903_v15, %v113_v55  ;;  %vm121_vm1 = vweird.f32 %v4903_v15 }
 0x11a   :  { %vm122_vm3 = vmor %vm120_vm2, %vm121_vm1  ;;  %vm685_vm1 = vcmp.eq.s32.totalorder %v5039_v26, %v5582_v36  ;;  %vm701_vm2 = vcmp.eq.s32.totalorder %v5048_v27, %v5582_v36 }
 0x11b   :  { %v116_v57 = vmul.f32 %v4903_v15, %v115_v56 }
 0x11d   :  { %v117_v49 = vmul.f32 0.5, %v116_v57 }
 0x11f   :  { %v118_v51 = vsub.f32 1.5, %v117_v49 }
 0x121   :  { %v119_v52 = vmul.f32 %v4903_v15, %v118_v51 }
 0x123   :  { %v123_v12 = vsel %vm122_vm3, %v4903_v15, %v119_v52  ;;  %vm717_vm3 = vcmp.eq.s32.totalorder %v5051_v28, %v5582_v36  ;;  %v5781_v15 = vld [vmem:[%s8731_s4 + $0x4] ss:$0 sm:$0xff]  ;;  %v5993_v52 = vld [vmem:[%s8731_s4 + $0x6] ss:$0 sm:$0xff] }
 0x124   :  { %v124_v13 = vmul.f32 %v123_v12, %v110_v53  ;;  %v125_v29 = vmul.f32 %v123_v12, %v111_v54  ;;  %v126_v56 = vmul.f32 %v123_v12, %v112_v24  ;;  %v8779_v12 = vld [vmem:[#allocation9_spill] sm:$0xff]  ;;  %v6188_v53 = vld [vmem:[%s8731_s4 + $0x7] ss:$0 sm:$0xff] }
 0x126   :  { %v132_v57 = vmul.f32 %v130_v14, %v124_v13  ;;  %v133_v49 = vmul.f32 %v130_v14, %v125_v29  ;;  %v134_v9 = vmul.f32 %v130_v14, %v126_v56  ;;  %v8773_v13 = vmov 1.0   ;;  %v8780_v29 = vld [vmem:[#allocation2_spill] sm:$0xff]  ;;  %v8781_v14 = vld [vmem:[#allocation8_spill] sm:$0xff] }
 0x128   :  { %v139_v55 = vadd.f32 %v137_v10, %v132_v57  ;;  %v140_v51 = vadd.f32 %v137_v10, %v133_v49  ;;  %v141_v11 = vadd.f32 %v137_v10, %v134_v9  ;;  %v8776_v9 = vld [vmem:[#allocation7_spill] sm:$0xff]  ;;  %v8777_v10 = vld [vmem:[#allocation5_spill] sm:$0xff] }
 0x12a   :  { %v142_v40 = vmul.f32 0.2, %v139_v55  ;;  %v143_v7 = vmul.f32 0.2, %v140_v51  ;;  %v144_v6 = vmul.f32 0.2, %v141_v11 }
 0x12c   :  { %v5584_v50 = vmax.f32 %v139_v55, %v142_v40  ;;  %v5586_v48 = vmax.f32 %v140_v51, %v143_v7  ;;  %v5588_v24 = vmax.f32 %v141_v11, %v144_v6  ;;  %v8774_v6 = vld [vmem:[#allocation3_spill] sm:$0xff]  ;;  %v8775_v7 = vld [vmem:[#allocation4_spill] sm:$0xff]  ;;  %v8778_v11 = vld [vmem:[#allocation6_spill] sm:$0xff] }
 0x12d   :  { %v6389_v51 = vld [vmem:[%s8731_s4 + $0x8] ss:$0 sm:$0xff] }
 0x12e   :  { %311 = vmatmul.f32.vlgmr.msra.gmra.mxu3 %v5584_v50  ;;  %331 = vmatmul.f32.vlgmr.msrb.gmra.mxu0 %v5586_v48 }
 0x12f   :  { %351 = vmatmul.f32.vlgmr.msrb.gmra.mxu1 %v5588_v24  ;;  %469 = vmatmul.f32.vlgmr.msrb.gmra.mxu2 %v5584_v50 }
 0x130   :  { %3937 = vmatpush.msk.msra.mxu3 %vm562_vm4, %v8773_v13  ;;  %3953 = vmatpush.msk.msrb.mxu0 %vm688_vm5, %v8773_v13  ;;  %vm558_vm4 = vcmp.eq.s32.totalorder %v5073_v32, %v5359_v45  ;;  %vm684_vm5 = vcmp.eq.s32.totalorder %v5059_v30, %v5582_v36 }
 0x131   :  { %3969 = vmatpush.msk.msrb.mxu1 %vm704_vm6, %v8773_v13  ;;  %3985 = vmatpush.msk.msrb.mxu2 %vm720_vm7, %v8773_v13  ;;  %vm700_vm6 = vcmp.eq.s32.totalorder %v5062_v31, %v5582_v36  ;;  %vm716_vm7 = vcmp.eq.s32.totalorder %v5073_v32, %v5582_v36 }
 0x132   :  { %3938 = vmatpush.msk.msra.mxu3 %vm561_vm8, %v8773_v13  ;;  %3954 = vmatpush.msk.msrb.mxu0 %vm687_vm9, %v8773_v13  ;;  %vm557_vm8 = vcmp.eq.s32.totalorder %v5102_v35, %v5359_v45  ;;  %vm683_vm9 = vcmp.eq.s32.totalorder %v5076_v33, %v5582_v36 }
 0x133   :  { %3970 = vmatpush.msk.msrb.mxu1 %vm703_vm10, %v8773_v13  ;;  %3986 = vmatpush.msk.msrb.mxu2 %vm719_vm11, %v8773_v13  ;;  %vm699_vm10 = vcmp.eq.s32.totalorder %v5091_v34, %v5582_v36  ;;  %vm715_vm11 = vcmp.eq.s32.totalorder %v5102_v35, %v5582_v36 }
 0x134   :  { %3939 = vmatpush.msk.msra.mxu3 %vm560_vm12, %v8773_v13  ;;  %3955 = vmatpush.msk.msrb.mxu0 %vm686_vm13, %v8773_v13  ;;  %vm556_vm12 = vcmp.eq.s32.totalorder %v5123_v39, %v5359_v45  ;;  %vm682_vm13 = vcmp.eq.s32.totalorder %v5117_v37, %v5582_v36 }
 0x135   :  { %3971 = vmatpush.msk.msrb.mxu1 %vm702_vm14, %v8773_v13  ;;  %3987 = vmatpush.msk.msrb.mxu2 %vm718_vm15, %v8773_v13  ;;  %vm698_vm14 = vcmp.eq.s32.totalorder %v5120_v38, %v5582_v36  ;;  %vm714_vm15 = vcmp.eq.s32.totalorder %v5123_v39, %v5582_v36 }
 0x136   :  { %3940 = vmatpush.msk.msra.mxu3 %vm559_vm0, %v8773_v13  ;;  %3956 = vmatpush.msk.msrb.mxu0 %vm685_vm1, %v8773_v13  ;;  %vm555_vm0 = vcmp.eq.s32.totalorder %v5158_v43, %v5359_v45  ;;  %vm681_vm1 = vcmp.eq.s32.totalorder %v5140_v41, %v5582_v36 }
 0x137   :  { %3972 = vmatpush.msk.msrb.mxu1 %vm701_vm2, %v8773_v13  ;;  %3988 = vmatpush.msk.msrb.mxu2 %vm717_vm3, %v8773_v13  ;;  %vm697_vm2 = vcmp.eq.s32.totalorder %v5143_v42, %v5582_v36  ;;  %vm713_vm3 = vcmp.eq.s32.totalorder %v5158_v43, %v5582_v36 }
 0x138   :  { %489 = vmatmul.f32.vlgmr.msrb.gmra.mxu3 %v5586_v48  ;;  %509 = vmatmul.f32.vlgmr.msra.gmra.mxu0 %v5588_v24 }
 0x139   :  { %627 = vmatmul.f32.vlgmr.msra.gmra.mxu1 %v5584_v50  ;;  %647 = vmatmul.f32.vlgmr.msra.gmra.mxu2 %v5586_v48 }
 0x13a   :  { %3941 = vmatpush.msk.msra.mxu3 %vm558_vm4, %v8773_v13  ;;  %3957 = vmatpush.msk.msrb.mxu0 %vm684_vm5, %v8773_v13  ;;  %vm554_vm4 = vcmp.eq.s32.totalorder %v5193_v47, %v5359_v45  ;;  %vm680_vm5 = vcmp.eq.s32.totalorder %v5173_v44, %v5582_v36 }
 0x13b   :  { %3973 = vmatpush.msk.msrb.mxu1 %vm700_vm6, %v8773_v13  ;;  %3989 = vmatpush.msk.msrb.mxu2 %vm716_vm7, %v8773_v13  ;;  %vm696_vm6 = vcmp.eq.s32.totalorder %v5184_v46, %v5582_v36  ;;  %vm712_vm7 = vcmp.eq.s32.totalorder %v5193_v47, %v5582_v36 }
 0x13c   :  { %3942 = vmatpush.msk.msra.mxu3 %vm557_vm8, %v8773_v13  ;;  %3958 = vmatpush.msk.msrb.mxu0 %vm683_vm9, %v8773_v13  ;;  %vm553_vm8 = vcmp.eq.s32.totalorder %v5235_v60, %v5359_v45  ;;  %vm679_vm9 = vcmp.eq.s32.totalorder %v5229_v58, %v5582_v36 }
 0x13d   :  { %3974 = vmatpush.msk.msrb.mxu1 %vm699_vm10, %v8773_v13  ;;  %3990 = vmatpush.msk.msrb.mxu2 %vm715_vm11, %v8773_v13  ;;  %vm695_vm10 = vcmp.eq.s32.totalorder %v5232_v59, %v5582_v36  ;;  %vm711_vm11 = vcmp.eq.s32.totalorder %v5235_v60, %v5582_v36 }
 0x13e   :  { %3943 = vmatpush.msk.msra.mxu3 %vm556_vm12, %v8773_v13  ;;  %3959 = vmatpush.msk.msrb.mxu0 %vm682_vm13, %v8773_v13  ;;  %vm552_vm12 = vcmp.eq.s32.totalorder %v5254_v63, %v5359_v45  ;;  %vm678_vm13 = vcmp.eq.s32.totalorder %v5248_v61, %v5582_v36 }
 0x13f   :  { %3975 = vmatpush.msk.msrb.mxu1 %vm698_vm14, %v8773_v13  ;;  %3991 = vmatpush.msk.msrb.mxu2 %vm714_vm15, %v8773_v13  ;;  %vm694_vm14 = vcmp.eq.s32.totalorder %v5251_v62, %v5582_v36  ;;  %vm710_vm15 = vcmp.eq.s32.totalorder %v5254_v63, %v5582_v36 }
 0x140   :  { %3944 = vmatpush.msk.msra.mxu3 %vm555_vm0, %v8773_v13  ;;  %3960 = vmatpush.msk.msrb.mxu0 %vm681_vm1, %v8773_v13  ;;  %vm551_vm0 = vcmp.eq.s32.totalorder %v5265_v2, %v5359_v45  ;;  %vm677_vm1 = vcmp.eq.s32.totalorder %v5257_v0, %v5582_v36 }
 0x141   :  { %3976 = vmatpush.msk.msrb.mxu1 %vm697_vm2, %v8773_v13  ;;  %3992 = vmatpush.msk.msrb.mxu2 %vm713_vm3, %v8773_v13  ;;  %vm693_vm2 = vcmp.eq.s32.totalorder %v5262_v1, %v5582_v36  ;;  %vm709_vm3 = vcmp.eq.s32.totalorder %v5265_v2, %v5582_v36 }
 0x142   :  { %3945 = vmatpush.msk.msra.mxu3 %vm554_vm4, %v8773_v13  ;;  %3961 = vmatpush.msk.msrb.mxu0 %vm680_vm5, %v8773_v13  ;;  %vm550_vm4 = vcmp.eq.s32.totalorder %v5290_v5, %v5359_v45  ;;  %vm676_vm5 = vcmp.eq.s32.totalorder %v5268_v3, %v5582_v36 }
 0x143   :  { %3977 = vmatpush.msk.msrb.mxu1 %vm696_vm6, %v8773_v13  ;;  %3993 = vmatpush.msk.msrb.mxu2 %vm712_vm7, %v8773_v13  ;;  %vm692_vm6 = vcmp.eq.s32.totalorder %v5271_v4, %v5582_v36  ;;  %vm708_vm7 = vcmp.eq.s32.totalorder %v5290_v5, %v5582_v36 }
 0x144   :  { %3946 = vmatpush.msk.msra.mxu3 %vm553_vm8, %v8773_v13  ;;  %3962 = vmatpush.msk.msrb.mxu0 %vm679_vm9, %v8773_v13  ;;  %vm549_vm8 = vcmp.eq.s32.totalorder %v5315_v8, %v5359_v45  ;;  %vm675_vm9 = vcmp.eq.s32.totalorder %v8774_v6, %v5582_v36 }
 0x145   :  { %3978 = vmatpush.msk.msrb.mxu1 %vm695_vm10, %v8773_v13  ;;  %3994 = vmatpush.msk.msrb.mxu2 %vm711_vm11, %v8773_v13  ;;  %vm691_vm10 = vcmp.eq.s32.totalorder %v8775_v7, %v5582_v36  ;;  %vm707_vm11 = vcmp.eq.s32.totalorder %v5315_v8, %v5582_v36 }
 0x146   :  { %3947 = vmatpush.msk.msra.mxu3 %vm552_vm12, %v8773_v13  ;;  %3963 = vmatpush.msk.msrb.mxu0 %vm678_vm13, %v8773_v13  ;;  %vm548_vm12 = vcmp.eq.s32.totalorder %v8776_v9, %v5359_v45  ;;  %vm674_vm13 = vcmp.eq.s32.totalorder %v8777_v10, %v5582_v36 }
 0x147   :  { %3979 = vmatpush.msk.msrb.mxu1 %vm694_vm14, %v8773_v13  ;;  %3995 = vmatpush.msk.msrb.mxu2 %vm710_vm15, %v8773_v13  ;;  %vm690_vm14 = vcmp.eq.s32.totalorder %v8778_v11, %v5582_v36  ;;  %vm706_vm15 = vcmp.eq.s32.totalorder %v8776_v9, %v5582_v36 }
 0x148   :  { %3948 = vmatpush.msk.msra.mxu3 %vm551_vm0, %v8773_v13  ;;  %3964 = vmatpush.msk.msrb.mxu0 %vm677_vm1, %v8773_v13  ;;  %vm547_vm0 = vcmp.eq.s32.totalorder %v8779_v12, %v5359_v45  ;;  %vm673_vm1 = vcmp.eq.s32.totalorder %v8780_v29, %v5582_v36  ;;  %v5792_v45 = vld [vmem:[%s8731_s4 + $0x5] ss:$0 sm:$0xff] }
 0x149   :  { %3980 = vmatpush.msk.msrb.mxu1 %vm693_vm2, %v8773_v13  ;;  %3996 = vmatpush.msk.msrb.mxu2 %vm709_vm3, %v8773_v13  ;;  %vm689_vm2 = vcmp.eq.s32.totalorder %v8781_v14, %v5582_v36  ;;  %vm705_vm3 = vcmp.eq.s32.totalorder %v8779_v12, %v5582_v36  ;;  %v6406_v36 = vld [vmem:[%s8731_s4 + $0x9] ss:$0 sm:$0xff] }
 0x14a   :  { %3949 = vmatpush.msk.msra.mxu3 %vm550_vm4, %v8773_v13  ;;  %3965 = vmatpush.msk.msrb.mxu0 %vm676_vm5, %v8773_v13  ;;  %vm846_vm4 = vcmp.eq.s32.totalorder %v4992_v16, %v5781_v15  ;;  %vm862_vm5 = vcmp.eq.s32.totalorder %v4995_v17, %v5781_v15 }
 0x14b   :  { %3981 = vmatpush.msk.msrb.mxu1 %vm692_vm6, %v8773_v13  ;;  %3997 = vmatpush.msk.msrb.mxu2 %vm708_vm7, %v8773_v13  ;;  %vm878_vm6 = vcmp.eq.s32.totalorder %v4998_v18, %v5781_v15  ;;  %vm1004_vm7 = vcmp.eq.s32.totalorder %v4992_v16, %v5792_v45 }
 0x14c   :  { %3950 = vmatpush.msk.msra.mxu3 %vm549_vm8, %v8773_v13  ;;  %3966 = vmatpush.msk.msrb.mxu0 %vm675_vm9, %v8773_v13  ;;  %vm845_vm8 = vcmp.eq.s32.totalorder %v5001_v19, %v5781_v15  ;;  %vm861_vm9 = vcmp.eq.s32.totalorder %v5004_v20, %v5781_v15 }
 0x14d   :  { %3982 = vmatpush.msk.msrb.mxu1 %vm691_vm10, %v8773_v13  ;;  %3998 = vmatpush.msk.msrb.mxu2 %vm707_vm11, %v8773_v13  ;;  %vm877_vm10 = vcmp.eq.s32.totalorder %v5007_v21, %v5781_v15  ;;  %vm1003_vm11 = vcmp.eq.s32.totalorder %v5001_v19, %v5792_v45 }
 0x14e   :  { %3951 = vmatpush.msk.msra.mxu3 %vm548_vm12, %v8773_v13  ;;  %3967 = vmatpush.msk.msrb.mxu0 %vm674_vm13, %v8773_v13  ;;  %vm844_vm12 = vcmp.eq.s32.totalorder %v5010_v22, %v5781_v15  ;;  %vm860_vm13 = vcmp.eq.s32.totalorder %v5013_v23, %v5781_v15 }
 0x14f   :  { %3983 = vmatpush.msk.msrb.mxu1 %vm690_vm14, %v8773_v13  ;;  %3999 = vmatpush.msk.msrb.mxu2 %vm706_vm15, %v8773_v13  ;;  %vm876_vm14 = vcmp.eq.s32.totalorder %v5032_v25, %v5781_v15  ;;  %vm1002_vm15 = vcmp.eq.s32.totalorder %v5010_v22, %v5792_v45 }
 0x150   :  { %3952 = vmatpush.msk.msra.mxu3 %vm547_vm0, %v8773_v13  ;;  %3968 = vmatpush.msk.msrb.mxu0 %vm673_vm1, %v8773_v13  ;;  %vm843_vm0 = vcmp.eq.s32.totalorder %v5039_v26, %v5781_v15  ;;  %vm859_vm1 = vcmp.eq.s32.totalorder %v5048_v27, %v5781_v15 }
 0x151   :  { %3984 = vmatpush.msk.msrb.mxu1 %vm689_vm2, %v8773_v13  ;;  %4000 = vmatpush.msk.msrb.mxu2 %vm705_vm3, %v8773_v13  ;;  %vm875_vm2 = vcmp.eq.s32.totalorder %v5051_v28, %v5781_v15  ;;  %vm1001_vm3 = vcmp.eq.s32.totalorder %v5039_v26, %v5792_v45 }
 0x152   :  { %667 = vmatmul.f32.vlgmr.msra.gmra.mxu3 %v5588_v24  ;;  %785 = vmatmul.f32.vlgmr.msrb.gmra.mxu0 %v5584_v50 }
 0x153   :  { %805 = vmatmul.f32.vlgmr.msrb.gmra.mxu1 %v5586_v48  ;;  %825 = vmatmul.f32.vlgmr.msrb.gmra.mxu2 %v5588_v24 }
 0x154   :  { %4001 = vmatpush.msk.msrb.mxu3 %vm846_vm4, %v8773_v13  ;;  %4017 = vmatpush.msk.msra.mxu0 %vm862_vm5, %v8773_v13  ;;  %vm842_vm4 = vcmp.eq.s32.totalorder %v5059_v30, %v5781_v15  ;;  %vm858_vm5 = vcmp.eq.s32.totalorder %v5062_v31, %v5781_v15 }
 0x155   :  { %4033 = vmatpush.msk.msra.mxu1 %vm878_vm6, %v8773_v13  ;;  %4049 = vmatpush.msk.msra.mxu2 %vm1004_vm7, %v8773_v13  ;;  %vm874_vm6 = vcmp.eq.s32.totalorder %v5073_v32, %v5781_v15  ;;  %vm1000_vm7 = vcmp.eq.s32.totalorder %v5059_v30, %v5792_v45 }
 0x156   :  { %4002 = vmatpush.msk.msrb.mxu3 %vm845_vm8, %v8773_v13  ;;  %4018 = vmatpush.msk.msra.mxu0 %vm861_vm9, %v8773_v13  ;;  %vm841_vm8 = vcmp.eq.s32.totalorder %v5076_v33, %v5781_v15  ;;  %vm857_vm9 = vcmp.eq.s32.totalorder %v5091_v34, %v5781_v15 }
 0x157   :  { %4034 = vmatpush.msk.msra.mxu1 %vm877_vm10, %v8773_v13  ;;  %4050 = vmatpush.msk.msra.mxu2 %vm1003_vm11, %v8773_v13  ;;  %vm873_vm10 = vcmp.eq.s32.totalorder %v5102_v35, %v5781_v15  ;;  %vm999_vm11 = vcmp.eq.s32.totalorder %v5076_v33, %v5792_v45 }
 0x158   :  { %4003 = vmatpush.msk.msrb.mxu3 %vm844_vm12, %v8773_v13  ;;  %4019 = vmatpush.msk.msra.mxu0 %vm860_vm13, %v8773_v13  ;;  %vm840_vm12 = vcmp.eq.s32.totalorder %v5117_v37, %v5781_v15  ;;  %vm856_vm13 = vcmp.eq.s32.totalorder %v5120_v38, %v5781_v15 }
 0x159   :  { %4035 = vmatpush.msk.msra.mxu1 %vm876_vm14, %v8773_v13  ;;  %4051 = vmatpush.msk.msra.mxu2 %vm1002_vm15, %v8773_v13  ;;  %vm872_vm14 = vcmp.eq.s32.totalorder %v5123_v39, %v5781_v15  ;;  %vm998_vm15 = vcmp.eq.s32.totalorder %v5117_v37, %v5792_v45 }
 0x15a   :  { %4004 = vmatpush.msk.msrb.mxu3 %vm843_vm0, %v8773_v13  ;;  %4020 = vmatpush.msk.msra.mxu0 %vm859_vm1, %v8773_v13  ;;  %vm839_vm0 = vcmp.eq.s32.totalorder %v5140_v41, %v5781_v15  ;;  %vm855_vm1 = vcmp.eq.s32.totalorder %v5143_v42, %v5781_v15 }
 0x15b   :  { %4036 = vmatpush.msk.msra.mxu1 %vm875_vm2, %v8773_v13  ;;  %4052 = vmatpush.msk.msra.mxu2 %vm1001_vm3, %v8773_v13  ;;  %vm871_vm2 = vcmp.eq.s32.totalorder %v5158_v43, %v5781_v15  ;;  %vm997_vm3 = vcmp.eq.s32.totalorder %v5140_v41, %v5792_v45 }
 0x15c   :  { %4005 = vmatpush.msk.msrb.mxu3 %vm842_vm4, %v8773_v13  ;;  %4021 = vmatpush.msk.msra.mxu0 %vm858_vm5, %v8773_v13  ;;  %vm838_vm4 = vcmp.eq.s32.totalorder %v5173_v44, %v5781_v15  ;;  %vm854_vm5 = vcmp.eq.s32.totalorder %v5184_v46, %v5781_v15 }
 0x15d   :  { %4037 = vmatpush.msk.msra.mxu1 %vm874_vm6, %v8773_v13  ;;  %4053 = vmatpush.msk.msra.mxu2 %vm1000_vm7, %v8773_v13  ;;  %vm870_vm6 = vcmp.eq.s32.totalorder %v5193_v47, %v5781_v15  ;;  %vm996_vm7 = vcmp.eq.s32.totalorder %v5173_v44, %v5792_v45 }
 0x15e   :  { %4006 = vmatpush.msk.msrb.mxu3 %vm841_vm8, %v8773_v13  ;;  %4022 = vmatpush.msk.msra.mxu0 %vm857_vm9, %v8773_v13  ;;  %vm837_vm8 = vcmp.eq.s32.totalorder %v5229_v58, %v5781_v15  ;;  %vm853_vm9 = vcmp.eq.s32.totalorder %v5232_v59, %v5781_v15 }
 0x15f   :  { %4038 = vmatpush.msk.msra.mxu1 %vm873_vm10, %v8773_v13  ;;  %4054 = vmatpush.msk.msra.mxu2 %vm999_vm11, %v8773_v13  ;;  %vm869_vm10 = vcmp.eq.s32.totalorder %v5235_v60, %v5781_v15  ;;  %vm995_vm11 = vcmp.eq.s32.totalorder %v5229_v58, %v5792_v45 }
 0x160   :  { %4007 = vmatpush.msk.msrb.mxu3 %vm840_vm12, %v8773_v13  ;;  %4023 = vmatpush.msk.msra.mxu0 %vm856_vm13, %v8773_v13  ;;  %vm836_vm12 = vcmp.eq.s32.totalorder %v5248_v61, %v5781_v15  ;;  %vm852_vm13 = vcmp.eq.s32.totalorder %v5251_v62, %v5781_v15 }
 0x161   :  { %4039 = vmatpush.msk.msra.mxu1 %vm872_vm14, %v8773_v13  ;;  %4055 = vmatpush.msk.msra.mxu2 %vm998_vm15, %v8773_v13  ;;  %vm868_vm14 = vcmp.eq.s32.totalorder %v5254_v63, %v5781_v15  ;;  %vm994_vm15 = vcmp.eq.s32.totalorder %v5248_v61, %v5792_v45 }
 0x162   :  { %4008 = vmatpush.msk.msrb.mxu3 %vm839_vm0, %v8773_v13  ;;  %4024 = vmatpush.msk.msra.mxu0 %vm855_vm1, %v8773_v13  ;;  %vm835_vm0 = vcmp.eq.s32.totalorder %v5257_v0, %v5781_v15  ;;  %vm851_vm1 = vcmp.eq.s32.totalorder %v5262_v1, %v5781_v15 }
 0x163   :  { %4040 = vmatpush.msk.msra.mxu1 %vm871_vm2, %v8773_v13  ;;  %4056 = vmatpush.msk.msra.mxu2 %vm997_vm3, %v8773_v13  ;;  %vm867_vm2 = vcmp.eq.s32.totalorder %v5265_v2, %v5781_v15  ;;  %vm993_vm3 = vcmp.eq.s32.totalorder %v5257_v0, %v5792_v45 }
 0x164   :  { %4009 = vmatpush.msk.msrb.mxu3 %vm838_vm4, %v8773_v13  ;;  %4025 = vmatpush.msk.msra.mxu0 %vm854_vm5, %v8773_v13  ;;  %vm834_vm4 = vcmp.eq.s32.totalorder %v5268_v3, %v5781_v15  ;;  %vm850_vm5 = vcmp.eq.s32.totalorder %v5271_v4, %v5781_v15 }
 0x165   :  { %4041 = vmatpush.msk.msra.mxu1 %vm870_vm6, %v8773_v13  ;;  %4057 = vmatpush.msk.msra.mxu2 %vm996_vm7, %v8773_v13  ;;  %vm866_vm6 = vcmp.eq.s32.totalorder %v5290_v5, %v5781_v15  ;;  %vm992_vm7 = vcmp.eq.s32.totalorder %v5268_v3, %v5792_v45 }
 0x166   :  { %4010 = vmatpush.msk.msrb.mxu3 %vm837_vm8, %v8773_v13  ;;  %4026 = vmatpush.msk.msra.mxu0 %vm853_vm9, %v8773_v13  ;;  %vm833_vm8 = vcmp.eq.s32.totalorder %v8774_v6, %v5781_v15  ;;  %vm849_vm9 = vcmp.eq.s32.totalorder %v8775_v7, %v5781_v15 }
 0x167   :  { %4042 = vmatpush.msk.msra.mxu1 %vm869_vm10, %v8773_v13  ;;  %4058 = vmatpush.msk.msra.mxu2 %vm995_vm11, %v8773_v13  ;;  %vm865_vm10 = vcmp.eq.s32.totalorder %v5315_v8, %v5781_v15  ;;  %vm991_vm11 = vcmp.eq.s32.totalorder %v8774_v6, %v5792_v45 }
 0x168   :  { %4011 = vmatpush.msk.msrb.mxu3 %vm836_vm12, %v8773_v13  ;;  %4027 = vmatpush.msk.msra.mxu0 %vm852_vm13, %v8773_v13  ;;  %vm832_vm12 = vcmp.eq.s32.totalorder %v8777_v10, %v5781_v15  ;;  %vm848_vm13 = vcmp.eq.s32.totalorder %v8778_v11, %v5781_v15 }
 0x169   :  { %4043 = vmatpush.msk.msra.mxu1 %vm868_vm14, %v8773_v13  ;;  %4059 = vmatpush.msk.msra.mxu2 %vm994_vm15, %v8773_v13  ;;  %vm864_vm14 = vcmp.eq.s32.totalorder %v8776_v9, %v5781_v15  ;;  %vm990_vm15 = vcmp.eq.s32.totalorder %v8777_v10, %v5792_v45 }
 0x16a   :  { %4012 = vmatpush.msk.msrb.mxu3 %vm835_vm0, %v8773_v13  ;;  %4028 = vmatpush.msk.msra.mxu0 %vm851_vm1, %v8773_v13  ;;  %vm831_vm0 = vcmp.eq.s32.totalorder %v8780_v29, %v5781_v15  ;;  %vm847_vm1 = vcmp.eq.s32.totalorder %v8781_v14, %v5781_v15 }
 0x16b   :  { %4044 = vmatpush.msk.msra.mxu1 %vm867_vm2, %v8773_v13  ;;  %4060 = vmatpush.msk.msra.mxu2 %vm993_vm3, %v8773_v13  ;;  %vm863_vm2 = vcmp.eq.s32.totalorder %v8779_v12, %v5781_v15  ;;  %vm989_vm3 = vcmp.eq.s32.totalorder %v8780_v29, %v5792_v45 }
 0x16c   :  { %4013 = vmatpush.msk.msrb.mxu3 %vm834_vm4, %v8773_v13  ;;  %4029 = vmatpush.msk.msra.mxu0 %vm850_vm5, %v8773_v13  ;;  %vm1020_vm4 = vcmp.eq.s32.totalorder %v4995_v17, %v5792_v45  ;;  %vm1036_vm5 = vcmp.eq.s32.totalorder %v4998_v18, %v5792_v45 }
 0x16d   :  { %4045 = vmatpush.msk.msra.mxu1 %vm866_vm6, %v8773_v13  ;;  %4061 = vmatpush.msk.msra.mxu2 %vm992_vm7, %v8773_v13  ;;  %vm1162_vm6 = vcmp.eq.s32.totalorder %v4992_v16, %v5993_v52  ;;  %vm1178_vm7 = vcmp.eq.s32.totalorder %v4995_v17, %v5993_v52 }
 0x16e   :  { %4014 = vmatpush.msk.msrb.mxu3 %vm833_vm8, %v8773_v13  ;;  %4030 = vmatpush.msk.msra.mxu0 %vm849_vm9, %v8773_v13  ;;  %vm1019_vm8 = vcmp.eq.s32.totalorder %v5004_v20, %v5792_v45  ;;  %vm1035_vm9 = vcmp.eq.s32.totalorder %v5007_v21, %v5792_v45 }
 0x16f   :  { %4046 = vmatpush.msk.msra.mxu1 %vm865_vm10, %v8773_v13  ;;  %4062 = vmatpush.msk.msra.mxu2 %vm991_vm11, %v8773_v13  ;;  %vm1161_vm10 = vcmp.eq.s32.totalorder %v5001_v19, %v5993_v52  ;;  %vm1177_vm11 = vcmp.eq.s32.totalorder %v5004_v20, %v5993_v52 }
 0x170   :  { %4015 = vmatpush.msk.msrb.mxu3 %vm832_vm12, %v8773_v13  ;;  %4031 = vmatpush.msk.msra.mxu0 %vm848_vm13, %v8773_v13  ;;  %vm1018_vm12 = vcmp.eq.s32.totalorder %v5013_v23, %v5792_v45  ;;  %vm1034_vm13 = vcmp.eq.s32.totalorder %v5032_v25, %v5792_v45 }
 0x171   :  { %4047 = vmatpush.msk.msra.mxu1 %vm864_vm14, %v8773_v13  ;;  %4063 = vmatpush.msk.msra.mxu2 %vm990_vm15, %v8773_v13  ;;  %vm1160_vm14 = vcmp.eq.s32.totalorder %v5010_v22, %v5993_v52  ;;  %vm1176_vm15 = vcmp.eq.s32.totalorder %v5013_v23, %v5993_v52 }
 0x172   :  { %4016 = vmatpush.msk.msrb.mxu3 %vm831_vm0, %v8773_v13  ;;  %4032 = vmatpush.msk.msra.mxu0 %vm847_vm1, %v8773_v13  ;;  %vm1017_vm0 = vcmp.eq.s32.totalorder %v5048_v27, %v5792_v45  ;;  %vm1033_vm1 = vcmp.eq.s32.totalorder %v5051_v28, %v5792_v45 }
 0x173   :  { %4048 = vmatpush.msk.msra.mxu1 %vm863_vm2, %v8773_v13  ;;  %4064 = vmatpush.msk.msra.mxu2 %vm989_vm3, %v8773_v13  ;;  %vm1159_vm2 = vcmp.eq.s32.totalorder %v5039_v26, %v5993_v52  ;;  %vm1175_vm3 = vcmp.eq.s32.totalorder %v5048_v27, %v5993_v52 }
 0x174   :  { %943 = vmatmul.f32.vlgmr.msrb.gmra.mxu3 %v5584_v50  ;;  %963 = vmatmul.f32.vlgmr.msra.gmra.mxu0 %v5586_v48 }
 0x175   :  { %983 = vmatmul.f32.vlgmr.msra.gmra.mxu1 %v5588_v24  ;;  %1101 = vmatmul.f32.vlgmr.msra.gmra.mxu2 %v5584_v50 }
 0x176   :  { %4065 = vmatpush.msk.msra.mxu3 %vm1020_vm4, %v8773_v13  ;;  %4081 = vmatpush.msk.msrb.mxu0 %vm1036_vm5, %v8773_v13  ;;  %vm1016_vm4 = vcmp.eq.s32.totalorder %v5062_v31, %v5792_v45  ;;  %vm1032_vm5 = vcmp.eq.s32.totalorder %v5073_v32, %v5792_v45 }
 0x177   :  { %4097 = vmatpush.msk.msrb.mxu1 %vm1162_vm6, %v8773_v13  ;;  %4113 = vmatpush.msk.msrb.mxu2 %vm1178_vm7, %v8773_v13  ;;  %vm1158_vm6 = vcmp.eq.s32.totalorder %v5059_v30, %v5993_v52  ;;  %vm1174_vm7 = vcmp.eq.s32.totalorder %v5062_v31, %v5993_v52 }
 0x178   :  { %4066 = vmatpush.msk.msra.mxu3 %vm1019_vm8, %v8773_v13  ;;  %4082 = vmatpush.msk.msrb.mxu0 %vm1035_vm9, %v8773_v13  ;;  %vm1015_vm8 = vcmp.eq.s32.totalorder %v5091_v34, %v5792_v45  ;;  %vm1031_vm9 = vcmp.eq.s32.totalorder %v5102_v35, %v5792_v45 }
 0x179   :  { %4098 = vmatpush.msk.msrb.mxu1 %vm1161_vm10, %v8773_v13  ;;  %4114 = vmatpush.msk.msrb.mxu2 %vm1177_vm11, %v8773_v13  ;;  %vm1157_vm10 = vcmp.eq.s32.totalorder %v5076_v33, %v5993_v52  ;;  %vm1173_vm11 = vcmp.eq.s32.totalorder %v5091_v34, %v5993_v52 }
 0x17a   :  { %4067 = vmatpush.msk.msra.mxu3 %vm1018_vm12, %v8773_v13  ;;  %4083 = vmatpush.msk.msrb.mxu0 %vm1034_vm13, %v8773_v13  ;;  %vm1014_vm12 = vcmp.eq.s32.totalorder %v5120_v38, %v5792_v45  ;;  %vm1030_vm13 = vcmp.eq.s32.totalorder %v5123_v39, %v5792_v45 }
 0x17b   :  { %4099 = vmatpush.msk.msrb.mxu1 %vm1160_vm14, %v8773_v13  ;;  %4115 = vmatpush.msk.msrb.mxu2 %vm1176_vm15, %v8773_v13  ;;  %vm1156_vm14 = vcmp.eq.s32.totalorder %v5117_v37, %v5993_v52  ;;  %vm1172_vm15 = vcmp.eq.s32.totalorder %v5120_v38, %v5993_v52 }
 0x17c   :  { %4068 = vmatpush.msk.msra.mxu3 %vm1017_vm0, %v8773_v13  ;;  %4084 = vmatpush.msk.msrb.mxu0 %vm1033_vm1, %v8773_v13  ;;  %vm1013_vm0 = vcmp.eq.s32.totalorder %v5143_v42, %v5792_v45  ;;  %vm1029_vm1 = vcmp.eq.s32.totalorder %v5158_v43, %v5792_v45 }
 0x17d   :  { %4100 = vmatpush.msk.msrb.mxu1 %vm1159_vm2, %v8773_v13  ;;  %4116 = vmatpush.msk.msrb.mxu2 %vm1175_vm3, %v8773_v13  ;;  %vm1155_vm2 = vcmp.eq.s32.totalorder %v5140_v41, %v5993_v52  ;;  %vm1171_vm3 = vcmp.eq.s32.totalorder %v5143_v42, %v5993_v52 }
 0x17e   :  { %4069 = vmatpush.msk.msra.mxu3 %vm1016_vm4, %v8773_v13  ;;  %4085 = vmatpush.msk.msrb.mxu0 %vm1032_vm5, %v8773_v13  ;;  %vm1012_vm4 = vcmp.eq.s32.totalorder %v5184_v46, %v5792_v45  ;;  %vm1028_vm5 = vcmp.eq.s32.totalorder %v5193_v47, %v5792_v45 }
 0x17f   :  { %4101 = vmatpush.msk.msrb.mxu1 %vm1158_vm6, %v8773_v13  ;;  %4117 = vmatpush.msk.msrb.mxu2 %vm1174_vm7, %v8773_v13  ;;  %vm1154_vm6 = vcmp.eq.s32.totalorder %v5173_v44, %v5993_v52  ;;  %vm1170_vm7 = vcmp.eq.s32.totalorder %v5184_v46, %v5993_v52 }
 0x180   :  { %4070 = vmatpush.msk.msra.mxu3 %vm1015_vm8, %v8773_v13  ;;  %4086 = vmatpush.msk.msrb.mxu0 %vm1031_vm9, %v8773_v13  ;;  %vm1011_vm8 = vcmp.eq.s32.totalorder %v5232_v59, %v5792_v45  ;;  %vm1027_vm9 = vcmp.eq.s32.totalorder %v5235_v60, %v5792_v45 }
 0x181   :  { %4102 = vmatpush.msk.msrb.mxu1 %vm1157_vm10, %v8773_v13  ;;  %4118 = vmatpush.msk.msrb.mxu2 %vm1173_vm11, %v8773_v13  ;;  %vm1153_vm10 = vcmp.eq.s32.totalorder %v5229_v58, %v5993_v52  ;;  %vm1169_vm11 = vcmp.eq.s32.totalorder %v5232_v59, %v5993_v52 }
 0x182   :  { %4071 = vmatpush.msk.msra.mxu3 %vm1014_vm12, %v8773_v13  ;;  %4087 = vmatpush.msk.msrb.mxu0 %vm1030_vm13, %v8773_v13  ;;  %vm1010_vm12 = vcmp.eq.s32.totalorder %v5251_v62, %v5792_v45  ;;  %vm1026_vm13 = vcmp.eq.s32.totalorder %v5254_v63, %v5792_v45 }
 0x183   :  { %4103 = vmatpush.msk.msrb.mxu1 %vm1156_vm14, %v8773_v13  ;;  %4119 = vmatpush.msk.msrb.mxu2 %vm1172_vm15, %v8773_v13  ;;  %vm1152_vm14 = vcmp.eq.s32.totalorder %v5248_v61, %v5993_v52  ;;  %vm1168_vm15 = vcmp.eq.s32.totalorder %v5251_v62, %v5993_v52 }
 0x184   :  { %4072 = vmatpush.msk.msra.mxu3 %vm1013_vm0, %v8773_v13  ;;  %4088 = vmatpush.msk.msrb.mxu0 %vm1029_vm1, %v8773_v13  ;;  %vm1009_vm0 = vcmp.eq.s32.totalorder %v5262_v1, %v5792_v45  ;;  %vm1025_vm1 = vcmp.eq.s32.totalorder %v5265_v2, %v5792_v45 }
 0x185   :  { %4104 = vmatpush.msk.msrb.mxu1 %vm1155_vm2, %v8773_v13  ;;  %4120 = vmatpush.msk.msrb.mxu2 %vm1171_vm3, %v8773_v13  ;;  %vm1151_vm2 = vcmp.eq.s32.totalorder %v5257_v0, %v5993_v52  ;;  %vm1167_vm3 = vcmp.eq.s32.totalorder %v5262_v1, %v5993_v52 }
 0x186   :  { %4073 = vmatpush.msk.msra.mxu3 %vm1012_vm4, %v8773_v13  ;;  %4089 = vmatpush.msk.msrb.mxu0 %vm1028_vm5, %v8773_v13  ;;  %vm1008_vm4 = vcmp.eq.s32.totalorder %v5271_v4, %v5792_v45  ;;  %vm1024_vm5 = vcmp.eq.s32.totalorder %v5290_v5, %v5792_v45 }
 0x187   :  { %4105 = vmatpush.msk.msrb.mxu1 %vm1154_vm6, %v8773_v13  ;;  %4121 = vmatpush.msk.msrb.mxu2 %vm1170_vm7, %v8773_v13  ;;  %vm1150_vm6 = vcmp.eq.s32.totalorder %v5268_v3, %v5993_v52  ;;  %vm1166_vm7 = vcmp.eq.s32.totalorder %v5271_v4, %v5993_v52 }
 0x188   :  { %4074 = vmatpush.msk.msra.mxu3 %vm1011_vm8, %v8773_v13  ;;  %4090 = vmatpush.msk.msrb.mxu0 %vm1027_vm9, %v8773_v13  ;;  %vm1007_vm8 = vcmp.eq.s32.totalorder %v8775_v7, %v5792_v45  ;;  %vm1023_vm9 = vcmp.eq.s32.totalorder %v5315_v8, %v5792_v45 }
 0x189   :  { %4106 = vmatpush.msk.msrb.mxu1 %vm1153_vm10, %v8773_v13  ;;  %4122 = vmatpush.msk.msrb.mxu2 %vm1169_vm11, %v8773_v13  ;;  %vm1149_vm10 = vcmp.eq.s32.totalorder %v8774_v6, %v5993_v52  ;;  %vm1165_vm11 = vcmp.eq.s32.totalorder %v8775_v7, %v5993_v52 }
 0x18a   :  { %4075 = vmatpush.msk.msra.mxu3 %vm1010_vm12, %v8773_v13  ;;  %4091 = vmatpush.msk.msrb.mxu0 %vm1026_vm13, %v8773_v13  ;;  %vm1006_vm12 = vcmp.eq.s32.totalorder %v8778_v11, %v5792_v45  ;;  %vm1022_vm13 = vcmp.eq.s32.totalorder %v8776_v9, %v5792_v45 }
 0x18b   :  { %4107 = vmatpush.msk.msrb.mxu1 %vm1152_vm14, %v8773_v13  ;;  %4123 = vmatpush.msk.msrb.mxu2 %vm1168_vm15, %v8773_v13  ;;  %vm1148_vm14 = vcmp.eq.s32.totalorder %v8777_v10, %v5993_v52  ;;  %vm1164_vm15 = vcmp.eq.s32.totalorder %v8778_v11, %v5993_v52 }
 0x18c   :  { %4076 = vmatpush.msk.msra.mxu3 %vm1009_vm0, %v8773_v13  ;;  %4092 = vmatpush.msk.msrb.mxu0 %vm1025_vm1, %v8773_v13  ;;  %vm1005_vm0 = vcmp.eq.s32.totalorder %v8781_v14, %v5792_v45  ;;  %vm1021_vm1 = vcmp.eq.s32.totalorder %v8779_v12, %v5792_v45 }
 0x18d   :  { %4108 = vmatpush.msk.msrb.mxu1 %vm1151_vm2, %v8773_v13  ;;  %4124 = vmatpush.msk.msrb.mxu2 %vm1167_vm3, %v8773_v13  ;;  %vm1147_vm2 = vcmp.eq.s32.totalorder %v8780_v29, %v5993_v52  ;;  %vm1163_vm3 = vcmp.eq.s32.totalorder %v8781_v14, %v5993_v52 }
 0x18e   :  { %4077 = vmatpush.msk.msra.mxu3 %vm1008_vm4, %v8773_v13  ;;  %4093 = vmatpush.msk.msrb.mxu0 %vm1024_vm5, %v8773_v13  ;;  %vm1194_vm4 = vcmp.eq.s32.totalorder %v4998_v18, %v5993_v52  ;;  %vm1320_vm5 = vcmp.eq.s32.totalorder %v4992_v16, %v6188_v53 }
 0x18f   :  { %4109 = vmatpush.msk.msrb.mxu1 %vm1150_vm6, %v8773_v13  ;;  %4125 = vmatpush.msk.msrb.mxu2 %vm1166_vm7, %v8773_v13  ;;  %vm1336_vm6 = vcmp.eq.s32.totalorder %v4995_v17, %v6188_v53  ;;  %vm1352_vm7 = vcmp.eq.s32.totalorder %v4998_v18, %v6188_v53 }
 0x190   :  { %4078 = vmatpush.msk.msra.mxu3 %vm1007_vm8, %v8773_v13  ;;  %4094 = vmatpush.msk.msrb.mxu0 %vm1023_vm9, %v8773_v13  ;;  %vm1193_vm8 = vcmp.eq.s32.totalorder %v5007_v21, %v5993_v52  ;;  %vm1319_vm9 = vcmp.eq.s32.totalorder %v5001_v19, %v6188_v53 }
 0x191   :  { %4110 = vmatpush.msk.msrb.mxu1 %vm1149_vm10, %v8773_v13  ;;  %4126 = vmatpush.msk.msrb.mxu2 %vm1165_vm11, %v8773_v13  ;;  %vm1335_vm10 = vcmp.eq.s32.totalorder %v5004_v20, %v6188_v53  ;;  %vm1351_vm11 = vcmp.eq.s32.totalorder %v5007_v21, %v6188_v53 }
 0x192   :  { %4079 = vmatpush.msk.msra.mxu3 %vm1006_vm12, %v8773_v13  ;;  %4095 = vmatpush.msk.msrb.mxu0 %vm1022_vm13, %v8773_v13  ;;  %vm1192_vm12 = vcmp.eq.s32.totalorder %v5032_v25, %v5993_v52  ;;  %vm1318_vm13 = vcmp.eq.s32.totalorder %v5010_v22, %v6188_v53 }
 0x193   :  { %4111 = vmatpush.msk.msrb.mxu1 %vm1148_vm14, %v8773_v13  ;;  %4127 = vmatpush.msk.msrb.mxu2 %vm1164_vm15, %v8773_v13  ;;  %vm1334_vm14 = vcmp.eq.s32.totalorder %v5013_v23, %v6188_v53  ;;  %vm1350_vm15 = vcmp.eq.s32.totalorder %v5032_v25, %v6188_v53 }
 0x194   :  { %4080 = vmatpush.msk.msra.mxu3 %vm1005_vm0, %v8773_v13  ;;  %4096 = vmatpush.msk.msrb.mxu0 %vm1021_vm1, %v8773_v13  ;;  %vm1191_vm0 = vcmp.eq.s32.totalorder %v5051_v28, %v5993_v52  ;;  %vm1317_vm1 = vcmp.eq.s32.totalorder %v5039_v26, %v6188_v53 }
 0x195   :  { %4112 = vmatpush.msk.msrb.mxu1 %vm1147_vm2, %v8773_v13  ;;  %4128 = vmatpush.msk.msrb.mxu2 %vm1163_vm3, %v8773_v13  ;;  %vm1333_vm2 = vcmp.eq.s32.totalorder %v5048_v27, %v6188_v53  ;;  %vm1349_vm3 = vcmp.eq.s32.totalorder %v5051_v28, %v6188_v53 }
 0x196   :  { %1121 = vmatmul.f32.vlgmr.msra.gmra.mxu3 %v5586_v48  ;;  %1141 = vmatmul.f32.vlgmr.msrb.gmra.mxu0 %v5588_v24 }
 0x197   :  { %1259 = vmatmul.f32.vlgmr.msrb.gmra.mxu1 %v5584_v50  ;;  %1279 = vmatmul.f32.vlgmr.msrb.gmra.mxu2 %v5586_v48 }
 0x198   :  { %4129 = vmatpush.msk.msrb.mxu3 %vm1194_vm4, %v8773_v13  ;;  %4145 = vmatpush.msk.msra.mxu0 %vm1320_vm5, %v8773_v13  ;;  %vm1190_vm4 = vcmp.eq.s32.totalorder %v5073_v32, %v5993_v52  ;;  %vm1316_vm5 = vcmp.eq.s32.totalorder %v5059_v30, %v6188_v53 }
 0x199   :  { %4161 = vmatpush.msk.msra.mxu1 %vm1336_vm6, %v8773_v13  ;;  %4177 = vmatpush.msk.msra.mxu2 %vm1352_vm7, %v8773_v13  ;;  %vm1332_vm6 = vcmp.eq.s32.totalorder %v5062_v31, %v6188_v53  ;;  %vm1348_vm7 = vcmp.eq.s32.totalorder %v5073_v32, %v6188_v53 }
 0x19a   :  { %4130 = vmatpush.msk.msrb.mxu3 %vm1193_vm8, %v8773_v13  ;;  %4146 = vmatpush.msk.msra.mxu0 %vm1319_vm9, %v8773_v13  ;;  %vm1189_vm8 = vcmp.eq.s32.totalorder %v5102_v35, %v5993_v52  ;;  %vm1315_vm9 = vcmp.eq.s32.totalorder %v5076_v33, %v6188_v53 }
 0x19b   :  { %4162 = vmatpush.msk.msra.mxu1 %vm1335_vm10, %v8773_v13  ;;  %4178 = vmatpush.msk.msra.mxu2 %vm1351_vm11, %v8773_v13  ;;  %vm1331_vm10 = vcmp.eq.s32.totalorder %v5091_v34, %v6188_v53  ;;  %vm1347_vm11 = vcmp.eq.s32.totalorder %v5102_v35, %v6188_v53 }
 0x19c   :  { %4131 = vmatpush.msk.msrb.mxu3 %vm1192_vm12, %v8773_v13  ;;  %4147 = vmatpush.msk.msra.mxu0 %vm1318_vm13, %v8773_v13  ;;  %vm1188_vm12 = vcmp.eq.s32.totalorder %v5123_v39, %v5993_v52  ;;  %vm1314_vm13 = vcmp.eq.s32.totalorder %v5117_v37, %v6188_v53 }
 0x19d   :  { %4163 = vmatpush.msk.msra.mxu1 %vm1334_vm14, %v8773_v13  ;;  %4179 = vmatpush.msk.msra.mxu2 %vm1350_vm15, %v8773_v13  ;;  %vm1330_vm14 = vcmp.eq.s32.totalorder %v5120_v38, %v6188_v53  ;;  %vm1346_vm15 = vcmp.eq.s32.totalorder %v5123_v39, %v6188_v53 }
 0x19e   :  { %4132 = vmatpush.msk.msrb.mxu3 %vm1191_vm0, %v8773_v13  ;;  %4148 = vmatpush.msk.msra.mxu0 %vm1317_vm1, %v8773_v13  ;;  %vm1187_vm0 = vcmp.eq.s32.totalorder %v5158_v43, %v5993_v52  ;;  %vm1313_vm1 = vcmp.eq.s32.totalorder %v5140_v41, %v6188_v53 }
 0x19f   :  { %4164 = vmatpush.msk.msra.mxu1 %vm1333_vm2, %v8773_v13  ;;  %4180 = vmatpush.msk.msra.mxu2 %vm1349_vm3, %v8773_v13  ;;  %vm1329_vm2 = vcmp.eq.s32.totalorder %v5143_v42, %v6188_v53  ;;  %vm1345_vm3 = vcmp.eq.s32.totalorder %v5158_v43, %v6188_v53 }
 0x1a0   :  { %4133 = vmatpush.msk.msrb.mxu3 %vm1190_vm4, %v8773_v13  ;;  %4149 = vmatpush.msk.msra.mxu0 %vm1316_vm5, %v8773_v13  ;;  %vm1186_vm4 = vcmp.eq.s32.totalorder %v5193_v47, %v5993_v52  ;;  %vm1312_vm5 = vcmp.eq.s32.totalorder %v5173_v44, %v6188_v53 }
 0x1a1   :  { %4165 = vmatpush.msk.msra.mxu1 %vm1332_vm6, %v8773_v13  ;;  %4181 = vmatpush.msk.msra.mxu2 %vm1348_vm7, %v8773_v13  ;;  %vm1328_vm6 = vcmp.eq.s32.totalorder %v5184_v46, %v6188_v53  ;;  %vm1344_vm7 = vcmp.eq.s32.totalorder %v5193_v47, %v6188_v53 }
 0x1a2   :  { %4134 = vmatpush.msk.msrb.mxu3 %vm1189_vm8, %v8773_v13  ;;  %4150 = vmatpush.msk.msra.mxu0 %vm1315_vm9, %v8773_v13  ;;  %vm1185_vm8 = vcmp.eq.s32.totalorder %v5235_v60, %v5993_v52  ;;  %vm1311_vm9 = vcmp.eq.s32.totalorder %v5229_v58, %v6188_v53 }
 0x1a3   :  { %4166 = vmatpush.msk.msra.mxu1 %vm1331_vm10, %v8773_v13  ;;  %4182 = vmatpush.msk.msra.mxu2 %vm1347_vm11, %v8773_v13  ;;  %vm1327_vm10 = vcmp.eq.s32.totalorder %v5232_v59, %v6188_v53  ;;  %vm1343_vm11 = vcmp.eq.s32.totalorder %v5235_v60, %v6188_v53 }
 0x1a4   :  { %4135 = vmatpush.msk.msrb.mxu3 %vm1188_vm12, %v8773_v13  ;;  %4151 = vmatpush.msk.msra.mxu0 %vm1314_vm13, %v8773_v13  ;;  %vm1184_vm12 = vcmp.eq.s32.totalorder %v5254_v63, %v5993_v52  ;;  %vm1310_vm13 = vcmp.eq.s32.totalorder %v5248_v61, %v6188_v53 }
 0x1a5   :  { %4167 = vmatpush.msk.msra.mxu1 %vm1330_vm14, %v8773_v13  ;;  %4183 = vmatpush.msk.msra.mxu2 %vm1346_vm15, %v8773_v13  ;;  %vm1326_vm14 = vcmp.eq.s32.totalorder %v5251_v62, %v6188_v53  ;;  %vm1342_vm15 = vcmp.eq.s32.totalorder %v5254_v63, %v6188_v53 }
 0x1a6   :  { %4136 = vmatpush.msk.msrb.mxu3 %vm1187_vm0, %v8773_v13  ;;  %4152 = vmatpush.msk.msra.mxu0 %vm1313_vm1, %v8773_v13  ;;  %vm1183_vm0 = vcmp.eq.s32.totalorder %v5265_v2, %v5993_v52  ;;  %vm1309_vm1 = vcmp.eq.s32.totalorder %v5257_v0, %v6188_v53 }
 0x1a7   :  { %4168 = vmatpush.msk.msra.mxu1 %vm1329_vm2, %v8773_v13  ;;  %4184 = vmatpush.msk.msra.mxu2 %vm1345_vm3, %v8773_v13  ;;  %vm1325_vm2 = vcmp.eq.s32.totalorder %v5262_v1, %v6188_v53  ;;  %vm1341_vm3 = vcmp.eq.s32.totalorder %v5265_v2, %v6188_v53 }
 0x1a8   :  { %4137 = vmatpush.msk.msrb.mxu3 %vm1186_vm4, %v8773_v13  ;;  %4153 = vmatpush.msk.msra.mxu0 %vm1312_vm5, %v8773_v13  ;;  %vm1182_vm4 = vcmp.eq.s32.totalorder %v5290_v5, %v5993_v52  ;;  %vm1308_vm5 = vcmp.eq.s32.totalorder %v5268_v3, %v6188_v53 }
 0x1a9   :  { %4169 = vmatpush.msk.msra.mxu1 %vm1328_vm6, %v8773_v13  ;;  %4185 = vmatpush.msk.msra.mxu2 %vm1344_vm7, %v8773_v13  ;;  %vm1324_vm6 = vcmp.eq.s32.totalorder %v5271_v4, %v6188_v53  ;;  %vm1340_vm7 = vcmp.eq.s32.totalorder %v5290_v5, %v6188_v53 }
 0x1aa   :  { %4138 = vmatpush.msk.msrb.mxu3 %vm1185_vm8, %v8773_v13  ;;  %4154 = vmatpush.msk.msra.mxu0 %vm1311_vm9, %v8773_v13  ;;  %vm1181_vm8 = vcmp.eq.s32.totalorder %v5315_v8, %v5993_v52  ;;  %vm1307_vm9 = vcmp.eq.s32.totalorder %v8774_v6, %v6188_v53 }
 0x1ab   :  { %4170 = vmatpush.msk.msra.mxu1 %vm1327_vm10, %v8773_v13  ;;  %4186 = vmatpush.msk.msra.mxu2 %vm1343_vm11, %v8773_v13  ;;  %vm1323_vm10 = vcmp.eq.s32.totalorder %v8775_v7, %v6188_v53  ;;  %vm1339_vm11 = vcmp.eq.s32.totalorder %v5315_v8, %v6188_v53  ;;  %v332_v54 = vpop.f32.mrf.mxu0 }
 0x1ac   :  { %4139 = vmatpush.msk.msrb.mxu3 %vm1184_vm12, %v8773_v13  ;;  %4155 = vmatpush.msk.msra.mxu0 %vm1310_vm13, %v8773_v13  ;;  %vm1180_vm12 = vcmp.eq.s32.totalorder %v8776_v9, %v5993_v52  ;;  %vm1306_vm13 = vcmp.eq.s32.totalorder %v8777_v10, %v6188_v53  ;;  %v352_v57 = vpop.f32.mrf.mxu1 }
 0x1ad   :  { %4171 = vmatpush.msk.msra.mxu1 %vm1326_vm14, %v8773_v13  ;;  %4187 = vmatpush.msk.msra.mxu2 %vm1342_vm15, %v8773_v13  ;;  %vm1322_vm14 = vcmp.eq.s32.totalorder %v8778_v11, %v6188_v53  ;;  %vm1338_vm15 = vcmp.eq.s32.totalorder %v8776_v9, %v6188_v53 }
 0x1ae   :  { %4140 = vmatpush.msk.msrb.mxu3 %vm1183_vm0, %v8773_v13  ;;  %4156 = vmatpush.msk.msra.mxu0 %vm1309_vm1, %v8773_v13  ;;  %vm1179_vm0 = vcmp.eq.s32.totalorder %v8779_v12, %v5993_v52  ;;  %vm1305_vm1 = vcmp.eq.s32.totalorder %v8780_v29, %v6188_v53 }
 0x1af   :  { %4172 = vmatpush.msk.msra.mxu1 %vm1325_vm2, %v8773_v13  ;;  %4188 = vmatpush.msk.msra.mxu2 %vm1341_vm3, %v8773_v13  ;;  %vm1321_vm2 = vcmp.eq.s32.totalorder %v8781_v14, %v6188_v53  ;;  %vm1337_vm3 = vcmp.eq.s32.totalorder %v8779_v12, %v6188_v53 }
 0x1b0   :  { %4141 = vmatpush.msk.msrb.mxu3 %vm1182_vm4, %v8773_v13  ;;  %4157 = vmatpush.msk.msra.mxu0 %vm1308_vm5, %v8773_v13  ;;  %vm1478_vm4 = vcmp.eq.s32.totalorder %v4992_v16, %v6389_v51  ;;  %vm1494_vm5 = vcmp.eq.s32.totalorder %v4995_v17, %v6389_v51 }
 0x1b1   :  { %4173 = vmatpush.msk.msra.mxu1 %vm1324_vm6, %v8773_v13  ;;  %4189 = vmatpush.msk.msra.mxu2 %vm1340_vm7, %v8773_v13  ;;  %v312_v56 = vpop.f32.mrf.mxu3  ;;  %vm1510_vm6 = vcmp.eq.s32.totalorder %v4998_v18, %v6389_v51  ;;  %vm1636_vm7 = vcmp.eq.s32.totalorder %v4992_v16, %v6406_v36 }
 0x1b2   :  { %4142 = vmatpush.msk.msrb.mxu3 %vm1181_vm8, %v8773_v13  ;;  %4158 = vmatpush.msk.msra.mxu0 %vm1307_vm9, %v8773_v13  ;;  %v333_v49 = vadd.f32 %v332_v54, %v312_v56  ;;  %v470_v55 = vpop.f32.mrf.mxu2  ;;  %vm1477_vm8 = vcmp.eq.s32.totalorder %v5001_v19, %v6389_v51  ;;  %vm1493_vm9 = vcmp.eq.s32.totalorder %v5004_v20, %v6389_v51 }
 0x1b3   :  { %4174 = vmatpush.msk.msra.mxu1 %vm1323_vm10, %v8773_v13  ;;  %4190 = vmatpush.msk.msra.mxu2 %vm1339_vm11, %v8773_v13  ;;  %vm1509_vm10 = vcmp.eq.s32.totalorder %v5007_v21, %v6389_v51  ;;  %vm1635_vm11 = vcmp.eq.s32.totalorder %v5001_v19, %v6406_v36 }
 0x1b4   :  { %4143 = vmatpush.msk.msrb.mxu3 %vm1180_vm12, %v8773_v13  ;;  %4159 = vmatpush.msk.msra.mxu0 %vm1306_vm13, %v8773_v13  ;;  %v6408_v40 = vadd.f32 %v352_v57, %v333_v49  ;;  %vm1476_vm12 = vcmp.eq.s32.totalorder %v5010_v22, %v6389_v51  ;;  %vm1492_vm13 = vcmp.eq.s32.totalorder %v5013_v23, %v6389_v51 }
 0x1b5   :  { %4175 = vmatpush.msk.msra.mxu1 %vm1322_vm14, %v8773_v13  ;;  %4191 = vmatpush.msk.msra.mxu2 %vm1338_vm15, %v8773_v13  ;;  %vm1508_vm14 = vcmp.eq.s32.totalorder %v5032_v25, %v6389_v51  ;;  %vm1634_vm15 = vcmp.eq.s32.totalorder %v5010_v22, %v6406_v36  ;;  %v510_v54 = vpop.f32.mrf.mxu0 }
 0x1b6   :  { %8782 = vst [vmem:[#allocation3_spill] sm:$0xff] %v6408_v40  ;;  %4144 = vmatpush.msk.msrb.mxu3 %vm1179_vm0, %v8773_v13  ;;  %4160 = vmatpush.msk.msra.mxu0 %vm1305_vm1, %v8773_v13  ;;  %v628_v45 = vpop.f32.mrf.mxu1  ;;  %vm1475_vm0 = vcmp.eq.s32.totalorder %v5039_v26, %v6389_v51  ;;  %vm1491_vm1 = vcmp.eq.s32.totalorder %v5048_v27, %v6389_v51 }
 0x1b7   :  { %4176 = vmatpush.msk.msra.mxu1 %vm1321_vm2, %v8773_v13  ;;  %4192 = vmatpush.msk.msra.mxu2 %vm1337_vm3, %v8773_v13  ;;  %vm1507_vm2 = vcmp.eq.s32.totalorder %v5051_v28, %v6389_v51  ;;  %vm1633_vm3 = vcmp.eq.s32.totalorder %v5039_v26, %v6406_v36 }
 0x1b8   :  { %1299 = vmatmul.f32.vlgmr.msrb.gmra.mxu3 %v5588_v24  ;;  %1417 = vmatmul.f32.vlgmr.msra.gmra.mxu0 %v5584_v50 }
 0x1b9   :  { %1437 = vmatmul.f32.vlgmr.msra.gmra.mxu1 %v5586_v48  ;;  %1457 = vmatmul.f32.vlgmr.msra.gmra.mxu2 %v5588_v24 }
 0x1ba   :  { %4193 = vmatpush.msk.msra.mxu3 %vm1478_vm4, %v8773_v13  ;;  %4209 = vmatpush.msk.msrb.mxu0 %vm1494_vm5, %v8773_v13  ;;  %vm1474_vm4 = vcmp.eq.s32.totalorder %v5059_v30, %v6389_v51  ;;  %vm1490_vm5 = vcmp.eq.s32.totalorder %v5062_v31, %v6389_v51 }
 0x1bb   :  { %4225 = vmatpush.msk.msrb.mxu1 %vm1510_vm6, %v8773_v13  ;;  %4241 = vmatpush.msk.msrb.mxu2 %vm1636_vm7, %v8773_v13  ;;  %v490_v15 = vpop.f32.mrf.mxu3  ;;  %vm1506_vm6 = vcmp.eq.s32.totalorder %v5073_v32, %v6389_v51  ;;  %vm1632_vm7 = vcmp.eq.s32.totalorder %v5059_v30, %v6406_v36 }
 0x1bc   :  { %4194 = vmatpush.msk.msra.mxu3 %vm1477_vm8, %v8773_v13  ;;  %4210 = vmatpush.msk.msrb.mxu0 %vm1493_vm9, %v8773_v13  ;;  %v491_v52 = vadd.f32 %v490_v15, %v470_v55  ;;  %v648_v53 = vpop.f32.mrf.mxu2  ;;  %vm1473_vm8 = vcmp.eq.s32.totalorder %v5076_v33, %v6389_v51  ;;  %vm1489_vm9 = vcmp.eq.s32.totalorder %v5091_v34, %v6389_v51 }
 0x1bd   :  { %4226 = vmatpush.msk.msrb.mxu1 %vm1509_vm10, %v8773_v13  ;;  %4242 = vmatpush.msk.msrb.mxu2 %vm1635_vm11, %v8773_v13  ;;  %v6462_v56 = vadd.f32 %v648_v53, %v628_v45  ;;  %vm1505_vm10 = vcmp.eq.s32.totalorder %v5102_v35, %v6389_v51  ;;  %vm1631_vm11 = vcmp.eq.s32.totalorder %v5076_v33, %v6406_v36  ;;  %v6633_v53 = vld [vmem:[%s8731_s4 + $0xa] ss:$0 sm:$0xff] }
 0x1be   :  { %4195 = vmatpush.msk.msra.mxu3 %vm1476_vm12, %v8773_v13  ;;  %4211 = vmatpush.msk.msrb.mxu0 %vm1492_vm13, %v8773_v13  ;;  %v6476_v57 = vadd.f32 %v510_v54, %v491_v52  ;;  %vm1472_vm12 = vcmp.eq.s32.totalorder %v5117_v37, %v6389_v51  ;;  %vm1488_vm13 = vcmp.eq.s32.totalorder %v5120_v38, %v6389_v51 }
 0x1bf   :  { %4227 = vmatpush.msk.msrb.mxu1 %vm1508_vm14, %v8773_v13  ;;  %4243 = vmatpush.msk.msrb.mxu2 %vm1634_vm15, %v8773_v13  ;;  %vm1504_vm14 = vcmp.eq.s32.totalorder %v5123_v39, %v6389_v51  ;;  %vm1630_vm15 = vcmp.eq.s32.totalorder %v5117_v37, %v6406_v36 }
 0x1c0   :  { %8783 = vst [vmem:[#allocation4_spill] sm:$0xff] %v6476_v57  ;;  %4196 = vmatpush.msk.msra.mxu3 %vm1475_vm0, %v8773_v13  ;;  %4212 = vmatpush.msk.msrb.mxu0 %vm1491_vm1, %v8773_v13  ;;  %vm1471_vm0 = vcmp.eq.s32.totalorder %v5140_v41, %v6389_v51  ;;  %vm1487_vm1 = vcmp.eq.s32.totalorder %v5143_v42, %v6389_v51 }
 0x1c1   :  { %4228 = vmatpush.msk.msrb.mxu1 %vm1507_vm2, %v8773_v13  ;;  %4244 = vmatpush.msk.msrb.mxu2 %vm1633_vm3, %v8773_v13  ;;  %vm1503_vm2 = vcmp.eq.s32.totalorder %v5158_v43, %v6389_v51  ;;  %vm1629_vm3 = vcmp.eq.s32.totalorder %v5140_v41, %v6406_v36 }
 0x1c2   :  { %4197 = vmatpush.msk.msra.mxu3 %vm1474_vm4, %v8773_v13  ;;  %4213 = vmatpush.msk.msrb.mxu0 %vm1490_vm5, %v8773_v13  ;;  %vm1470_vm4 = vcmp.eq.s32.totalorder %v5173_v44, %v6389_v51  ;;  %vm1486_vm5 = vcmp.eq.s32.totalorder %v5184_v46, %v6389_v51 }
 0x1c3   :  { %4229 = vmatpush.msk.msrb.mxu1 %vm1506_vm6, %v8773_v13  ;;  %4245 = vmatpush.msk.msrb.mxu2 %vm1632_vm7, %v8773_v13  ;;  %vm1502_vm6 = vcmp.eq.s32.totalorder %v5193_v47, %v6389_v51  ;;  %vm1628_vm7 = vcmp.eq.s32.totalorder %v5173_v44, %v6406_v36 }
 0x1c4   :  { %4198 = vmatpush.msk.msra.mxu3 %vm1473_vm8, %v8773_v13  ;;  %4214 = vmatpush.msk.msrb.mxu0 %vm1489_vm9, %v8773_v13  ;;  %vm1469_vm8 = vcmp.eq.s32.totalorder %v5229_v58, %v6389_v51  ;;  %vm1485_vm9 = vcmp.eq.s32.totalorder %v5232_v59, %v6389_v51 }
 0x1c5   :  { %4230 = vmatpush.msk.msrb.mxu1 %vm1505_vm10, %v8773_v13  ;;  %4246 = vmatpush.msk.msrb.mxu2 %vm1631_vm11, %v8773_v13  ;;  %vm1501_vm10 = vcmp.eq.s32.totalorder %v5235_v60, %v6389_v51  ;;  %vm1627_vm11 = vcmp.eq.s32.totalorder %v5229_v58, %v6406_v36 }
 0x1c6   :  { %4199 = vmatpush.msk.msra.mxu3 %vm1472_vm12, %v8773_v13  ;;  %4215 = vmatpush.msk.msrb.mxu0 %vm1488_vm13, %v8773_v13  ;;  %vm1468_vm12 = vcmp.eq.s32.totalorder %v5248_v61, %v6389_v51  ;;  %vm1484_vm13 = vcmp.eq.s32.totalorder %v5251_v62, %v6389_v51 }
 0x1c7   :  { %4231 = vmatpush.msk.msrb.mxu1 %vm1504_vm14, %v8773_v13  ;;  %4247 = vmatpush.msk.msrb.mxu2 %vm1630_vm15, %v8773_v13  ;;  %vm1500_vm14 = vcmp.eq.s32.totalorder %v5254_v63, %v6389_v51  ;;  %vm1626_vm15 = vcmp.eq.s32.totalorder %v5248_v61, %v6406_v36 }
 0x1c8   :  { %4200 = vmatpush.msk.msra.mxu3 %vm1471_vm0, %v8773_v13  ;;  %4216 = vmatpush.msk.msrb.mxu0 %vm1487_vm1, %v8773_v13  ;;  %vm1467_vm0 = vcmp.eq.s32.totalorder %v5257_v0, %v6389_v51  ;;  %vm1483_vm1 = vcmp.eq.s32.totalorder %v5262_v1, %v6389_v51 }
 0x1c9   :  { %4232 = vmatpush.msk.msrb.mxu1 %vm1503_vm2, %v8773_v13  ;;  %4248 = vmatpush.msk.msrb.mxu2 %vm1629_vm3, %v8773_v13  ;;  %vm1499_vm2 = vcmp.eq.s32.totalorder %v5265_v2, %v6389_v51  ;;  %vm1625_vm3 = vcmp.eq.s32.totalorder %v5257_v0, %v6406_v36 }
 0x1ca   :  { %4201 = vmatpush.msk.msra.mxu3 %vm1470_vm4, %v8773_v13  ;;  %4217 = vmatpush.msk.msrb.mxu0 %vm1486_vm5, %v8773_v13  ;;  %vm1466_vm4 = vcmp.eq.s32.totalorder %v5268_v3, %v6389_v51  ;;  %vm1482_vm5 = vcmp.eq.s32.totalorder %v5271_v4, %v6389_v51 }
 0x1cb   :  { %4233 = vmatpush.msk.msrb.mxu1 %vm1502_vm6, %v8773_v13  ;;  %4249 = vmatpush.msk.msrb.mxu2 %vm1628_vm7, %v8773_v13  ;;  %vm1498_vm6 = vcmp.eq.s32.totalorder %v5290_v5, %v6389_v51  ;;  %vm1624_vm7 = vcmp.eq.s32.totalorder %v5268_v3, %v6406_v36 }
 0x1cc   :  { %4202 = vmatpush.msk.msra.mxu3 %vm1469_vm8, %v8773_v13  ;;  %4218 = vmatpush.msk.msrb.mxu0 %vm1485_vm9, %v8773_v13  ;;  %vm1465_vm8 = vcmp.eq.s32.totalorder %v8774_v6, %v6389_v51  ;;  %vm1481_vm9 = vcmp.eq.s32.totalorder %v8775_v7, %v6389_v51 }
 0x1cd   :  { %4234 = vmatpush.msk.msrb.mxu1 %vm1501_vm10, %v8773_v13  ;;  %4250 = vmatpush.msk.msrb.mxu2 %vm1627_vm11, %v8773_v13  ;;  %vm1497_vm10 = vcmp.eq.s32.totalorder %v5315_v8, %v6389_v51  ;;  %vm1623_vm11 = vcmp.eq.s32.totalorder %v8774_v6, %v6406_v36 }
 0x1ce   :  { %4203 = vmatpush.msk.msra.mxu3 %vm1468_vm12, %v8773_v13  ;;  %4219 = vmatpush.msk.msrb.mxu0 %vm1484_vm13, %v8773_v13  ;;  %vm1464_vm12 = vcmp.eq.s32.totalorder %v8777_v10, %v6389_v51  ;;  %vm1480_vm13 = vcmp.eq.s32.totalorder %v8778_v11, %v6389_v51 }
 0x1cf   :  { %4235 = vmatpush.msk.msrb.mxu1 %vm1500_vm14, %v8773_v13  ;;  %4251 = vmatpush.msk.msrb.mxu2 %vm1626_vm15, %v8773_v13  ;;  %v786_v55 = vpop.f32.mrf.mxu0  ;;  %vm1496_vm14 = vcmp.eq.s32.totalorder %v8776_v9, %v6389_v51  ;;  %vm1622_vm15 = vcmp.eq.s32.totalorder %v8777_v10, %v6406_v36 }
 0x1d0   :  { %4204 = vmatpush.msk.msra.mxu3 %vm1467_vm0, %v8773_v13  ;;  %4220 = vmatpush.msk.msrb.mxu0 %vm1483_vm1, %v8773_v13  ;;  %v806_v15 = vpop.f32.mrf.mxu1  ;;  %vm1463_vm0 = vcmp.eq.s32.totalorder %v8780_v29, %v6389_v51  ;;  %vm1479_vm1 = vcmp.eq.s32.totalorder %v8781_v14, %v6389_v51 }
 0x1d1   :  { %4236 = vmatpush.msk.msrb.mxu1 %vm1499_vm2, %v8773_v13  ;;  %4252 = vmatpush.msk.msrb.mxu2 %vm1625_vm3, %v8773_v13  ;;  %v807_v45 = vadd.f32 %v806_v15, %v786_v55  ;;  %vm1495_vm2 = vcmp.eq.s32.totalorder %v8779_v12, %v6389_v51  ;;  %vm1621_vm3 = vcmp.eq.s32.totalorder %v8780_v29, %v6406_v36 }
 0x1d2   :  { %4205 = vmatpush.msk.msra.mxu3 %vm1466_vm4, %v8773_v13  ;;  %4221 = vmatpush.msk.msrb.mxu0 %vm1482_vm5, %v8773_v13  ;;  %vm1652_vm4 = vcmp.eq.s32.totalorder %v4995_v17, %v6406_v36  ;;  %vm1668_vm5 = vcmp.eq.s32.totalorder %v4998_v18, %v6406_v36 }
 0x1d3   :  { %4237 = vmatpush.msk.msrb.mxu1 %vm1498_vm6, %v8773_v13  ;;  %4253 = vmatpush.msk.msrb.mxu2 %vm1624_vm7, %v8773_v13  ;;  %vm1794_vm6 = vcmp.eq.s32.totalorder %v4992_v16, %v6633_v53  ;;  %vm1810_vm7 = vcmp.eq.s32.totalorder %v4995_v17, %v6633_v53 }
 0x1d4   :  { %4206 = vmatpush.msk.msra.mxu3 %vm1465_vm8, %v8773_v13  ;;  %4222 = vmatpush.msk.msrb.mxu0 %vm1481_vm9, %v8773_v13  ;;  %vm1651_vm8 = vcmp.eq.s32.totalorder %v5004_v20, %v6406_v36  ;;  %vm1667_vm9 = vcmp.eq.s32.totalorder %v5007_v21, %v6406_v36 }
 0x1d5   :  { %4238 = vmatpush.msk.msrb.mxu1 %vm1497_vm10, %v8773_v13  ;;  %4254 = vmatpush.msk.msrb.mxu2 %vm1623_vm11, %v8773_v13  ;;  %v668_v52 = vpop.f32.mrf.mxu3  ;;  %vm1793_vm10 = vcmp.eq.s32.totalorder %v5001_v19, %v6633_v53  ;;  %vm1809_vm11 = vcmp.eq.s32.totalorder %v5004_v20, %v6633_v53 }
 0x1d6   :  { %4207 = vmatpush.msk.msra.mxu3 %vm1464_vm12, %v8773_v13  ;;  %4223 = vmatpush.msk.msrb.mxu0 %vm1480_vm13, %v8773_v13  ;;  %v6636_v54 = vadd.f32 %v668_v52, %v6462_v56  ;;  %v826_v55 = vpop.f32.mrf.mxu2  ;;  %vm1650_vm12 = vcmp.eq.s32.totalorder %v5013_v23, %v6406_v36  ;;  %vm1666_vm13 = vcmp.eq.s32.totalorder %v5032_v25, %v6406_v36  ;;  %v6835_v56 = vld [vmem:[%s8731_s4 + $0xb] ss:$0 sm:$0xff] }
 0x1d7   :  { %4239 = vmatpush.msk.msrb.mxu1 %vm1496_vm14, %v8773_v13  ;;  %4255 = vmatpush.msk.msrb.mxu2 %vm1622_vm15, %v8773_v13  ;;  %v6640_v15 = vadd.f32 %v826_v55, %v807_v45  ;;  %vm1792_vm14 = vcmp.eq.s32.totalorder %v5010_v22, %v6633_v53  ;;  %vm1808_vm15 = vcmp.eq.s32.totalorder %v5013_v23, %v6633_v53 }
 0x1d8   :  { %8784 = vst [vmem:[#allocation7_spill] sm:$0xff] %v6636_v54  ;;  %4208 = vmatpush.msk.msra.mxu3 %vm1463_vm0, %v8773_v13  ;;  %4224 = vmatpush.msk.msrb.mxu0 %vm1479_vm1, %v8773_v13  ;;  %vm1649_vm0 = vcmp.eq.s32.totalorder %v5048_v27, %v6406_v36  ;;  %vm1665_vm1 = vcmp.eq.s32.totalorder %v5051_v28, %v6406_v36 }
 0x1d9   :  { %8785 = vst [vmem:[#allocation5_spill] sm:$0xff] %v6640_v15  ;;  %4240 = vmatpush.msk.msrb.mxu1 %vm1495_vm2, %v8773_v13  ;;  %4256 = vmatpush.msk.msrb.mxu2 %vm1621_vm3, %v8773_v13  ;;  %vm1791_vm2 = vcmp.eq.s32.totalorder %v5039_v26, %v6633_v53  ;;  %vm1807_vm3 = vcmp.eq.s32.totalorder %v5048_v27, %v6633_v53 }
 0x1da   :  { %1575 = vmatmul.f32.vlgmr.msra.gmra.mxu3 %v5584_v50  ;;  %1595 = vmatmul.f32.vlgmr.msrb.gmra.mxu0 %v5586_v48 }
 0x1db   :  { %1615 = vmatmul.f32.vlgmr.msrb.gmra.mxu1 %v5588_v24  ;;  %1733 = vmatmul.f32.vlgmr.msrb.gmra.mxu2 %v5584_v50 }
 0x1dc   :  { %4257 = vmatpush.msk.msrb.mxu3 %vm1652_vm4, %v8773_v13  ;;  %4273 = vmatpush.msk.msra.mxu0 %vm1668_vm5, %v8773_v13  ;;  %vm1648_vm4 = vcmp.eq.s32.totalorder %v5062_v31, %v6406_v36  ;;  %vm1664_vm5 = vcmp.eq.s32.totalorder %v5073_v32, %v6406_v36 }
 0x1dd   :  { %4289 = vmatpush.msk.msra.mxu1 %vm1794_vm6, %v8773_v13  ;;  %4305 = vmatpush.msk.msra.mxu2 %vm1810_vm7, %v8773_v13  ;;  %vm1790_vm6 = vcmp.eq.s32.totalorder %v5059_v30, %v6633_v53  ;;  %vm1806_vm7 = vcmp.eq.s32.totalorder %v5062_v31, %v6633_v53 }
 0x1de   :  { %4258 = vmatpush.msk.msrb.mxu3 %vm1651_vm8, %v8773_v13  ;;  %4274 = vmatpush.msk.msra.mxu0 %vm1667_vm9, %v8773_v13  ;;  %vm1647_vm8 = vcmp.eq.s32.totalorder %v5091_v34, %v6406_v36  ;;  %vm1663_vm9 = vcmp.eq.s32.totalorder %v5102_v35, %v6406_v36 }
 0x1df   :  { %4290 = vmatpush.msk.msra.mxu1 %vm1793_vm10, %v8773_v13  ;;  %4306 = vmatpush.msk.msra.mxu2 %vm1809_vm11, %v8773_v13  ;;  %vm1789_vm10 = vcmp.eq.s32.totalorder %v5076_v33, %v6633_v53  ;;  %vm1805_vm11 = vcmp.eq.s32.totalorder %v5091_v34, %v6633_v53 }
 0x1e0   :  { %4259 = vmatpush.msk.msrb.mxu3 %vm1650_vm12, %v8773_v13  ;;  %4275 = vmatpush.msk.msra.mxu0 %vm1666_vm13, %v8773_v13  ;;  %vm1646_vm12 = vcmp.eq.s32.totalorder %v5120_v38, %v6406_v36  ;;  %vm1662_vm13 = vcmp.eq.s32.totalorder %v5123_v39, %v6406_v36 }
 0x1e1   :  { %4291 = vmatpush.msk.msra.mxu1 %vm1792_vm14, %v8773_v13  ;;  %4307 = vmatpush.msk.msra.mxu2 %vm1808_vm15, %v8773_v13  ;;  %vm1788_vm14 = vcmp.eq.s32.totalorder %v5117_v37, %v6633_v53  ;;  %vm1804_vm15 = vcmp.eq.s32.totalorder %v5120_v38, %v6633_v53 }
 0x1e2   :  { %4260 = vmatpush.msk.msrb.mxu3 %vm1649_vm0, %v8773_v13  ;;  %4276 = vmatpush.msk.msra.mxu0 %vm1665_vm1, %v8773_v13  ;;  %vm1645_vm0 = vcmp.eq.s32.totalorder %v5143_v42, %v6406_v36  ;;  %vm1661_vm1 = vcmp.eq.s32.totalorder %v5158_v43, %v6406_v36 }
 0x1e3   :  { %4292 = vmatpush.msk.msra.mxu1 %vm1791_vm2, %v8773_v13  ;;  %4308 = vmatpush.msk.msra.mxu2 %vm1807_vm3, %v8773_v13  ;;  %vm1787_vm2 = vcmp.eq.s32.totalorder %v5140_v41, %v6633_v53  ;;  %vm1803_vm3 = vcmp.eq.s32.totalorder %v5143_v42, %v6633_v53 }
 0x1e4   :  { %4261 = vmatpush.msk.msrb.mxu3 %vm1648_vm4, %v8773_v13  ;;  %4277 = vmatpush.msk.msra.mxu0 %vm1664_vm5, %v8773_v13  ;;  %vm1644_vm4 = vcmp.eq.s32.totalorder %v5184_v46, %v6406_v36  ;;  %vm1660_vm5 = vcmp.eq.s32.totalorder %v5193_v47, %v6406_v36 }
 0x1e5   :  { %4293 = vmatpush.msk.msra.mxu1 %vm1790_vm6, %v8773_v13  ;;  %4309 = vmatpush.msk.msra.mxu2 %vm1806_vm7, %v8773_v13  ;;  %vm1786_vm6 = vcmp.eq.s32.totalorder %v5173_v44, %v6633_v53  ;;  %vm1802_vm7 = vcmp.eq.s32.totalorder %v5184_v46, %v6633_v53 }
 0x1e6   :  { %4262 = vmatpush.msk.msrb.mxu3 %vm1647_vm8, %v8773_v13  ;;  %4278 = vmatpush.msk.msra.mxu0 %vm1663_vm9, %v8773_v13  ;;  %vm1643_vm8 = vcmp.eq.s32.totalorder %v5232_v59, %v6406_v36  ;;  %vm1659_vm9 = vcmp.eq.s32.totalorder %v5235_v60, %v6406_v36 }
 0x1e7   :  { %4294 = vmatpush.msk.msra.mxu1 %vm1789_vm10, %v8773_v13  ;;  %4310 = vmatpush.msk.msra.mxu2 %vm1805_vm11, %v8773_v13  ;;  %vm1785_vm10 = vcmp.eq.s32.totalorder %v5229_v58, %v6633_v53  ;;  %vm1801_vm11 = vcmp.eq.s32.totalorder %v5232_v59, %v6633_v53 }
 0x1e8   :  { %4263 = vmatpush.msk.msrb.mxu3 %vm1646_vm12, %v8773_v13  ;;  %4279 = vmatpush.msk.msra.mxu0 %vm1662_vm13, %v8773_v13  ;;  %vm1642_vm12 = vcmp.eq.s32.totalorder %v5251_v62, %v6406_v36  ;;  %vm1658_vm13 = vcmp.eq.s32.totalorder %v5254_v63, %v6406_v36 }
 0x1e9   :  { %4295 = vmatpush.msk.msra.mxu1 %vm1788_vm14, %v8773_v13  ;;  %4311 = vmatpush.msk.msra.mxu2 %vm1804_vm15, %v8773_v13  ;;  %vm1784_vm14 = vcmp.eq.s32.totalorder %v5248_v61, %v6633_v53  ;;  %vm1800_vm15 = vcmp.eq.s32.totalorder %v5251_v62, %v6633_v53 }
 0x1ea   :  { %4264 = vmatpush.msk.msrb.mxu3 %vm1645_vm0, %v8773_v13  ;;  %4280 = vmatpush.msk.msra.mxu0 %vm1661_vm1, %v8773_v13  ;;  %vm1641_vm0 = vcmp.eq.s32.totalorder %v5262_v1, %v6406_v36  ;;  %vm1657_vm1 = vcmp.eq.s32.totalorder %v5265_v2, %v6406_v36 }
 0x1eb   :  { %4296 = vmatpush.msk.msra.mxu1 %vm1787_vm2, %v8773_v13  ;;  %4312 = vmatpush.msk.msra.mxu2 %vm1803_vm3, %v8773_v13  ;;  %vm1783_vm2 = vcmp.eq.s32.totalorder %v5257_v0, %v6633_v53  ;;  %vm1799_vm3 = vcmp.eq.s32.totalorder %v5262_v1, %v6633_v53 }
 0x1ec   :  { %4265 = vmatpush.msk.msrb.mxu3 %vm1644_vm4, %v8773_v13  ;;  %4281 = vmatpush.msk.msra.mxu0 %vm1660_vm5, %v8773_v13  ;;  %vm1640_vm4 = vcmp.eq.s32.totalorder %v5271_v4, %v6406_v36  ;;  %vm1656_vm5 = vcmp.eq.s32.totalorder %v5290_v5, %v6406_v36 }
 0x1ed   :  { %4297 = vmatpush.msk.msra.mxu1 %vm1786_vm6, %v8773_v13  ;;  %4313 = vmatpush.msk.msra.mxu2 %vm1802_vm7, %v8773_v13  ;;  %vm1782_vm6 = vcmp.eq.s32.totalorder %v5268_v3, %v6633_v53  ;;  %vm1798_vm7 = vcmp.eq.s32.totalorder %v5271_v4, %v6633_v53 }
 0x1ee   :  { %4266 = vmatpush.msk.msrb.mxu3 %vm1643_vm8, %v8773_v13  ;;  %4282 = vmatpush.msk.msra.mxu0 %vm1659_vm9, %v8773_v13  ;;  %vm1639_vm8 = vcmp.eq.s32.totalorder %v8775_v7, %v6406_v36  ;;  %vm1655_vm9 = vcmp.eq.s32.totalorder %v5315_v8, %v6406_v36 }
 0x1ef   :  { %4298 = vmatpush.msk.msra.mxu1 %vm1785_vm10, %v8773_v13  ;;  %4314 = vmatpush.msk.msra.mxu2 %vm1801_vm11, %v8773_v13  ;;  %vm1781_vm10 = vcmp.eq.s32.totalorder %v8774_v6, %v6633_v53  ;;  %vm1797_vm11 = vcmp.eq.s32.totalorder %v8775_v7, %v6633_v53 }
 0x1f0   :  { %4267 = vmatpush.msk.msrb.mxu3 %vm1642_vm12, %v8773_v13  ;;  %4283 = vmatpush.msk.msra.mxu0 %vm1658_vm13, %v8773_v13  ;;  %vm1638_vm12 = vcmp.eq.s32.totalorder %v8778_v11, %v6406_v36  ;;  %vm1654_vm13 = vcmp.eq.s32.totalorder %v8776_v9, %v6406_v36 }
 0x1f1   :  { %4299 = vmatpush.msk.msra.mxu1 %vm1784_vm14, %v8773_v13  ;;  %4315 = vmatpush.msk.msra.mxu2 %vm1800_vm15, %v8773_v13  ;;  %vm1780_vm14 = vcmp.eq.s32.totalorder %v8777_v10, %v6633_v53  ;;  %vm1796_vm15 = vcmp.eq.s32.totalorder %v8778_v11, %v6633_v53  ;;  %v964_v45 = vpop.f32.mrf.mxu0 }
 0x1f2   :  { %4268 = vmatpush.msk.msrb.mxu3 %vm1641_vm0, %v8773_v13  ;;  %4284 = vmatpush.msk.msra.mxu0 %vm1657_vm1, %v8773_v13  ;;  %vm1637_vm0 = vcmp.eq.s32.totalorder %v8781_v14, %v6406_v36  ;;  %vm1653_vm1 = vcmp.eq.s32.totalorder %v8779_v12, %v6406_v36  ;;  %v984_v36 = vpop.f32.mrf.mxu1 }
 0x1f3   :  { %4300 = vmatpush.msk.msra.mxu1 %vm1783_vm2, %v8773_v13  ;;  %4316 = vmatpush.msk.msra.mxu2 %vm1799_vm3, %v8773_v13  ;;  %vm1779_vm2 = vcmp.eq.s32.totalorder %v8780_v29, %v6633_v53  ;;  %vm1795_vm3 = vcmp.eq.s32.totalorder %v8781_v14, %v6633_v53 }
 0x1f4   :  { %4269 = vmatpush.msk.msrb.mxu3 %vm1640_vm4, %v8773_v13  ;;  %4285 = vmatpush.msk.msra.mxu0 %vm1656_vm5, %v8773_v13  ;;  %vm1826_vm4 = vcmp.eq.s32.totalorder %v4998_v18, %v6633_v53  ;;  %vm1952_vm5 = vcmp.eq.s32.totalorder %v4992_v16, %v6835_v56 }
 0x1f5   :  { %4301 = vmatpush.msk.msra.mxu1 %vm1782_vm6, %v8773_v13  ;;  %4317 = vmatpush.msk.msra.mxu2 %vm1798_vm7, %v8773_v13  ;;  %vm1968_vm6 = vcmp.eq.s32.totalorder %v4995_v17, %v6835_v56  ;;  %vm1984_vm7 = vcmp.eq.s32.totalorder %v4998_v18, %v6835_v56 }
 0x1f6   :  { %4270 = vmatpush.msk.msrb.mxu3 %vm1639_vm8, %v8773_v13  ;;  %4286 = vmatpush.msk.msra.mxu0 %vm1655_vm9, %v8773_v13  ;;  %vm1825_vm8 = vcmp.eq.s32.totalorder %v5007_v21, %v6633_v53  ;;  %vm1951_vm9 = vcmp.eq.s32.totalorder %v5001_v19, %v6835_v56 }
 0x1f7   :  { %4302 = vmatpush.msk.msra.mxu1 %vm1781_vm10, %v8773_v13  ;;  %4318 = vmatpush.msk.msra.mxu2 %vm1797_vm11, %v8773_v13  ;;  %v944_v52 = vpop.f32.mrf.mxu3  ;;  %vm1967_vm10 = vcmp.eq.s32.totalorder %v5004_v20, %v6835_v56  ;;  %vm1983_vm11 = vcmp.eq.s32.totalorder %v5007_v21, %v6835_v56 }
 0x1f8   :  { %4271 = vmatpush.msk.msrb.mxu3 %vm1638_vm12, %v8773_v13  ;;  %4287 = vmatpush.msk.msra.mxu0 %vm1654_vm13, %v8773_v13  ;;  %v965_v55 = vadd.f32 %v964_v45, %v944_v52  ;;  %vm1824_vm12 = vcmp.eq.s32.totalorder %v5032_v25, %v6633_v53  ;;  %vm1950_vm13 = vcmp.eq.s32.totalorder %v5010_v22, %v6835_v56  ;;  %v1102_v45 = vpop.f32.mrf.mxu2  ;;  %v7038_v52 = vld [vmem:[%s8731_s4 + $0xc] ss:$0 sm:$0xff] }
 0x1f9   :  { %4303 = vmatpush.msk.msra.mxu1 %vm1780_vm14, %v8773_v13  ;;  %4319 = vmatpush.msk.msra.mxu2 %vm1796_vm15, %v8773_v13  ;;  %vm1966_vm14 = vcmp.eq.s32.totalorder %v5013_v23, %v6835_v56  ;;  %vm1982_vm15 = vcmp.eq.s32.totalorder %v5032_v25, %v6835_v56 }
 0x1fa   :  { %4272 = vmatpush.msk.msrb.mxu3 %vm1637_vm0, %v8773_v13  ;;  %4288 = vmatpush.msk.msra.mxu0 %vm1653_vm1, %v8773_v13  ;;  %v6847_v49 = vadd.f32 %v984_v36, %v965_v55  ;;  %vm1823_vm0 = vcmp.eq.s32.totalorder %v5051_v28, %v6633_v53  ;;  %vm1949_vm1 = vcmp.eq.s32.totalorder %v5039_v26, %v6835_v56  ;;  %v7049_v36 = vld [vmem:[%s8731_s4 + $0xd] ss:$0 sm:$0xff] }
 0x1fb   :  { %4304 = vmatpush.msk.msra.mxu1 %vm1779_vm2, %v8773_v13  ;;  %4320 = vmatpush.msk.msra.mxu2 %vm1795_vm3, %v8773_v13  ;;  %vm1965_vm2 = vcmp.eq.s32.totalorder %v5048_v27, %v6835_v56  ;;  %vm1981_vm3 = vcmp.eq.s32.totalorder %v5051_v28, %v6835_v56 }
 0x1fc   :  { %1753 = vmatmul.f32.vlgmr.msrb.gmra.mxu3 %v5586_v48  ;;  %1773 = vmatmul.f32.vlgmr.msra.gmra.mxu0 %v5588_v24 }
 0x1fd   :  { %1891 = vmatmul.f32.vlgmr.msra.gmra.mxu1 %v5584_v50  ;;  %1911 = vmatmul.f32.vlgmr.msra.gmra.mxu2 %v5586_v48 }
 0x1fe   :  { %4321 = vmatpush.msk.msra.mxu3 %vm1826_vm4, %v8773_v13  ;;  %4337 = vmatpush.msk.msrb.mxu0 %vm1952_vm5, %v8773_v13  ;;  %vm1822_vm4 = vcmp.eq.s32.totalorder %v5073_v32, %v6633_v53  ;;  %vm1948_vm5 = vcmp.eq.s32.totalorder %v5059_v30, %v6835_v56 }
 0x1ff   :  { %4353 = vmatpush.msk.msrb.mxu1 %vm1968_vm6, %v8773_v13  ;;  %4369 = vmatpush.msk.msrb.mxu2 %vm1984_vm7, %v8773_v13  ;;  %vm1964_vm6 = vcmp.eq.s32.totalorder %v5062_v31, %v6835_v56  ;;  %vm1980_vm7 = vcmp.eq.s32.totalorder %v5073_v32, %v6835_v56 }
 0x200   :  { %4322 = vmatpush.msk.msra.mxu3 %vm1825_vm8, %v8773_v13  ;;  %4338 = vmatpush.msk.msrb.mxu0 %vm1951_vm9, %v8773_v13  ;;  %vm1821_vm8 = vcmp.eq.s32.totalorder %v5102_v35, %v6633_v53  ;;  %vm1947_vm9 = vcmp.eq.s32.totalorder %v5076_v33, %v6835_v56 }
 0x201   :  { %4354 = vmatpush.msk.msrb.mxu1 %vm1967_vm10, %v8773_v13  ;;  %4370 = vmatpush.msk.msrb.mxu2 %vm1983_vm11, %v8773_v13  ;;  %vm1963_vm10 = vcmp.eq.s32.totalorder %v5091_v34, %v6835_v56  ;;  %vm1979_vm11 = vcmp.eq.s32.totalorder %v5102_v35, %v6835_v56 }
 0x202   :  { %4323 = vmatpush.msk.msra.mxu3 %vm1824_vm12, %v8773_v13  ;;  %4339 = vmatpush.msk.msrb.mxu0 %vm1950_vm13, %v8773_v13  ;;  %vm1820_vm12 = vcmp.eq.s32.totalorder %v5123_v39, %v6633_v53  ;;  %vm1946_vm13 = vcmp.eq.s32.totalorder %v5117_v37, %v6835_v56 }
 0x203   :  { %4355 = vmatpush.msk.msrb.mxu1 %vm1966_vm14, %v8773_v13  ;;  %4371 = vmatpush.msk.msrb.mxu2 %vm1982_vm15, %v8773_v13  ;;  %vm1962_vm14 = vcmp.eq.s32.totalorder %v5120_v38, %v6835_v56  ;;  %vm1978_vm15 = vcmp.eq.s32.totalorder %v5123_v39, %v6835_v56 }
 0x204   :  { %4324 = vmatpush.msk.msra.mxu3 %vm1823_vm0, %v8773_v13  ;;  %4340 = vmatpush.msk.msrb.mxu0 %vm1949_vm1, %v8773_v13  ;;  %vm1819_vm0 = vcmp.eq.s32.totalorder %v5158_v43, %v6633_v53  ;;  %vm1945_vm1 = vcmp.eq.s32.totalorder %v5140_v41, %v6835_v56 }
 0x205   :  { %4356 = vmatpush.msk.msrb.mxu1 %vm1965_vm2, %v8773_v13  ;;  %4372 = vmatpush.msk.msrb.mxu2 %vm1981_vm3, %v8773_v13  ;;  %vm1961_vm2 = vcmp.eq.s32.totalorder %v5143_v42, %v6835_v56  ;;  %vm1977_vm3 = vcmp.eq.s32.totalorder %v5158_v43, %v6835_v56 }
 0x206   :  { %4325 = vmatpush.msk.msra.mxu3 %vm1822_vm4, %v8773_v13  ;;  %4341 = vmatpush.msk.msrb.mxu0 %vm1948_vm5, %v8773_v13  ;;  %vm1818_vm4 = vcmp.eq.s32.totalorder %v5193_v47, %v6633_v53  ;;  %vm1944_vm5 = vcmp.eq.s32.totalorder %v5173_v44, %v6835_v56 }
 0x207   :  { %4357 = vmatpush.msk.msrb.mxu1 %vm1964_vm6, %v8773_v13  ;;  %4373 = vmatpush.msk.msrb.mxu2 %vm1980_vm7, %v8773_v13  ;;  %vm1960_vm6 = vcmp.eq.s32.totalorder %v5184_v46, %v6835_v56  ;;  %vm1976_vm7 = vcmp.eq.s32.totalorder %v5193_v47, %v6835_v56 }
 0x208   :  { %4326 = vmatpush.msk.msra.mxu3 %vm1821_vm8, %v8773_v13  ;;  %4342 = vmatpush.msk.msrb.mxu0 %vm1947_vm9, %v8773_v13  ;;  %vm1817_vm8 = vcmp.eq.s32.totalorder %v5235_v60, %v6633_v53  ;;  %vm1943_vm9 = vcmp.eq.s32.totalorder %v5229_v58, %v6835_v56 }
 0x209   :  { %4358 = vmatpush.msk.msrb.mxu1 %vm1963_vm10, %v8773_v13  ;;  %4374 = vmatpush.msk.msrb.mxu2 %vm1979_vm11, %v8773_v13  ;;  %vm1959_vm10 = vcmp.eq.s32.totalorder %v5232_v59, %v6835_v56  ;;  %vm1975_vm11 = vcmp.eq.s32.totalorder %v5235_v60, %v6835_v56 }
 0x20a   :  { %4327 = vmatpush.msk.msra.mxu3 %vm1820_vm12, %v8773_v13  ;;  %4343 = vmatpush.msk.msrb.mxu0 %vm1946_vm13, %v8773_v13  ;;  %vm1816_vm12 = vcmp.eq.s32.totalorder %v5254_v63, %v6633_v53  ;;  %vm1942_vm13 = vcmp.eq.s32.totalorder %v5248_v61, %v6835_v56 }
 0x20b   :  { %4359 = vmatpush.msk.msrb.mxu1 %vm1962_vm14, %v8773_v13  ;;  %4375 = vmatpush.msk.msrb.mxu2 %vm1978_vm15, %v8773_v13  ;;  %vm1958_vm14 = vcmp.eq.s32.totalorder %v5251_v62, %v6835_v56  ;;  %vm1974_vm15 = vcmp.eq.s32.totalorder %v5254_v63, %v6835_v56 }
 0x20c   :  { %4328 = vmatpush.msk.msra.mxu3 %vm1819_vm0, %v8773_v13  ;;  %4344 = vmatpush.msk.msrb.mxu0 %vm1945_vm1, %v8773_v13  ;;  %vm1815_vm0 = vcmp.eq.s32.totalorder %v5265_v2, %v6633_v53  ;;  %vm1941_vm1 = vcmp.eq.s32.totalorder %v5257_v0, %v6835_v56 }
 0x20d   :  { %4360 = vmatpush.msk.msrb.mxu1 %vm1961_vm2, %v8773_v13  ;;  %4376 = vmatpush.msk.msrb.mxu2 %vm1977_vm3, %v8773_v13  ;;  %vm1957_vm2 = vcmp.eq.s32.totalorder %v5262_v1, %v6835_v56  ;;  %vm1973_vm3 = vcmp.eq.s32.totalorder %v5265_v2, %v6835_v56 }
 0x20e   :  { %4329 = vmatpush.msk.msra.mxu3 %vm1818_vm4, %v8773_v13  ;;  %4345 = vmatpush.msk.msrb.mxu0 %vm1944_vm5, %v8773_v13  ;;  %vm1814_vm4 = vcmp.eq.s32.totalorder %v5290_v5, %v6633_v53  ;;  %vm1940_vm5 = vcmp.eq.s32.totalorder %v5268_v3, %v6835_v56 }
 0x20f   :  { %4361 = vmatpush.msk.msrb.mxu1 %vm1960_vm6, %v8773_v13  ;;  %4377 = vmatpush.msk.msrb.mxu2 %vm1976_vm7, %v8773_v13  ;;  %vm1956_vm6 = vcmp.eq.s32.totalorder %v5271_v4, %v6835_v56  ;;  %vm1972_vm7 = vcmp.eq.s32.totalorder %v5290_v5, %v6835_v56 }
 0x210   :  { %4330 = vmatpush.msk.msra.mxu3 %vm1817_vm8, %v8773_v13  ;;  %4346 = vmatpush.msk.msrb.mxu0 %vm1943_vm9, %v8773_v13  ;;  %vm1813_vm8 = vcmp.eq.s32.totalorder %v5315_v8, %v6633_v53  ;;  %vm1939_vm9 = vcmp.eq.s32.totalorder %v8774_v6, %v6835_v56 }
 0x211   :  { %4362 = vmatpush.msk.msrb.mxu1 %vm1959_vm10, %v8773_v13  ;;  %4378 = vmatpush.msk.msrb.mxu2 %vm1975_vm11, %v8773_v13  ;;  %vm1955_vm10 = vcmp.eq.s32.totalorder %v8775_v7, %v6835_v56  ;;  %vm1971_vm11 = vcmp.eq.s32.totalorder %v5315_v8, %v6835_v56 }
 0x212   :  { %4331 = vmatpush.msk.msra.mxu3 %vm1816_vm12, %v8773_v13  ;;  %4347 = vmatpush.msk.msrb.mxu0 %vm1942_vm13, %v8773_v13  ;;  %vm1812_vm12 = vcmp.eq.s32.totalorder %v8776_v9, %v6633_v53  ;;  %vm1938_vm13 = vcmp.eq.s32.totalorder %v8777_v10, %v6835_v56 }
 0x213   :  { %4363 = vmatpush.msk.msrb.mxu1 %vm1958_vm14, %v8773_v13  ;;  %4379 = vmatpush.msk.msrb.mxu2 %vm1974_vm15, %v8773_v13  ;;  %vm1954_vm14 = vcmp.eq.s32.totalorder %v8778_v11, %v6835_v56  ;;  %vm1970_vm15 = vcmp.eq.s32.totalorder %v8776_v9, %v6835_v56  ;;  %v1142_v54 = vpop.f32.mrf.mxu0 }
 0x214   :  { %4332 = vmatpush.msk.msra.mxu3 %vm1815_vm0, %v8773_v13  ;;  %4348 = vmatpush.msk.msrb.mxu0 %vm1941_vm1, %v8773_v13  ;;  %vm1811_vm0 = vcmp.eq.s32.totalorder %v8779_v12, %v6633_v53  ;;  %vm1937_vm1 = vcmp.eq.s32.totalorder %v8780_v29, %v6835_v56  ;;  %v1260_v51 = vpop.f32.mrf.mxu1 }
 0x215   :  { %4364 = vmatpush.msk.msrb.mxu1 %vm1957_vm2, %v8773_v13  ;;  %4380 = vmatpush.msk.msrb.mxu2 %vm1973_vm3, %v8773_v13  ;;  %vm1953_vm2 = vcmp.eq.s32.totalorder %v8781_v14, %v6835_v56  ;;  %vm1969_vm3 = vcmp.eq.s32.totalorder %v8779_v12, %v6835_v56  ;;  %v7268_v56 = vld [vmem:[%s8731_s4 + $0xe] ss:$0 sm:$0xff] }
 0x216   :  { %4333 = vmatpush.msk.msra.mxu3 %vm1814_vm4, %v8773_v13  ;;  %4349 = vmatpush.msk.msrb.mxu0 %vm1940_vm5, %v8773_v13  ;;  %vm2110_vm4 = vcmp.eq.s32.totalorder %v4992_v16, %v7038_v52  ;;  %vm2126_vm5 = vcmp.eq.s32.totalorder %v4995_v17, %v7038_v52 }
 0x217   :  { %4365 = vmatpush.msk.msrb.mxu1 %vm1956_vm6, %v8773_v13  ;;  %4381 = vmatpush.msk.msrb.mxu2 %vm1972_vm7, %v8773_v13  ;;  %vm2142_vm6 = vcmp.eq.s32.totalorder %v4998_v18, %v7038_v52  ;;  %vm2268_vm7 = vcmp.eq.s32.totalorder %v4992_v16, %v7049_v36 }
 0x218   :  { %4334 = vmatpush.msk.msra.mxu3 %vm1813_vm8, %v8773_v13  ;;  %4350 = vmatpush.msk.msrb.mxu0 %vm1939_vm9, %v8773_v13  ;;  %vm2109_vm8 = vcmp.eq.s32.totalorder %v5001_v19, %v7038_v52  ;;  %vm2125_vm9 = vcmp.eq.s32.totalorder %v5004_v20, %v7038_v52 }
 0x219   :  { %4366 = vmatpush.msk.msrb.mxu1 %vm1955_vm10, %v8773_v13  ;;  %4382 = vmatpush.msk.msrb.mxu2 %vm1971_vm11, %v8773_v13  ;;  %v1122_v55 = vpop.f32.mrf.mxu3  ;;  %vm2141_vm10 = vcmp.eq.s32.totalorder %v5007_v21, %v7038_v52  ;;  %vm2267_vm11 = vcmp.eq.s32.totalorder %v5001_v19, %v7049_v36 }
 0x21a   :  { %4335 = vmatpush.msk.msra.mxu3 %vm1812_vm12, %v8773_v13  ;;  %4351 = vmatpush.msk.msrb.mxu0 %vm1938_vm13, %v8773_v13  ;;  %v1123_v40 = vadd.f32 %v1122_v55, %v1102_v45  ;;  %v1280_v57 = vpop.f32.mrf.mxu2  ;;  %vm2108_vm12 = vcmp.eq.s32.totalorder %v5010_v22, %v7038_v52  ;;  %vm2124_vm13 = vcmp.eq.s32.totalorder %v5013_v23, %v7038_v52 }
 0x21b   :  { %4367 = vmatpush.msk.msrb.mxu1 %vm1954_vm14, %v8773_v13  ;;  %4383 = vmatpush.msk.msrb.mxu2 %vm1970_vm15, %v8773_v13  ;;  %v7059_v15 = vadd.f32 %v1280_v57, %v1260_v51  ;;  %vm2140_vm14 = vcmp.eq.s32.totalorder %v5032_v25, %v7038_v52  ;;  %vm2266_vm15 = vcmp.eq.s32.totalorder %v5010_v22, %v7049_v36 }
 0x21c   :  { %4336 = vmatpush.msk.msra.mxu3 %vm1811_vm0, %v8773_v13  ;;  %4352 = vmatpush.msk.msrb.mxu0 %vm1937_vm1, %v8773_v13  ;;  %v7069_v45 = vadd.f32 %v1142_v54, %v1123_v40  ;;  %vm2107_vm0 = vcmp.eq.s32.totalorder %v5039_v26, %v7038_v52  ;;  %vm2123_vm1 = vcmp.eq.s32.totalorder %v5048_v27, %v7038_v52 }
 0x21d   :  { %4368 = vmatpush.msk.msrb.mxu1 %vm1953_vm2, %v8773_v13  ;;  %4384 = vmatpush.msk.msrb.mxu2 %vm1969_vm3, %v8773_v13  ;;  %vm2139_vm2 = vcmp.eq.s32.totalorder %v5051_v28, %v7038_v52  ;;  %vm2265_vm3 = vcmp.eq.s32.totalorder %v5039_v26, %v7049_v36 }
 0x21e   :  { %1931 = vmatmul.f32.vlgmr.msra.gmra.mxu3 %v5588_v24  ;;  %2049 = vmatmul.f32.vlgmr.msrb.gmra.mxu0 %v5584_v50  ;;  %v2727_v40 = vpack.c.bf16 %v7069_v45, %v6847_v49 }
 0x21f   :  { %2069 = vmatmul.f32.vlgmr.msrb.gmra.mxu1 %v5586_v48  ;;  %2089 = vmatmul.f32.vlgmr.msrb.gmra.mxu2 %v5588_v24 }
 0x220   :  { %4385 = vmatpush.msk.msrb.mxu3 %vm2110_vm4, %v8773_v13  ;;  %4401 = vmatpush.msk.msra.mxu0 %vm2126_vm5, %v8773_v13  ;;  %vm2106_vm4 = vcmp.eq.s32.totalorder %v5059_v30, %v7038_v52  ;;  %vm2122_vm5 = vcmp.eq.s32.totalorder %v5062_v31, %v7038_v52 }
 0x221   :  { %4417 = vmatpush.msk.msra.mxu1 %vm2142_vm6, %v8773_v13  ;;  %4433 = vmatpush.msk.msra.mxu2 %vm2268_vm7, %v8773_v13  ;;  %vm2138_vm6 = vcmp.eq.s32.totalorder %v5073_v32, %v7038_v52  ;;  %vm2264_vm7 = vcmp.eq.s32.totalorder %v5059_v30, %v7049_v36 }
 0x222   :  { %4386 = vmatpush.msk.msrb.mxu3 %vm2109_vm8, %v8773_v13  ;;  %4402 = vmatpush.msk.msra.mxu0 %vm2125_vm9, %v8773_v13  ;;  %vm2105_vm8 = vcmp.eq.s32.totalorder %v5076_v33, %v7038_v52  ;;  %vm2121_vm9 = vcmp.eq.s32.totalorder %v5091_v34, %v7038_v52 }
 0x223   :  { %4418 = vmatpush.msk.msra.mxu1 %vm2141_vm10, %v8773_v13  ;;  %4434 = vmatpush.msk.msra.mxu2 %vm2267_vm11, %v8773_v13  ;;  %vm2137_vm10 = vcmp.eq.s32.totalorder %v5102_v35, %v7038_v52  ;;  %vm2263_vm11 = vcmp.eq.s32.totalorder %v5076_v33, %v7049_v36 }
 0x224   :  { %4387 = vmatpush.msk.msrb.mxu3 %vm2108_vm12, %v8773_v13  ;;  %4403 = vmatpush.msk.msra.mxu0 %vm2124_vm13, %v8773_v13  ;;  %vm2104_vm12 = vcmp.eq.s32.totalorder %v5117_v37, %v7038_v52  ;;  %vm2120_vm13 = vcmp.eq.s32.totalorder %v5120_v38, %v7038_v52 }
 0x225   :  { %4419 = vmatpush.msk.msra.mxu1 %vm2140_vm14, %v8773_v13  ;;  %4435 = vmatpush.msk.msra.mxu2 %vm2266_vm15, %v8773_v13  ;;  %vm2136_vm14 = vcmp.eq.s32.totalorder %v5123_v39, %v7038_v52  ;;  %vm2262_vm15 = vcmp.eq.s32.totalorder %v5117_v37, %v7049_v36 }
 0x226   :  { %4388 = vmatpush.msk.msrb.mxu3 %vm2107_vm0, %v8773_v13  ;;  %4404 = vmatpush.msk.msra.mxu0 %vm2123_vm1, %v8773_v13  ;;  %vm2103_vm0 = vcmp.eq.s32.totalorder %v5140_v41, %v7038_v52  ;;  %vm2119_vm1 = vcmp.eq.s32.totalorder %v5143_v42, %v7038_v52 }
 0x227   :  { %4420 = vmatpush.msk.msra.mxu1 %vm2139_vm2, %v8773_v13  ;;  %4436 = vmatpush.msk.msra.mxu2 %vm2265_vm3, %v8773_v13  ;;  %vm2135_vm2 = vcmp.eq.s32.totalorder %v5158_v43, %v7038_v52  ;;  %vm2261_vm3 = vcmp.eq.s32.totalorder %v5140_v41, %v7049_v36 }
 0x228   :  { %4389 = vmatpush.msk.msrb.mxu3 %vm2106_vm4, %v8773_v13  ;;  %4405 = vmatpush.msk.msra.mxu0 %vm2122_vm5, %v8773_v13  ;;  %vm2102_vm4 = vcmp.eq.s32.totalorder %v5173_v44, %v7038_v52  ;;  %vm2118_vm5 = vcmp.eq.s32.totalorder %v5184_v46, %v7038_v52 }
 0x229   :  { %4421 = vmatpush.msk.msra.mxu1 %vm2138_vm6, %v8773_v13  ;;  %4437 = vmatpush.msk.msra.mxu2 %vm2264_vm7, %v8773_v13  ;;  %vm2134_vm6 = vcmp.eq.s32.totalorder %v5193_v47, %v7038_v52  ;;  %vm2260_vm7 = vcmp.eq.s32.totalorder %v5173_v44, %v7049_v36 }
 0x22a   :  { %4390 = vmatpush.msk.msrb.mxu3 %vm2105_vm8, %v8773_v13  ;;  %4406 = vmatpush.msk.msra.mxu0 %vm2121_vm9, %v8773_v13  ;;  %vm2101_vm8 = vcmp.eq.s32.totalorder %v5229_v58, %v7038_v52  ;;  %vm2117_vm9 = vcmp.eq.s32.totalorder %v5232_v59, %v7038_v52 }
 0x22b   :  { %4422 = vmatpush.msk.msra.mxu1 %vm2137_vm10, %v8773_v13  ;;  %4438 = vmatpush.msk.msra.mxu2 %vm2263_vm11, %v8773_v13  ;;  %vm2133_vm10 = vcmp.eq.s32.totalorder %v5235_v60, %v7038_v52  ;;  %vm2259_vm11 = vcmp.eq.s32.totalorder %v5229_v58, %v7049_v36 }
 0x22c   :  { %4391 = vmatpush.msk.msrb.mxu3 %vm2104_vm12, %v8773_v13  ;;  %4407 = vmatpush.msk.msra.mxu0 %vm2120_vm13, %v8773_v13  ;;  %vm2100_vm12 = vcmp.eq.s32.totalorder %v5248_v61, %v7038_v52  ;;  %vm2116_vm13 = vcmp.eq.s32.totalorder %v5251_v62, %v7038_v52 }
 0x22d   :  { %4423 = vmatpush.msk.msra.mxu1 %vm2136_vm14, %v8773_v13  ;;  %4439 = vmatpush.msk.msra.mxu2 %vm2262_vm15, %v8773_v13  ;;  %vm2132_vm14 = vcmp.eq.s32.totalorder %v5254_v63, %v7038_v52  ;;  %vm2258_vm15 = vcmp.eq.s32.totalorder %v5248_v61, %v7049_v36 }
 0x22e   :  { %4392 = vmatpush.msk.msrb.mxu3 %vm2103_vm0, %v8773_v13  ;;  %4408 = vmatpush.msk.msra.mxu0 %vm2119_vm1, %v8773_v13  ;;  %vm2099_vm0 = vcmp.eq.s32.totalorder %v5257_v0, %v7038_v52  ;;  %vm2115_vm1 = vcmp.eq.s32.totalorder %v5262_v1, %v7038_v52 }
 0x22f   :  { %4424 = vmatpush.msk.msra.mxu1 %vm2135_vm2, %v8773_v13  ;;  %4440 = vmatpush.msk.msra.mxu2 %vm2261_vm3, %v8773_v13  ;;  %vm2131_vm2 = vcmp.eq.s32.totalorder %v5265_v2, %v7038_v52  ;;  %vm2257_vm3 = vcmp.eq.s32.totalorder %v5257_v0, %v7049_v36 }
 0x230   :  { %4393 = vmatpush.msk.msrb.mxu3 %vm2102_vm4, %v8773_v13  ;;  %4409 = vmatpush.msk.msra.mxu0 %vm2118_vm5, %v8773_v13  ;;  %vm2098_vm4 = vcmp.eq.s32.totalorder %v5268_v3, %v7038_v52  ;;  %vm2114_vm5 = vcmp.eq.s32.totalorder %v5271_v4, %v7038_v52 }
 0x231   :  { %4425 = vmatpush.msk.msra.mxu1 %vm2134_vm6, %v8773_v13  ;;  %4441 = vmatpush.msk.msra.mxu2 %vm2260_vm7, %v8773_v13  ;;  %vm2130_vm6 = vcmp.eq.s32.totalorder %v5290_v5, %v7038_v52  ;;  %vm2256_vm7 = vcmp.eq.s32.totalorder %v5268_v3, %v7049_v36 }
 0x232   :  { %4394 = vmatpush.msk.msrb.mxu3 %vm2101_vm8, %v8773_v13  ;;  %4410 = vmatpush.msk.msra.mxu0 %vm2117_vm9, %v8773_v13  ;;  %vm2097_vm8 = vcmp.eq.s32.totalorder %v8774_v6, %v7038_v52  ;;  %vm2113_vm9 = vcmp.eq.s32.totalorder %v8775_v7, %v7038_v52 }
 0x233   :  { %4426 = vmatpush.msk.msra.mxu1 %vm2133_vm10, %v8773_v13  ;;  %4442 = vmatpush.msk.msra.mxu2 %vm2259_vm11, %v8773_v13  ;;  %vm2129_vm10 = vcmp.eq.s32.totalorder %v5315_v8, %v7038_v52  ;;  %vm2255_vm11 = vcmp.eq.s32.totalorder %v8774_v6, %v7049_v36 }
 0x234   :  { %4395 = vmatpush.msk.msrb.mxu3 %vm2100_vm12, %v8773_v13  ;;  %4411 = vmatpush.msk.msra.mxu0 %vm2116_vm13, %v8773_v13  ;;  %vm2096_vm12 = vcmp.eq.s32.totalorder %v8777_v10, %v7038_v52  ;;  %vm2112_vm13 = vcmp.eq.s32.totalorder %v8778_v11, %v7038_v52 }
 0x235   :  { %4427 = vmatpush.msk.msra.mxu1 %vm2132_vm14, %v8773_v13  ;;  %4443 = vmatpush.msk.msra.mxu2 %vm2258_vm15, %v8773_v13  ;;  %v1418_v57 = vpop.f32.mrf.mxu0  ;;  %vm2128_vm14 = vcmp.eq.s32.totalorder %v8776_v9, %v7038_v52  ;;  %vm2254_vm15 = vcmp.eq.s32.totalorder %v8777_v10, %v7049_v36 }
 0x236   :  { %4396 = vmatpush.msk.msrb.mxu3 %vm2099_vm0, %v8773_v13  ;;  %4412 = vmatpush.msk.msra.mxu0 %vm2115_vm1, %v8773_v13  ;;  %v1438_v53 = vpop.f32.mrf.mxu1  ;;  %vm2095_vm0 = vcmp.eq.s32.totalorder %v8780_v29, %v7038_v52  ;;  %vm2111_vm1 = vcmp.eq.s32.totalorder %v8781_v14, %v7038_v52 }
 0x237   :  { %4428 = vmatpush.msk.msra.mxu1 %vm2131_vm2, %v8773_v13  ;;  %4444 = vmatpush.msk.msra.mxu2 %vm2257_vm3, %v8773_v13  ;;  %v1439_v54 = vadd.f32 %v1438_v53, %v1418_v57  ;;  %vm2127_vm2 = vcmp.eq.s32.totalorder %v8779_v12, %v7038_v52  ;;  %vm2253_vm3 = vcmp.eq.s32.totalorder %v8780_v29, %v7049_v36  ;;  %v7470_v52 = vld [vmem:[%s8731_s4 + $0xf] ss:$0 sm:$0xff] }
 0x238   :  { %4397 = vmatpush.msk.msrb.mxu3 %vm2098_vm4, %v8773_v13  ;;  %4413 = vmatpush.msk.msra.mxu0 %vm2114_vm5, %v8773_v13  ;;  %vm2284_vm4 = vcmp.eq.s32.totalorder %v4995_v17, %v7049_v36  ;;  %vm2300_vm5 = vcmp.eq.s32.totalorder %v4998_v18, %v7049_v36 }
 0x239   :  { %4429 = vmatpush.msk.msra.mxu1 %vm2130_vm6, %v8773_v13  ;;  %4445 = vmatpush.msk.msra.mxu2 %vm2256_vm7, %v8773_v13  ;;  %vm2426_vm6 = vcmp.eq.s32.totalorder %v4992_v16, %v7268_v56  ;;  %vm2442_vm7 = vcmp.eq.s32.totalorder %v4995_v17, %v7268_v56 }
 0x23a   :  { %4398 = vmatpush.msk.msrb.mxu3 %vm2097_vm8, %v8773_v13  ;;  %4414 = vmatpush.msk.msra.mxu0 %vm2113_vm9, %v8773_v13  ;;  %vm2283_vm8 = vcmp.eq.s32.totalorder %v5004_v20, %v7049_v36  ;;  %vm2299_vm9 = vcmp.eq.s32.totalorder %v5007_v21, %v7049_v36 }
 0x23b   :  { %4430 = vmatpush.msk.msra.mxu1 %vm2129_vm10, %v8773_v13  ;;  %4446 = vmatpush.msk.msra.mxu2 %vm2255_vm11, %v8773_v13  ;;  %v1300_v51 = vpop.f32.mrf.mxu3  ;;  %vm2425_vm10 = vcmp.eq.s32.totalorder %v5001_v19, %v7268_v56  ;;  %vm2441_vm11 = vcmp.eq.s32.totalorder %v5004_v20, %v7268_v56 }
 0x23c   :  { %4399 = vmatpush.msk.msrb.mxu3 %vm2096_vm12, %v8773_v13  ;;  %4415 = vmatpush.msk.msra.mxu0 %vm2112_vm13, %v8773_v13  ;;  %v7271_v55 = vadd.f32 %v1300_v51, %v7059_v15  ;;  %v1458_v57 = vpop.f32.mrf.mxu2  ;;  %vm2282_vm12 = vcmp.eq.s32.totalorder %v5013_v23, %v7049_v36  ;;  %vm2298_vm13 = vcmp.eq.s32.totalorder %v5032_v25, %v7049_v36 }
 0x23d   :  { %4431 = vmatpush.msk.msra.mxu1 %vm2128_vm14, %v8773_v13  ;;  %4447 = vmatpush.msk.msra.mxu2 %vm2254_vm15, %v8773_v13  ;;  %v7275_v53 = vadd.f32 %v1458_v57, %v1439_v54  ;;  %vm2424_vm14 = vcmp.eq.s32.totalorder %v5010_v22, %v7268_v56  ;;  %vm2440_vm15 = vcmp.eq.s32.totalorder %v5013_v23, %v7268_v56 }
 0x23e   :  { %4400 = vmatpush.msk.msrb.mxu3 %vm2095_vm0, %v8773_v13  ;;  %4416 = vmatpush.msk.msra.mxu0 %vm2111_vm1, %v8773_v13  ;;  %vm2281_vm0 = vcmp.eq.s32.totalorder %v5048_v27, %v7049_v36  ;;  %vm2297_vm1 = vcmp.eq.s32.totalorder %v5051_v28, %v7049_v36 }
 0x23f   :  { %4432 = vmatpush.msk.msra.mxu1 %vm2127_vm2, %v8773_v13  ;;  %4448 = vmatpush.msk.msra.mxu2 %vm2253_vm3, %v8773_v13  ;;  %v2728_v15 = vpack.c.bf16 %v7275_v53, %v7271_v55  ;;  %vm2423_vm2 = vcmp.eq.s32.totalorder %v5039_v26, %v7268_v56  ;;  %vm2439_vm3 = vcmp.eq.s32.totalorder %v5048_v27, %v7268_v56  ;;  %v4913_v55 = vmov 2  }
 0x240   :  { %2207 = vmatmul.f32.vlgmr.msrb.gmra.mxu3 %v5584_v50  ;;  %2227 = vmatmul.f32.vlgmr.msra.gmra.mxu0 %v5586_v48 }
 0x241   :  { %2247 = vmatmul.f32.vlgmr.msra.gmra.mxu1 %v5588_v24  ;;  %2365 = vmatmul.f32.vlgmr.msra.gmra.mxu2 %v5584_v50 }
 0x242   :  { %4449 = vmatpush.msk.msra.mxu3 %vm2284_vm4, %v8773_v13  ;;  %4465 = vmatpush.msk.msrb.mxu0 %vm2300_vm5, %v8773_v13  ;;  %vm2280_vm4 = vcmp.eq.s32.totalorder %v5062_v31, %v7049_v36  ;;  %vm2296_vm5 = vcmp.eq.s32.totalorder %v5073_v32, %v7049_v36 }
 0x243   :  { %4481 = vmatpush.msk.msrb.mxu1 %vm2426_vm6, %v8773_v13  ;;  %4497 = vmatpush.msk.msrb.mxu2 %vm2442_vm7, %v8773_v13  ;;  %vm2422_vm6 = vcmp.eq.s32.totalorder %v5059_v30, %v7268_v56  ;;  %vm2438_vm7 = vcmp.eq.s32.totalorder %v5062_v31, %v7268_v56 }
 0x244   :  { %4450 = vmatpush.msk.msra.mxu3 %vm2283_vm8, %v8773_v13  ;;  %4466 = vmatpush.msk.msrb.mxu0 %vm2299_vm9, %v8773_v13  ;;  %vm2279_vm8 = vcmp.eq.s32.totalorder %v5091_v34, %v7049_v36  ;;  %vm2295_vm9 = vcmp.eq.s32.totalorder %v5102_v35, %v7049_v36 }
 0x245   :  { %4482 = vmatpush.msk.msrb.mxu1 %vm2425_vm10, %v8773_v13  ;;  %4498 = vmatpush.msk.msrb.mxu2 %vm2441_vm11, %v8773_v13  ;;  %vm2421_vm10 = vcmp.eq.s32.totalorder %v5076_v33, %v7268_v56  ;;  %vm2437_vm11 = vcmp.eq.s32.totalorder %v5091_v34, %v7268_v56 }
 0x246   :  { %4451 = vmatpush.msk.msra.mxu3 %vm2282_vm12, %v8773_v13  ;;  %4467 = vmatpush.msk.msrb.mxu0 %vm2298_vm13, %v8773_v13  ;;  %vm2278_vm12 = vcmp.eq.s32.totalorder %v5120_v38, %v7049_v36  ;;  %vm2294_vm13 = vcmp.eq.s32.totalorder %v5123_v39, %v7049_v36 }
 0x247   :  { %4483 = vmatpush.msk.msrb.mxu1 %vm2424_vm14, %v8773_v13  ;;  %4499 = vmatpush.msk.msrb.mxu2 %vm2440_vm15, %v8773_v13  ;;  %vm2420_vm14 = vcmp.eq.s32.totalorder %v5117_v37, %v7268_v56  ;;  %vm2436_vm15 = vcmp.eq.s32.totalorder %v5120_v38, %v7268_v56 }
 0x248   :  { %4452 = vmatpush.msk.msra.mxu3 %vm2281_vm0, %v8773_v13  ;;  %4468 = vmatpush.msk.msrb.mxu0 %vm2297_vm1, %v8773_v13  ;;  %vm2277_vm0 = vcmp.eq.s32.totalorder %v5143_v42, %v7049_v36  ;;  %vm2293_vm1 = vcmp.eq.s32.totalorder %v5158_v43, %v7049_v36 }
 0x249   :  { %4484 = vmatpush.msk.msrb.mxu1 %vm2423_vm2, %v8773_v13  ;;  %4500 = vmatpush.msk.msrb.mxu2 %vm2439_vm3, %v8773_v13  ;;  %vm2419_vm2 = vcmp.eq.s32.totalorder %v5140_v41, %v7268_v56  ;;  %vm2435_vm3 = vcmp.eq.s32.totalorder %v5143_v42, %v7268_v56 }
 0x24a   :  { %4453 = vmatpush.msk.msra.mxu3 %vm2280_vm4, %v8773_v13  ;;  %4469 = vmatpush.msk.msrb.mxu0 %vm2296_vm5, %v8773_v13  ;;  %vm2276_vm4 = vcmp.eq.s32.totalorder %v5184_v46, %v7049_v36  ;;  %vm2292_vm5 = vcmp.eq.s32.totalorder %v5193_v47, %v7049_v36 }
 0x24b   :  { %4485 = vmatpush.msk.msrb.mxu1 %vm2422_vm6, %v8773_v13  ;;  %4501 = vmatpush.msk.msrb.mxu2 %vm2438_vm7, %v8773_v13  ;;  %vm2418_vm6 = vcmp.eq.s32.totalorder %v5173_v44, %v7268_v56  ;;  %vm2434_vm7 = vcmp.eq.s32.totalorder %v5184_v46, %v7268_v56 }
 0x24c   :  { %4454 = vmatpush.msk.msra.mxu3 %vm2279_vm8, %v8773_v13  ;;  %4470 = vmatpush.msk.msrb.mxu0 %vm2295_vm9, %v8773_v13  ;;  %vm2275_vm8 = vcmp.eq.s32.totalorder %v5232_v59, %v7049_v36  ;;  %vm2291_vm9 = vcmp.eq.s32.totalorder %v5235_v60, %v7049_v36 }
 0x24d   :  { %4486 = vmatpush.msk.msrb.mxu1 %vm2421_vm10, %v8773_v13  ;;  %4502 = vmatpush.msk.msrb.mxu2 %vm2437_vm11, %v8773_v13  ;;  %vm2417_vm10 = vcmp.eq.s32.totalorder %v5229_v58, %v7268_v56  ;;  %vm2433_vm11 = vcmp.eq.s32.totalorder %v5232_v59, %v7268_v56 }
 0x24e   :  { %4455 = vmatpush.msk.msra.mxu3 %vm2278_vm12, %v8773_v13  ;;  %4471 = vmatpush.msk.msrb.mxu0 %vm2294_vm13, %v8773_v13  ;;  %vm2274_vm12 = vcmp.eq.s32.totalorder %v5251_v62, %v7049_v36  ;;  %vm2290_vm13 = vcmp.eq.s32.totalorder %v5254_v63, %v7049_v36 }
 0x24f   :  { %4487 = vmatpush.msk.msrb.mxu1 %vm2420_vm14, %v8773_v13  ;;  %4503 = vmatpush.msk.msrb.mxu2 %vm2436_vm15, %v8773_v13  ;;  %vm2416_vm14 = vcmp.eq.s32.totalorder %v5248_v61, %v7268_v56  ;;  %vm2432_vm15 = vcmp.eq.s32.totalorder %v5251_v62, %v7268_v56 }
 0x250   :  { %4456 = vmatpush.msk.msra.mxu3 %vm2277_vm0, %v8773_v13  ;;  %4472 = vmatpush.msk.msrb.mxu0 %vm2293_vm1, %v8773_v13  ;;  %vm2273_vm0 = vcmp.eq.s32.totalorder %v5262_v1, %v7049_v36  ;;  %vm2289_vm1 = vcmp.eq.s32.totalorder %v5265_v2, %v7049_v36 }
 0x251   :  { %4488 = vmatpush.msk.msrb.mxu1 %vm2419_vm2, %v8773_v13  ;;  %4504 = vmatpush.msk.msrb.mxu2 %vm2435_vm3, %v8773_v13  ;;  %vm2415_vm2 = vcmp.eq.s32.totalorder %v5257_v0, %v7268_v56  ;;  %vm2431_vm3 = vcmp.eq.s32.totalorder %v5262_v1, %v7268_v56 }
 0x252   :  { %4457 = vmatpush.msk.msra.mxu3 %vm2276_vm4, %v8773_v13  ;;  %4473 = vmatpush.msk.msrb.mxu0 %vm2292_vm5, %v8773_v13  ;;  %vm2272_vm4 = vcmp.eq.s32.totalorder %v5271_v4, %v7049_v36  ;;  %vm2288_vm5 = vcmp.eq.s32.totalorder %v5290_v5, %v7049_v36 }
 0x253   :  { %4489 = vmatpush.msk.msrb.mxu1 %vm2418_vm6, %v8773_v13  ;;  %4505 = vmatpush.msk.msrb.mxu2 %vm2434_vm7, %v8773_v13  ;;  %vm2414_vm6 = vcmp.eq.s32.totalorder %v5268_v3, %v7268_v56  ;;  %vm2430_vm7 = vcmp.eq.s32.totalorder %v5271_v4, %v7268_v56 }
 0x254   :  { %4458 = vmatpush.msk.msra.mxu3 %vm2275_vm8, %v8773_v13  ;;  %4474 = vmatpush.msk.msrb.mxu0 %vm2291_vm9, %v8773_v13  ;;  %vm2271_vm8 = vcmp.eq.s32.totalorder %v8775_v7, %v7049_v36  ;;  %vm2287_vm9 = vcmp.eq.s32.totalorder %v5315_v8, %v7049_v36 }
 0x255   :  { %4490 = vmatpush.msk.msrb.mxu1 %vm2417_vm10, %v8773_v13  ;;  %4506 = vmatpush.msk.msrb.mxu2 %vm2433_vm11, %v8773_v13  ;;  %vm2413_vm10 = vcmp.eq.s32.totalorder %v8774_v6, %v7268_v56  ;;  %vm2429_vm11 = vcmp.eq.s32.totalorder %v8775_v7, %v7268_v56 }
 0x256   :  { %4459 = vmatpush.msk.msra.mxu3 %vm2274_vm12, %v8773_v13  ;;  %4475 = vmatpush.msk.msrb.mxu0 %vm2290_vm13, %v8773_v13  ;;  %vm2270_vm12 = vcmp.eq.s32.totalorder %v8778_v11, %v7049_v36  ;;  %vm2286_vm13 = vcmp.eq.s32.totalorder %v8776_v9, %v7049_v36 }
 0x257   :  { %4491 = vmatpush.msk.msrb.mxu1 %vm2416_vm14, %v8773_v13  ;;  %4507 = vmatpush.msk.msrb.mxu2 %vm2432_vm15, %v8773_v13  ;;  %vm2412_vm14 = vcmp.eq.s32.totalorder %v8777_v10, %v7268_v56  ;;  %vm2428_vm15 = vcmp.eq.s32.totalorder %v8778_v11, %v7268_v56 }
 0x258   :  { %4460 = vmatpush.msk.msra.mxu3 %vm2273_vm0, %v8773_v13  ;;  %4476 = vmatpush.msk.msrb.mxu0 %vm2289_vm1, %v8773_v13  ;;  %vm2269_vm0 = vcmp.eq.s32.totalorder %v8781_v14, %v7049_v36  ;;  %vm2285_vm1 = vcmp.eq.s32.totalorder %v8779_v12, %v7049_v36 }
 0x259   :  { %4492 = vmatpush.msk.msrb.mxu1 %vm2415_vm2, %v8773_v13  ;;  %4508 = vmatpush.msk.msrb.mxu2 %vm2431_vm3, %v8773_v13  ;;  %vm2411_vm2 = vcmp.eq.s32.totalorder %v8780_v29, %v7268_v56  ;;  %vm2427_vm3 = vcmp.eq.s32.totalorder %v8781_v14, %v7268_v56 }
 0x25a   :  { %4461 = vmatpush.msk.msra.mxu3 %vm2272_vm4, %v8773_v13  ;;  %4477 = vmatpush.msk.msrb.mxu0 %vm2288_vm5, %v8773_v13  ;;  %vm2458_vm4 = vcmp.eq.s32.totalorder %v4998_v18, %v7268_v56  ;;  %vm2584_vm5 = vcmp.eq.s32.totalorder %v4992_v16, %v7470_v52 }
 0x25b   :  { %4493 = vmatpush.msk.msrb.mxu1 %vm2414_vm6, %v8773_v13  ;;  %4509 = vmatpush.msk.msrb.mxu2 %vm2430_vm7, %v8773_v13  ;;  %vm2600_vm6 = vcmp.eq.s32.totalorder %v4995_v17, %v7470_v52  ;;  %vm2616_vm7 = vcmp.eq.s32.totalorder %v4998_v18, %v7470_v52  ;;  %v1596_v17 = vpop.f32.mrf.mxu0  ;;  %v1616_v18 = vpop.f32.mrf.mxu1 }
 0x25c   :  { %4462 = vmatpush.msk.msra.mxu3 %vm2271_vm8, %v8773_v13  ;;  %4478 = vmatpush.msk.msrb.mxu0 %vm2287_vm9, %v8773_v13  ;;  %vm2457_vm8 = vcmp.eq.s32.totalorder %v5007_v21, %v7268_v56  ;;  %vm2583_vm9 = vcmp.eq.s32.totalorder %v5001_v19, %v7470_v52 }
 0x25d   :  { %4494 = vmatpush.msk.msrb.mxu1 %vm2413_vm10, %v8773_v13  ;;  %4510 = vmatpush.msk.msrb.mxu2 %vm2429_vm11, %v8773_v13  ;;  %vm2599_vm10 = vcmp.eq.s32.totalorder %v5004_v20, %v7470_v52  ;;  %vm2615_vm11 = vcmp.eq.s32.totalorder %v5007_v21, %v7470_v52  ;;  %v1576_v20 = vpop.f32.mrf.mxu3 }
 0x25e   :  { %4463 = vmatpush.msk.msra.mxu3 %vm2270_vm12, %v8773_v13  ;;  %4479 = vmatpush.msk.msrb.mxu0 %vm2286_vm13, %v8773_v13  ;;  %vm2456_vm12 = vcmp.eq.s32.totalorder %v5032_v25, %v7268_v56  ;;  %vm2582_vm13 = vcmp.eq.s32.totalorder %v5010_v22, %v7470_v52  ;;  %v1734_v21 = vpop.f32.mrf.mxu2  ;;  %v1597_v57 = vadd.f32 %v1596_v17, %v1576_v20  ;;  %v4840_v17 = vld [vmem:[%s8733_s2] sm:$0xff]  ;;  %v8790_v20 = vld [vmem:[#allocation3_spill] sm:$0xff] }
 0x25f   :  { %4495 = vmatpush.msk.msrb.mxu1 %vm2412_vm14, %v8773_v13  ;;  %4511 = vmatpush.msk.msrb.mxu2 %vm2428_vm15, %v8773_v13  ;;  %vm2598_vm14 = vcmp.eq.s32.totalorder %v5013_v23, %v7470_v52  ;;  %vm2614_vm15 = vcmp.eq.s32.totalorder %v5032_v25, %v7470_v52 }
 0x260   :  { %4464 = vmatpush.msk.msra.mxu3 %vm2269_vm0, %v8773_v13  ;;  %4480 = vmatpush.msk.msrb.mxu0 %vm2285_vm1, %v8773_v13  ;;  %vm2455_vm0 = vcmp.eq.s32.totalorder %v5051_v28, %v7268_v56  ;;  %vm2581_vm1 = vcmp.eq.s32.totalorder %v5039_v26, %v7470_v52 }
 0x261   :  { %4496 = vmatpush.msk.msrb.mxu1 %vm2411_vm2, %v8773_v13  ;;  %4512 = vmatpush.msk.msrb.mxu2 %vm2427_vm3, %v8773_v13  ;;  %vm2597_vm2 = vcmp.eq.s32.totalorder %v5048_v27, %v7470_v52  ;;  %vm2613_vm3 = vcmp.eq.s32.totalorder %v5051_v28, %v7470_v52 }
 0x262   :  { %2385 = vmatmul.f32.vlgmr.msra.gmra.mxu3 %v5586_v48  ;;  %2405 = vmatmul.f32.vlgmr.msrb.gmra.mxu0 %v5588_v24 }
 0x263   :  { %2523 = vmatmul.f32.vlgmr.msrb.gmra.mxu1 %v5584_v50  ;;  %2543 = vmatmul.f32.vlgmr.msrb.gmra.mxu2 %v5586_v48 }
 0x264   :  { %4513 = vmatpush.msk.msrb.mxu3 %vm2458_vm4, %v8773_v13  ;;  %4529 = vmatpush.msk.msra.mxu0 %vm2584_vm5, %v8773_v13  ;;  %vm2454_vm4 = vcmp.eq.s32.totalorder %v5073_v32, %v7268_v56  ;;  %vm2580_vm5 = vcmp.eq.s32.totalorder %v5059_v30, %v7470_v52 }
 0x265   :  { %4545 = vmatpush.msk.msra.mxu1 %vm2600_vm6, %v8773_v13  ;;  %4561 = vmatpush.msk.msra.mxu2 %vm2616_vm7, %v8773_v13  ;;  %vm2596_vm6 = vcmp.eq.s32.totalorder %v5062_v31, %v7470_v52  ;;  %vm2612_vm7 = vcmp.eq.s32.totalorder %v5073_v32, %v7470_v52 }
 0x266   :  { %4514 = vmatpush.msk.msrb.mxu3 %vm2457_vm8, %v8773_v13  ;;  %4530 = vmatpush.msk.msra.mxu0 %vm2583_vm9, %v8773_v13  ;;  %vm2453_vm8 = vcmp.eq.s32.totalorder %v5102_v35, %v7268_v56  ;;  %vm2579_vm9 = vcmp.eq.s32.totalorder %v5076_v33, %v7470_v52 }
 0x267   :  { %4546 = vmatpush.msk.msra.mxu1 %vm2599_vm10, %v8773_v13  ;;  %4562 = vmatpush.msk.msra.mxu2 %vm2615_vm11, %v8773_v13  ;;  %vm2595_vm10 = vcmp.eq.s32.totalorder %v5091_v34, %v7470_v52  ;;  %vm2611_vm11 = vcmp.eq.s32.totalorder %v5102_v35, %v7470_v52 }
 0x268   :  { %4515 = vmatpush.msk.msrb.mxu3 %vm2456_vm12, %v8773_v13  ;;  %4531 = vmatpush.msk.msra.mxu0 %vm2582_vm13, %v8773_v13  ;;  %vm2452_vm12 = vcmp.eq.s32.totalorder %v5123_v39, %v7268_v56  ;;  %vm2578_vm13 = vcmp.eq.s32.totalorder %v5117_v37, %v7470_v52 }
 0x269   :  { %4547 = vmatpush.msk.msra.mxu1 %vm2598_vm14, %v8773_v13  ;;  %4563 = vmatpush.msk.msra.mxu2 %vm2614_vm15, %v8773_v13  ;;  %vm2594_vm14 = vcmp.eq.s32.totalorder %v5120_v38, %v7470_v52  ;;  %vm2610_vm15 = vcmp.eq.s32.totalorder %v5123_v39, %v7470_v52 }
 0x26a   :  { %4516 = vmatpush.msk.msrb.mxu3 %vm2455_vm0, %v8773_v13  ;;  %4532 = vmatpush.msk.msra.mxu0 %vm2581_vm1, %v8773_v13  ;;  %vm2451_vm0 = vcmp.eq.s32.totalorder %v5158_v43, %v7268_v56  ;;  %vm2577_vm1 = vcmp.eq.s32.totalorder %v5140_v41, %v7470_v52 }
 0x26b   :  { %4548 = vmatpush.msk.msra.mxu1 %vm2597_vm2, %v8773_v13  ;;  %4564 = vmatpush.msk.msra.mxu2 %vm2613_vm3, %v8773_v13  ;;  %vm2593_vm2 = vcmp.eq.s32.totalorder %v5143_v42, %v7470_v52  ;;  %vm2609_vm3 = vcmp.eq.s32.totalorder %v5158_v43, %v7470_v52 }
 0x26c   :  { %4517 = vmatpush.msk.msrb.mxu3 %vm2454_vm4, %v8773_v13  ;;  %4533 = vmatpush.msk.msra.mxu0 %vm2580_vm5, %v8773_v13  ;;  %vm2450_vm4 = vcmp.eq.s32.totalorder %v5193_v47, %v7268_v56  ;;  %vm2576_vm5 = vcmp.eq.s32.totalorder %v5173_v44, %v7470_v52 }
 0x26d   :  { %4549 = vmatpush.msk.msra.mxu1 %vm2596_vm6, %v8773_v13  ;;  %4565 = vmatpush.msk.msra.mxu2 %vm2612_vm7, %v8773_v13  ;;  %vm2592_vm6 = vcmp.eq.s32.totalorder %v5184_v46, %v7470_v52  ;;  %vm2608_vm7 = vcmp.eq.s32.totalorder %v5193_v47, %v7470_v52 }
 0x26e   :  { %4518 = vmatpush.msk.msrb.mxu3 %vm2453_vm8, %v8773_v13  ;;  %4534 = vmatpush.msk.msra.mxu0 %vm2579_vm9, %v8773_v13  ;;  %vm2449_vm8 = vcmp.eq.s32.totalorder %v5235_v60, %v7268_v56  ;;  %vm2575_vm9 = vcmp.eq.s32.totalorder %v5229_v58, %v7470_v52 }
 0x26f   :  { %4550 = vmatpush.msk.msra.mxu1 %vm2595_vm10, %v8773_v13  ;;  %4566 = vmatpush.msk.msra.mxu2 %vm2611_vm11, %v8773_v13  ;;  %vm2591_vm10 = vcmp.eq.s32.totalorder %v5232_v59, %v7470_v52  ;;  %vm2607_vm11 = vcmp.eq.s32.totalorder %v5235_v60, %v7470_v52 }
 0x270   :  { %4519 = vmatpush.msk.msrb.mxu3 %vm2452_vm12, %v8773_v13  ;;  %4535 = vmatpush.msk.msra.mxu0 %vm2578_vm13, %v8773_v13  ;;  %vm2448_vm12 = vcmp.eq.s32.totalorder %v5254_v63, %v7268_v56  ;;  %vm2574_vm13 = vcmp.eq.s32.totalorder %v5248_v61, %v7470_v52 }
 0x271   :  { %4551 = vmatpush.msk.msra.mxu1 %vm2594_vm14, %v8773_v13  ;;  %4567 = vmatpush.msk.msra.mxu2 %vm2610_vm15, %v8773_v13  ;;  %vm2590_vm14 = vcmp.eq.s32.totalorder %v5251_v62, %v7470_v52  ;;  %vm2606_vm15 = vcmp.eq.s32.totalorder %v5254_v63, %v7470_v52 }
 0x272   :  { %4520 = vmatpush.msk.msrb.mxu3 %vm2451_vm0, %v8773_v13  ;;  %4536 = vmatpush.msk.msra.mxu0 %vm2577_vm1, %v8773_v13  ;;  %vm2447_vm0 = vcmp.eq.s32.totalorder %v5265_v2, %v7268_v56  ;;  %vm2573_vm1 = vcmp.eq.s32.totalorder %v5257_v0, %v7470_v52 }
 0x273   :  { %4552 = vmatpush.msk.msra.mxu1 %vm2593_vm2, %v8773_v13  ;;  %4568 = vmatpush.msk.msra.mxu2 %vm2609_vm3, %v8773_v13  ;;  %vm2589_vm2 = vcmp.eq.s32.totalorder %v5262_v1, %v7470_v52  ;;  %vm2605_vm3 = vcmp.eq.s32.totalorder %v5265_v2, %v7470_v52 }
 0x274   :  { %4521 = vmatpush.msk.msrb.mxu3 %vm2450_vm4, %v8773_v13  ;;  %4537 = vmatpush.msk.msra.mxu0 %vm2576_vm5, %v8773_v13  ;;  %vm2446_vm4 = vcmp.eq.s32.totalorder %v5290_v5, %v7268_v56  ;;  %vm2572_vm5 = vcmp.eq.s32.totalorder %v5268_v3, %v7470_v52 }
 0x275   :  { %4553 = vmatpush.msk.msra.mxu1 %vm2592_vm6, %v8773_v13  ;;  %4569 = vmatpush.msk.msra.mxu2 %vm2608_vm7, %v8773_v13  ;;  %vm2588_vm6 = vcmp.eq.s32.totalorder %v5271_v4, %v7470_v52  ;;  %vm2604_vm7 = vcmp.eq.s32.totalorder %v5290_v5, %v7470_v52 }
 0x276   :  { %4522 = vmatpush.msk.msrb.mxu3 %vm2449_vm8, %v8773_v13  ;;  %4538 = vmatpush.msk.msra.mxu0 %vm2575_vm9, %v8773_v13  ;;  %vm2445_vm8 = vcmp.eq.s32.totalorder %v5315_v8, %v7268_v56  ;;  %vm2571_vm9 = vcmp.eq.s32.totalorder %v8774_v6, %v7470_v52 }
 0x277   :  { %4554 = vmatpush.msk.msra.mxu1 %vm2591_vm10, %v8773_v13  ;;  %4570 = vmatpush.msk.msra.mxu2 %vm2607_vm11, %v8773_v13  ;;  %vm2587_vm10 = vcmp.eq.s32.totalorder %v8775_v7, %v7470_v52  ;;  %vm2603_vm11 = vcmp.eq.s32.totalorder %v5315_v8, %v7470_v52 }
 0x278   :  { %4523 = vmatpush.msk.msrb.mxu3 %vm2448_vm12, %v8773_v13  ;;  %4539 = vmatpush.msk.msra.mxu0 %vm2574_vm13, %v8773_v13  ;;  %vm2444_vm12 = vcmp.eq.s32.totalorder %v8776_v9, %v7268_v56  ;;  %vm2570_vm13 = vcmp.eq.s32.totalorder %v8777_v10, %v7470_v52 }
 0x279   :  { %4555 = vmatpush.msk.msra.mxu1 %vm2590_vm14, %v8773_v13  ;;  %4571 = vmatpush.msk.msra.mxu2 %vm2606_vm15, %v8773_v13  ;;  %vm2586_vm14 = vcmp.eq.s32.totalorder %v8778_v11, %v7470_v52  ;;  %vm2602_vm15 = vcmp.eq.s32.totalorder %v8776_v9, %v7470_v52  ;;  %v1774_v23 = vpop.f32.mrf.mxu0 }
 0x27a   :  { %4524 = vmatpush.msk.msrb.mxu3 %vm2447_vm0, %v8773_v13  ;;  %4540 = vmatpush.msk.msra.mxu0 %vm2573_vm1, %v8773_v13  ;;  %vm2443_vm0 = vcmp.eq.s32.totalorder %v8779_v12, %v7268_v56  ;;  %vm2569_vm1 = vcmp.eq.s32.totalorder %v8780_v29, %v7470_v52  ;;  %v1892_v25 = vpop.f32.mrf.mxu1 }
 0x27b   :  { %4556 = vmatpush.msk.msra.mxu1 %vm2589_vm2, %v8773_v13  ;;  %4572 = vmatpush.msk.msra.mxu2 %vm2605_vm3, %v8773_v13  ;;  %vm2585_vm2 = vcmp.eq.s32.totalorder %v8781_v14, %v7470_v52  ;;  %vm2601_vm3 = vcmp.eq.s32.totalorder %v8779_v12, %v7470_v52 }
 0x27c   :  { %4525 = vmatpush.msk.msrb.mxu3 %vm2446_vm4, %v8773_v13  ;;  %4541 = vmatpush.msk.msra.mxu0 %vm2572_vm5, %v8773_v13 }
 0x27d   :  { %4557 = vmatpush.msk.msra.mxu1 %vm2588_vm6, %v8773_v13  ;;  %4573 = vmatpush.msk.msra.mxu2 %vm2604_vm7, %v8773_v13 }
 0x27e   :  { %4526 = vmatpush.msk.msrb.mxu3 %vm2445_vm8, %v8773_v13  ;;  %4542 = vmatpush.msk.msra.mxu0 %vm2571_vm9, %v8773_v13 }
 0x27f   :  { %4558 = vmatpush.msk.msra.mxu1 %vm2587_vm10, %v8773_v13  ;;  %4574 = vmatpush.msk.msra.mxu2 %vm2603_vm11, %v8773_v13  ;;  %v1754_v27 = vpop.f32.mrf.mxu3 }
 0x280   :  { %4527 = vmatpush.msk.msrb.mxu3 %vm2444_vm12, %v8773_v13  ;;  %4543 = vmatpush.msk.msra.mxu0 %vm2570_vm13, %v8773_v13  ;;  %v1912_v28 = vpop.f32.mrf.mxu2  ;;  %v1755_v36 = vadd.f32 %v1754_v27, %v1734_v21  ;;  %v8786_v21 = vld [vmem:[#allocation5_spill] sm:$0xff] }
 0x281   :  { %4559 = vmatpush.msk.msra.mxu1 %vm2586_vm14, %v8773_v13  ;;  %4575 = vmatpush.msk.msra.mxu2 %vm2602_vm15, %v8773_v13  ;;  %v1913_v11 = vadd.f32 %v1912_v28, %v1892_v25  ;;  %v8787_v25 = vld [vmem:[#allocation7_spill] sm:$0xff]  ;;  %v4912_v28 = vmov 3  }
 0x282   :  { %4528 = vmatpush.msk.msrb.mxu3 %vm2443_vm0, %v8773_v13  ;;  %4544 = vmatpush.msk.msra.mxu0 %vm2569_vm1, %v8773_v13  ;;  %v1775_v52 = vadd.f32 %v1774_v23, %v1755_v36  ;;  %v8788_v27 = vpack.c.bf16 %v8786_v21, %v8787_v25 }
 0x283   :  { %4560 = vmatpush.msk.msra.mxu1 %vm2585_vm2, %v8773_v13  ;;  %4576 = vmatpush.msk.msra.mxu2 %vm2601_vm3, %v8773_v13 }
 0x284   :  { %2563 = vmatmul.f32.vlgmr.msrb.gmra.mxu3 %v5588_v24  ;;  %2681 = vmatmul.f32.vlgmr.msra.gmra.mxu0 %v5584_v50 }
 0x285   :  { %2701 = vmatmul.f32.vlgmr.msra.gmra.mxu1 %v5586_v48  ;;  %2721 = vmatmul.f32.vlgmr.msra.gmra.mxu2 %v5588_v24 }
 0x286   :  { %4866 = vset.pattern.permute.xlu0 %v4912_v28  ;;  %4865 = vset.pattern.permute.xlu2 %v4913_v55 }
 0x29b   :  { %v2050_v31 = vpop.f32.mrf.mxu0 }
 0x29c   :  { %v2070_v32 = vpop.f32.mrf.mxu1 }
 0x29d   :  { %v2071_v12 = vadd.f32 %v2070_v32, %v2050_v31  ;;  %v7718_v31 = vld [vmem:[%s8734_s5 + $0x1] ss:$0 sm:$0xff]  ;;  %v7723_v32 = vld [vmem:[%s8734_s5 + $0x2] ss:$0 sm:$0xff] }
 0x29e   :  { %vm2900_vm5 = vcmp.eq.s32.totalorder %v4992_v16, %v7718_v31  ;;  %vm2957_vm6 = vcmp.eq.s32.totalorder %v4992_v16, %v7723_v32  ;;  %vm2899_vm9 = vcmp.eq.s32.totalorder %v5001_v19, %v7718_v31  ;;  %vm2956_vm10 = vcmp.eq.s32.totalorder %v5001_v19, %v7723_v32 }
 0x29f   :  { %4597 = vmatpush.msk.msrb.mxu1 %vm2900_vm5, %v8773_v13  ;;  %4613 = vmatpush.msk.msrb.mxu2 %vm2957_vm6, %v8773_v13  ;;  %vm2898_vm13 = vcmp.eq.s32.totalorder %v5010_v22, %v7718_v31  ;;  %vm2955_vm14 = vcmp.eq.s32.totalorder %v5010_v22, %v7723_v32  ;;  %vm2897_vm1 = vcmp.eq.s32.totalorder %v5039_v26, %v7718_v31 }
 0x2a0   :  { %vm2954_vm2 = vcmp.eq.s32.totalorder %v5039_v26, %v7723_v32  ;;  %vm2896_vm5 = vcmp.eq.s32.totalorder %v5059_v30, %v7718_v31  ;;  %vm2953_vm6 = vcmp.eq.s32.totalorder %v5059_v30, %v7723_v32 }
 0x2a1   :  { %v1932_v34 = vpop.f32.mrf.mxu3  ;;  %4598 = vmatpush.msk.msrb.mxu1 %vm2899_vm9, %v8773_v13  ;;  %4614 = vmatpush.msk.msrb.mxu2 %vm2956_vm10, %v8773_v13  ;;  %vm2895_vm9 = vcmp.eq.s32.totalorder %v5076_v33, %v7718_v31  ;;  %vm2952_vm10 = vcmp.eq.s32.totalorder %v5076_v33, %v7723_v32 }
 0x2a2   :  { %v2090_v35 = vpop.f32.mrf.mxu2  ;;  %v1933_v54 = vadd.f32 %v1932_v34, %v1913_v11  ;;  %v7728_v34 = vld [vmem:[%s8734_s5 + $0x3] ss:$0 sm:$0xff] }
 0x2a3   :  { %v2091_v51 = vadd.f32 %v2090_v35, %v2071_v12  ;;  %vm3014_vm8 = vcmp.eq.s32.totalorder %v4992_v16, %v7728_v34  ;;  %vm3013_vm11 = vcmp.eq.s32.totalorder %v5001_v19, %v7728_v34  ;;  %vm3012_vm15 = vcmp.eq.s32.totalorder %v5010_v22, %v7728_v34  ;;  %4599 = vmatpush.msk.msrb.mxu1 %vm2898_vm13, %v8773_v13  ;;  %v4908_v35 = vld [vmem:[%s8732_s6] sm:$0xff] }
 0x2a4   :  { %vm3011_vm3 = vcmp.eq.s32.totalorder %v5039_v26, %v7728_v34  ;;  %4615 = vmatpush.msk.msrb.mxu2 %vm2955_vm14, %v8773_v13  ;;  %vm2894_vm13 = vcmp.eq.s32.totalorder %v5117_v37, %v7718_v31  ;;  %vm2951_vm14 = vcmp.eq.s32.totalorder %v5117_v37, %v7723_v32 }
 0x2a5   :  { %4600 = vmatpush.msk.msrb.mxu1 %vm2897_vm1, %v8773_v13  ;;  %vm2893_vm1 = vcmp.eq.s32.totalorder %v5140_v41, %v7718_v31 }
 0x2a6   :  { %4616 = vmatpush.msk.msrb.mxu2 %vm2954_vm2, %v8773_v13  ;;  %vm2950_vm2 = vcmp.eq.s32.totalorder %v5140_v41, %v7723_v32 }
 0x2a7   :  { %4601 = vmatpush.msk.msrb.mxu1 %vm2896_vm5, %v8773_v13  ;;  %vm2892_vm5 = vcmp.eq.s32.totalorder %v5173_v44, %v7718_v31 }
 0x2a8   :  { %4617 = vmatpush.msk.msrb.mxu2 %vm2953_vm6, %v8773_v13  ;;  %vm2949_vm6 = vcmp.eq.s32.totalorder %v5173_v44, %v7723_v32 }
 0x2a9   :  { %4602 = vmatpush.msk.msrb.mxu1 %vm2895_vm9, %v8773_v13  ;;  %vm2891_vm9 = vcmp.eq.s32.totalorder %v5229_v58, %v7718_v31 }
 0x2aa   :  { %4618 = vmatpush.msk.msrb.mxu2 %vm2952_vm10, %v8773_v13  ;;  %vm2948_vm10 = vcmp.eq.s32.totalorder %v5229_v58, %v7723_v32 }
 0x2ab   :  { %4603 = vmatpush.msk.msrb.mxu1 %vm2894_vm13, %v8773_v13  ;;  %vm2890_vm13 = vcmp.eq.s32.totalorder %v5248_v61, %v7718_v31 }
 0x2ac   :  { %4619 = vmatpush.msk.msrb.mxu2 %vm2951_vm14, %v8773_v13  ;;  %vm2947_vm14 = vcmp.eq.s32.totalorder %v5248_v61, %v7723_v32 }
 0x2ad   :  { %4604 = vmatpush.msk.msrb.mxu1 %vm2893_vm1, %v8773_v13  ;;  %vm2889_vm1 = vcmp.eq.s32.totalorder %v5257_v0, %v7718_v31 }
 0x2ae   :  { %4620 = vmatpush.msk.msrb.mxu2 %vm2950_vm2, %v8773_v13  ;;  %vm2946_vm2 = vcmp.eq.s32.totalorder %v5257_v0, %v7723_v32 }
 0x2af   :  { %4605 = vmatpush.msk.msrb.mxu1 %vm2892_vm5, %v8773_v13  ;;  %vm2888_vm5 = vcmp.eq.s32.totalorder %v5268_v3, %v7718_v31 }
 0x2b0   :  { %4621 = vmatpush.msk.msrb.mxu2 %vm2949_vm6, %v8773_v13  ;;  %vm2945_vm6 = vcmp.eq.s32.totalorder %v5268_v3, %v7723_v32 }
 0x2b1   :  { %4606 = vmatpush.msk.msrb.mxu1 %vm2891_vm9, %v8773_v13  ;;  %vm2887_vm9 = vcmp.eq.s32.totalorder %v8774_v6, %v7718_v31 }
 0x2b2   :  { %4622 = vmatpush.msk.msrb.mxu2 %vm2948_vm10, %v8773_v13  ;;  %vm2944_vm10 = vcmp.eq.s32.totalorder %v8774_v6, %v7723_v32 }
 0x2b3   :  { %4607 = vmatpush.msk.msrb.mxu1 %vm2890_vm13, %v8773_v13  ;;  %vm2886_vm13 = vcmp.eq.s32.totalorder %v8777_v10, %v7718_v31 }
 0x2b4   :  { %4623 = vmatpush.msk.msrb.mxu2 %vm2947_vm14, %v8773_v13  ;;  %vm2943_vm14 = vcmp.eq.s32.totalorder %v8777_v10, %v7723_v32 }
 0x2b5   :  { %4608 = vmatpush.msk.msrb.mxu1 %vm2889_vm1, %v8773_v13  ;;  %vm2885_vm1 = vcmp.eq.s32.totalorder %v8780_v29, %v7718_v31 }
 0x2b6   :  { %4624 = vmatpush.msk.msrb.mxu2 %vm2946_vm2, %v8773_v13  ;;  %vm2942_vm2 = vcmp.eq.s32.totalorder %v8780_v29, %v7723_v32 }
 0x2b7   :  { %4609 = vmatpush.msk.msrb.mxu1 %vm2888_vm5, %v8773_v13 }
 0x2b8   :  { %4625 = vmatpush.msk.msrb.mxu2 %vm2945_vm6, %v8773_v13 }
 0x2b9   :  { %4610 = vmatpush.msk.msrb.mxu1 %vm2887_vm9, %v8773_v13 }
 0x2ba   :  { %4626 = vmatpush.msk.msrb.mxu2 %vm2944_vm10, %v8773_v13 }
 0x2bb   :  { %4611 = vmatpush.msk.msrb.mxu1 %vm2886_vm13, %v8773_v13 }
 0x2bc   :  { %4627 = vmatpush.msk.msrb.mxu2 %vm2943_vm14, %v8773_v13 }
 0x2bd   :  { %v2228_v38 = vpop.f32.mrf.mxu0  ;;  %4612 = vmatpush.msk.msrb.mxu1 %vm2885_vm1, %v8773_v13 }
 0x2be   :  { %v2248_v39 = vpop.f32.mrf.mxu1  ;;  %4628 = vmatpush.msk.msrb.mxu2 %vm2942_vm2, %v8773_v13 }
 0x2c3   :  { %v2208_v42 = vpop.f32.mrf.mxu3 }
 0x2c4   :  { %v2366_v43 = vpop.f32.mrf.mxu2  ;;  %v2229_v48 = vadd.f32 %v2228_v38, %v2208_v42  ;;  %v28_v38 = vld [vmem:[%s8732_s6 + $0x8] sm:$0xff]  ;;  %v7923_v42 = vld [vmem:[%s8734_s5 + $0x5] ss:$0 sm:$0xff] }
 0x2c5   :  { %vm3128_vm5 = vcmp.eq.s32.totalorder %v4992_v16, %v7923_v42  ;;  %vm3127_vm9 = vcmp.eq.s32.totalorder %v5001_v19, %v7923_v42  ;;  %vm3126_vm13 = vcmp.eq.s32.totalorder %v5010_v22, %v7923_v42  ;;  %vm3125_vm1 = vcmp.eq.s32.totalorder %v5039_v26, %v7923_v42 }
 0x2c6   :  { %v2249_v14 = vadd.f32 %v2248_v39, %v2229_v48  ;;  %v7918_v39 = vld [vmem:[%s8734_s5 + $0x4] ss:$0 sm:$0xff]  ;;  %4661 = vmatpush.msk.msra.mxu1 %vm3128_vm5, %v8773_v13  ;;  %vm3124_vm5 = vcmp.eq.s32.totalorder %v5059_v30, %v7923_v42 }
 0x2c8   :  { %4662 = vmatpush.msk.msra.mxu1 %vm3127_vm9, %v8773_v13  ;;  %vm3123_vm9 = vcmp.eq.s32.totalorder %v5076_v33, %v7923_v42 }
 0x2ca   :  { %4663 = vmatpush.msk.msra.mxu1 %vm3126_vm13, %v8773_v13  ;;  %vm3122_vm13 = vcmp.eq.s32.totalorder %v5117_v37, %v7923_v42 }
 0x2cc   :  { %4664 = vmatpush.msk.msra.mxu1 %vm3125_vm1, %v8773_v13  ;;  %vm3121_vm1 = vcmp.eq.s32.totalorder %v5140_v41, %v7923_v42 }
 0x2ce   :  { %4665 = vmatpush.msk.msra.mxu1 %vm3124_vm5, %v8773_v13  ;;  %vm3120_vm5 = vcmp.eq.s32.totalorder %v5173_v44, %v7923_v42 }
 0x2d0   :  { %4666 = vmatpush.msk.msra.mxu1 %vm3123_vm9, %v8773_v13  ;;  %vm3119_vm9 = vcmp.eq.s32.totalorder %v5229_v58, %v7923_v42 }
 0x2d2   :  { %4667 = vmatpush.msk.msra.mxu1 %vm3122_vm13, %v8773_v13  ;;  %vm3118_vm13 = vcmp.eq.s32.totalorder %v5248_v61, %v7923_v42 }
 0x2d4   :  { %4668 = vmatpush.msk.msra.mxu1 %vm3121_vm1, %v8773_v13  ;;  %vm3117_vm1 = vcmp.eq.s32.totalorder %v5257_v0, %v7923_v42 }
 0x2d6   :  { %4669 = vmatpush.msk.msra.mxu1 %vm3120_vm5, %v8773_v13  ;;  %vm3116_vm5 = vcmp.eq.s32.totalorder %v5268_v3, %v7923_v42 }
 0x2d8   :  { %4670 = vmatpush.msk.msra.mxu1 %vm3119_vm9, %v8773_v13  ;;  %vm3115_vm9 = vcmp.eq.s32.totalorder %v8774_v6, %v7923_v42 }
 0x2da   :  { %4671 = vmatpush.msk.msra.mxu1 %vm3118_vm13, %v8773_v13  ;;  %vm3114_vm13 = vcmp.eq.s32.totalorder %v8777_v10, %v7923_v42 }
 0x2dc   :  { %4672 = vmatpush.msk.msra.mxu1 %vm3117_vm1, %v8773_v13  ;;  %vm3113_vm1 = vcmp.eq.s32.totalorder %v8780_v29, %v7923_v42  ;;  %v8166_v42 = vld [vmem:[%s8734_s5 + $0xb] ss:$0 sm:$0xff] }
 0x2de   :  { %4673 = vmatpush.msk.msra.mxu1 %vm3116_vm5, %v8773_v13 }
 0x2df   :  { %v2406_v46 = vpop.f32.mrf.mxu0 }
 0x2e0   :  { %v2524_v47 = vpop.f32.mrf.mxu1  ;;  %4674 = vmatpush.msk.msra.mxu1 %vm3115_vm9, %v8773_v13 }
 0x2e2   :  { %4675 = vmatpush.msk.msra.mxu1 %vm3114_vm13, %v8773_v13  ;;  %vm3470_vm13 = vcmp.eq.s32.totalorder %v4992_v16, %v8166_v42 }
 0x2e4   :  { %4676 = vmatpush.msk.msra.mxu1 %vm3113_vm1, %v8773_v13  ;;  %vm3469_vm1 = vcmp.eq.s32.totalorder %v5001_v19, %v8166_v42 }
 0x2e5   :  { %v2386_v59 = vpop.f32.mrf.mxu3 }
 0x2e6   :  { %v2544_v60 = vpop.f32.mrf.mxu2  ;;  %v2387_v2 = vadd.f32 %v2386_v59, %v2366_v43  ;;  %v2730_v43 = vpack.c.bf16 %v2091_v51, %v1933_v54 }
 0x2e7   :  { %v2545_v1 = vadd.f32 %v2544_v60, %v2524_v47  ;;  %v1617_v47 = vadd.f32 %v1616_v18, %v1597_v57  ;;  %v8789_v18 = vld [vmem:[#allocation4_spill] sm:$0xff]  ;;  %v7941_v60 = vld [vmem:[%s8734_s5 + $0x7] ss:$0 sm:$0xff] }
 0x2e8   :  { %v2407_v7 = vadd.f32 %v2406_v46, %v2387_v2  ;;  %v8791_v23 = vpack.c.bf16 %v8789_v18, %v8790_v20  ;;  %v7928_v46 = vld [vmem:[%s8734_s5 + $0x6] ss:$0 sm:$0xff] }
 0x2e9   :  { %v2729_v59 = vpack.c.bf16 %v1775_v52, %v1617_v47  ;;  %vm3185_vm6 = vcmp.eq.s32.totalorder %v4992_v16, %v7928_v46  ;;  %vm3184_vm10 = vcmp.eq.s32.totalorder %v5001_v19, %v7928_v46  ;;  %vm3183_vm14 = vcmp.eq.s32.totalorder %v5010_v22, %v7928_v46 }
 0x2ea   :  { %v2731_v56 = vpack.c.bf16 %v2407_v7, %v2249_v14  ;;  %4677 = vmatpush.msk.msra.mxu2 %vm3185_vm6, %v8773_v13  ;;  %vm3182_vm2 = vcmp.eq.s32.totalorder %v5039_v26, %v7928_v46  ;;  %vm3181_vm6 = vcmp.eq.s32.totalorder %v5059_v30, %v7928_v46 }
 0x2ec   :  { %4678 = vmatpush.msk.msra.mxu2 %vm3184_vm10, %v8773_v13  ;;  %vm3180_vm10 = vcmp.eq.s32.totalorder %v5076_v33, %v7928_v46 }
 0x2ee   :  { %4679 = vmatpush.msk.msra.mxu2 %vm3183_vm14, %v8773_v13  ;;  %vm3179_vm14 = vcmp.eq.s32.totalorder %v5117_v37, %v7928_v46 }
 0x2f0   :  { %4680 = vmatpush.msk.msra.mxu2 %vm3182_vm2, %v8773_v13  ;;  %vm3178_vm2 = vcmp.eq.s32.totalorder %v5140_v41, %v7928_v46 }
 0x2f2   :  { %4681 = vmatpush.msk.msra.mxu2 %vm3181_vm6, %v8773_v13  ;;  %vm3177_vm6 = vcmp.eq.s32.totalorder %v5173_v44, %v7928_v46 }
 0x2f4   :  { %4682 = vmatpush.msk.msra.mxu2 %vm3180_vm10, %v8773_v13  ;;  %vm3176_vm10 = vcmp.eq.s32.totalorder %v5229_v58, %v7928_v46 }
 0x2f6   :  { %4683 = vmatpush.msk.msra.mxu2 %vm3179_vm14, %v8773_v13  ;;  %vm3175_vm14 = vcmp.eq.s32.totalorder %v5248_v61, %v7928_v46 }
 0x2f8   :  { %4684 = vmatpush.msk.msra.mxu2 %vm3178_vm2, %v8773_v13  ;;  %vm3174_vm2 = vcmp.eq.s32.totalorder %v5257_v0, %v7928_v46 }
 0x2fa   :  { %4685 = vmatpush.msk.msra.mxu2 %vm3177_vm6, %v8773_v13  ;;  %vm3173_vm6 = vcmp.eq.s32.totalorder %v5268_v3, %v7928_v46 }
 0x2fc   :  { %4686 = vmatpush.msk.msra.mxu2 %vm3176_vm10, %v8773_v13  ;;  %vm3172_vm10 = vcmp.eq.s32.totalorder %v8774_v6, %v7928_v46 }
 0x2fe   :  { %4687 = vmatpush.msk.msra.mxu2 %vm3175_vm14, %v8773_v13  ;;  %vm3171_vm14 = vcmp.eq.s32.totalorder %v8777_v10, %v7928_v46 }
 0x300   :  { %4688 = vmatpush.msk.msra.mxu2 %vm3174_vm2, %v8773_v13  ;;  %vm3170_vm2 = vcmp.eq.s32.totalorder %v8780_v29, %v7928_v46 }
 0x301   :  { %v2682_v62 = vpop.f32.mrf.mxu0 }
 0x302   :  { %v2702_v63 = vpop.f32.mrf.mxu1  ;;  %4689 = vmatpush.msk.msra.mxu2 %vm3173_vm6, %v8773_v13 }
 0x303   :  { %v2703_v4 = vadd.f32 %v2702_v63, %v2682_v62 }
 0x304   :  { %4690 = vmatpush.msk.msra.mxu2 %vm3172_vm10, %v8773_v13 }
 0x306   :  { %4691 = vmatpush.msk.msra.mxu2 %vm3171_vm14, %v8773_v13 }
 0x307   :  { %v2564_v5 = vpop.f32.mrf.mxu3 }
 0x308   :  { %v2565_v8 = vadd.f32 %v2564_v5, %v2545_v1  ;;  %v2722_v50 = vpop.f32.mrf.mxu2  ;;  %4692 = vmatpush.msk.msra.mxu2 %vm3170_vm2, %v8773_v13 }
 0x309   :  { %v2723_v24 = vadd.f32 %v2722_v50, %v2703_v4 }
 0x30b   :  { %v2732_v9 = vpack.c.bf16 %v2723_v24, %v2565_v8 }
 0x30d   :  { %2741 = vmatpush.bf16.msra.mxu3 %v2732_v9 }
 0x311   :  { %2742 = vmatpush.bf16.msra.mxu3 %v2731_v56 }
 0x315   :  { %2743 = vmatpush.bf16.msra.mxu3 %v2730_v43 }
 0x319   :  { %2744 = vmatpush.bf16.msra.mxu3 %v2729_v59 }
 0x31d   :  { %2745 = vmatpush.bf16.msra.mxu3 %v2728_v15  ;;  %v7713_v15 = vld [vmem:[%s8734_s5] ss:$0 sm:$0xff] }
 0x31e   :  { %vm2843_vm4 = vcmp.eq.s32.totalorder %v4992_v16, %v7713_v15  ;;  %vm2842_vm7 = vcmp.eq.s32.totalorder %v5001_v19, %v7713_v15  ;;  %vm2841_vm12 = vcmp.eq.s32.totalorder %v5010_v22, %v7713_v15  ;;  %vm2840_vm0 = vcmp.eq.s32.totalorder %v5039_v26, %v7713_v15 }
 0x31f   :  { %4581 = vmatpush.msk.msrb.mxu0 %vm2843_vm4, %v8773_v13  ;;  %vm2839_vm4 = vcmp.eq.s32.totalorder %v5059_v30, %v7713_v15 }
 0x321   :  { %2746 = vmatpush.bf16.msra.mxu3 %v2727_v40  ;;  %4582 = vmatpush.msk.msrb.mxu0 %vm2842_vm7, %v8773_v13  ;;  %vm3010_vm7 = vcmp.eq.s32.totalorder %v5059_v30, %v7728_v34 }
 0x323   :  { %4583 = vmatpush.msk.msrb.mxu0 %vm2841_vm12, %v8773_v13  ;;  %vm2837_vm12 = vcmp.eq.s32.totalorder %v5117_v37, %v7713_v15 }
 0x325   :  { %2747 = vmatpush.bf16.msra.mxu3 %v8788_v27  ;;  %4584 = vmatpush.msk.msrb.mxu0 %vm2840_vm0, %v8773_v13  ;;  %vm2836_vm0 = vcmp.eq.s32.totalorder %v5140_v41, %v7713_v15 }
 0x327   :  { %4585 = vmatpush.msk.msrb.mxu0 %vm2839_vm4, %v8773_v13  ;;  %vm2835_vm4 = vcmp.eq.s32.totalorder %v5173_v44, %v7713_v15 }
 0x329   :  { %2748 = vmatpush.bf16.msra.mxu3 %v8791_v23 }
 0x32c   :  { %2749 = vmatmul.bf16.vlgmr.msra.gmra.mxu3 %v4840_v17 }
 0x32d   :  { %4629 = vmatpush.msk.msrb.mxu3 %vm3014_vm8, %v8773_v13  ;;  %vm2838_vm8 = vcmp.eq.s32.totalorder %v5076_v33, %v7713_v15 }
 0x32e   :  { %4586 = vmatpush.msk.msrb.mxu0 %vm2838_vm8, %v8773_v13  ;;  %vm2834_vm8 = vcmp.eq.s32.totalorder %v5229_v58, %v7713_v15 }
 0x32f   :  { %4630 = vmatpush.msk.msrb.mxu3 %vm3013_vm11, %v8773_v13  ;;  %vm3009_vm11 = vcmp.eq.s32.totalorder %v5076_v33, %v7728_v34 }
 0x330   :  { %4587 = vmatpush.msk.msrb.mxu0 %vm2837_vm12, %v8773_v13  ;;  %vm2833_vm12 = vcmp.eq.s32.totalorder %v5248_v61, %v7713_v15 }
 0x331   :  { %4631 = vmatpush.msk.msrb.mxu3 %vm3012_vm15, %v8773_v13  ;;  %vm3008_vm15 = vcmp.eq.s32.totalorder %v5117_v37, %v7728_v34 }
 0x332   :  { %4588 = vmatpush.msk.msrb.mxu0 %vm2836_vm0, %v8773_v13  ;;  %vm2832_vm0 = vcmp.eq.s32.totalorder %v5257_v0, %v7713_v15 }
 0x333   :  { %4632 = vmatpush.msk.msrb.mxu3 %vm3011_vm3, %v8773_v13  ;;  %vm3007_vm3 = vcmp.eq.s32.totalorder %v5140_v41, %v7728_v34 }
 0x334   :  { %4589 = vmatpush.msk.msrb.mxu0 %vm2835_vm4, %v8773_v13  ;;  %vm2831_vm4 = vcmp.eq.s32.totalorder %v5268_v3, %v7713_v15 }
 0x335   :  { %4633 = vmatpush.msk.msrb.mxu3 %vm3010_vm7, %v8773_v13  ;;  %vm3006_vm7 = vcmp.eq.s32.totalorder %v5173_v44, %v7728_v34 }
 0x336   :  { %4590 = vmatpush.msk.msrb.mxu0 %vm2834_vm8, %v8773_v13  ;;  %vm2830_vm8 = vcmp.eq.s32.totalorder %v8774_v6, %v7713_v15 }
 0x337   :  { %4634 = vmatpush.msk.msrb.mxu3 %vm3009_vm11, %v8773_v13  ;;  %vm3005_vm11 = vcmp.eq.s32.totalorder %v5229_v58, %v7728_v34 }
 0x338   :  { %4591 = vmatpush.msk.msrb.mxu0 %vm2833_vm12, %v8773_v13  ;;  %vm2829_vm12 = vcmp.eq.s32.totalorder %v8777_v10, %v7713_v15 }
 0x339   :  { %4635 = vmatpush.msk.msrb.mxu3 %vm3008_vm15, %v8773_v13  ;;  %vm3004_vm15 = vcmp.eq.s32.totalorder %v5248_v61, %v7728_v34 }
 0x33a   :  { %4592 = vmatpush.msk.msrb.mxu0 %vm2832_vm0, %v8773_v13  ;;  %vm2828_vm0 = vcmp.eq.s32.totalorder %v8780_v29, %v7713_v15 }
 0x33b   :  { %4636 = vmatpush.msk.msrb.mxu3 %vm3007_vm3, %v8773_v13  ;;  %vm3003_vm3 = vcmp.eq.s32.totalorder %v5257_v0, %v7728_v34 }
 0x33c   :  { %4593 = vmatpush.msk.msrb.mxu0 %vm2831_vm4, %v8773_v13  ;;  %vm3071_vm4 = vcmp.eq.s32.totalorder %v4992_v16, %v7918_v39 }
 0x33d   :  { %4637 = vmatpush.msk.msrb.mxu3 %vm3006_vm7, %v8773_v13  ;;  %vm3002_vm7 = vcmp.eq.s32.totalorder %v5268_v3, %v7728_v34 }
 0x33e   :  { %4594 = vmatpush.msk.msrb.mxu0 %vm2830_vm8, %v8773_v13  ;;  %vm3070_vm8 = vcmp.eq.s32.totalorder %v5001_v19, %v7918_v39 }
 0x33f   :  { %4638 = vmatpush.msk.msrb.mxu3 %vm3005_vm11, %v8773_v13  ;;  %vm3001_vm11 = vcmp.eq.s32.totalorder %v8774_v6, %v7728_v34 }
 0x340   :  { %4595 = vmatpush.msk.msrb.mxu0 %vm2829_vm12, %v8773_v13  ;;  %vm3069_vm12 = vcmp.eq.s32.totalorder %v5010_v22, %v7918_v39 }
 0x341   :  { %4639 = vmatpush.msk.msrb.mxu3 %vm3004_vm15, %v8773_v13  ;;  %vm3000_vm15 = vcmp.eq.s32.totalorder %v8777_v10, %v7728_v34 }
 0x342   :  { %4596 = vmatpush.msk.msrb.mxu0 %vm2828_vm0, %v8773_v13  ;;  %vm3068_vm0 = vcmp.eq.s32.totalorder %v5039_v26, %v7918_v39 }
 0x343   :  { %4640 = vmatpush.msk.msrb.mxu3 %vm3003_vm3, %v8773_v13  ;;  %vm2999_vm3 = vcmp.eq.s32.totalorder %v8780_v29, %v7728_v34 }
 0x344   :  { %4645 = vmatpush.msk.msra.mxu0 %vm3071_vm4, %v8773_v13  ;;  %vm3067_vm4 = vcmp.eq.s32.totalorder %v5059_v30, %v7918_v39 }
 0x345   :  { %4641 = vmatpush.msk.msrb.mxu3 %vm3002_vm7, %v8773_v13  ;;  %vm3242_vm7 = vcmp.eq.s32.totalorder %v4992_v16, %v7941_v60 }
 0x346   :  { %4646 = vmatpush.msk.msra.mxu0 %vm3070_vm8, %v8773_v13  ;;  %vm3066_vm8 = vcmp.eq.s32.totalorder %v5076_v33, %v7918_v39 }
 0x347   :  { %4642 = vmatpush.msk.msrb.mxu3 %vm3001_vm11, %v8773_v13  ;;  %vm3241_vm11 = vcmp.eq.s32.totalorder %v5001_v19, %v7941_v60 }
 0x348   :  { %4647 = vmatpush.msk.msra.mxu0 %vm3069_vm12, %v8773_v13  ;;  %vm3065_vm12 = vcmp.eq.s32.totalorder %v5117_v37, %v7918_v39 }
 0x349   :  { %4643 = vmatpush.msk.msrb.mxu3 %vm3000_vm15, %v8773_v13  ;;  %vm3240_vm15 = vcmp.eq.s32.totalorder %v5010_v22, %v7941_v60 }
 0x34a   :  { %4648 = vmatpush.msk.msra.mxu0 %vm3068_vm0, %v8773_v13  ;;  %vm3064_vm0 = vcmp.eq.s32.totalorder %v5140_v41, %v7918_v39 }
 0x34b   :  { %4644 = vmatpush.msk.msrb.mxu3 %vm2999_vm3, %v8773_v13  ;;  %vm3239_vm3 = vcmp.eq.s32.totalorder %v5039_v26, %v7941_v60 }
 0x34c   :  { %4649 = vmatpush.msk.msra.mxu0 %vm3067_vm4, %v8773_v13  ;;  %vm3063_vm4 = vcmp.eq.s32.totalorder %v5173_v44, %v7918_v39 }
 0x34d   :  { %4693 = vmatpush.msk.msra.mxu3 %vm3242_vm7, %v8773_v13  ;;  %vm3238_vm7 = vcmp.eq.s32.totalorder %v5059_v30, %v7941_v60 }
 0x34e   :  { %4650 = vmatpush.msk.msra.mxu0 %vm3066_vm8, %v8773_v13  ;;  %vm3062_vm8 = vcmp.eq.s32.totalorder %v5229_v58, %v7918_v39 }
 0x34f   :  { %4694 = vmatpush.msk.msra.mxu3 %vm3241_vm11, %v8773_v13  ;;  %vm3237_vm11 = vcmp.eq.s32.totalorder %v5076_v33, %v7941_v60 }
 0x350   :  { %4651 = vmatpush.msk.msra.mxu0 %vm3065_vm12, %v8773_v13  ;;  %vm3061_vm12 = vcmp.eq.s32.totalorder %v5248_v61, %v7918_v39 }
 0x351   :  { %4695 = vmatpush.msk.msra.mxu3 %vm3240_vm15, %v8773_v13  ;;  %vm3236_vm15 = vcmp.eq.s32.totalorder %v5117_v37, %v7941_v60 }
 0x352   :  { %4652 = vmatpush.msk.msra.mxu0 %vm3064_vm0, %v8773_v13  ;;  %vm3060_vm0 = vcmp.eq.s32.totalorder %v5257_v0, %v7918_v39 }
 0x353   :  { %4696 = vmatpush.msk.msra.mxu3 %vm3239_vm3, %v8773_v13  ;;  %vm3235_vm3 = vcmp.eq.s32.totalorder %v5140_v41, %v7941_v60 }
 0x354   :  { %4653 = vmatpush.msk.msra.mxu0 %vm3063_vm4, %v8773_v13  ;;  %vm3059_vm4 = vcmp.eq.s32.totalorder %v5268_v3, %v7918_v39 }
 0x355   :  { %4697 = vmatpush.msk.msra.mxu3 %vm3238_vm7, %v8773_v13  ;;  %vm3234_vm7 = vcmp.eq.s32.totalorder %v5173_v44, %v7941_v60 }
 0x356   :  { %4654 = vmatpush.msk.msra.mxu0 %vm3062_vm8, %v8773_v13  ;;  %vm3058_vm8 = vcmp.eq.s32.totalorder %v8774_v6, %v7918_v39 }
 0x357   :  { %4698 = vmatpush.msk.msra.mxu3 %vm3237_vm11, %v8773_v13  ;;  %vm3233_vm11 = vcmp.eq.s32.totalorder %v5229_v58, %v7941_v60 }
 0x358   :  { %4655 = vmatpush.msk.msra.mxu0 %vm3061_vm12, %v8773_v13  ;;  %vm3057_vm12 = vcmp.eq.s32.totalorder %v8777_v10, %v7918_v39 }
 0x359   :  { %4699 = vmatpush.msk.msra.mxu3 %vm3236_vm15, %v8773_v13  ;;  %vm3232_vm15 = vcmp.eq.s32.totalorder %v5248_v61, %v7941_v60 }
 0x35a   :  { %4656 = vmatpush.msk.msra.mxu0 %vm3060_vm0, %v8773_v13  ;;  %vm3056_vm0 = vcmp.eq.s32.totalorder %v8780_v29, %v7918_v39 }
 0x35b   :  { %4700 = vmatpush.msk.msra.mxu3 %vm3235_vm3, %v8773_v13  ;;  %vm3231_vm3 = vcmp.eq.s32.totalorder %v5257_v0, %v7941_v60 }
 0x35c   :  { %4657 = vmatpush.msk.msra.mxu0 %vm3059_vm4, %v8773_v13 }
 0x35d   :  { %4701 = vmatpush.msk.msra.mxu3 %vm3234_vm7, %v8773_v13  ;;  %vm3230_vm7 = vcmp.eq.s32.totalorder %v5268_v3, %v7941_v60 }
 0x35e   :  { %4658 = vmatpush.msk.msra.mxu0 %vm3058_vm8, %v8773_v13 }
 0x35f   :  { %4702 = vmatpush.msk.msra.mxu3 %vm3233_vm11, %v8773_v13  ;;  %vm3229_vm11 = vcmp.eq.s32.totalorder %v8774_v6, %v7941_v60 }
 0x360   :  { %4659 = vmatpush.msk.msra.mxu0 %vm3057_vm12, %v8773_v13 }
 0x361   :  { %4703 = vmatpush.msk.msra.mxu3 %vm3232_vm15, %v8773_v13  ;;  %vm3228_vm15 = vcmp.eq.s32.totalorder %v8777_v10, %v7941_v60 }
 0x362   :  { %4660 = vmatpush.msk.msra.mxu0 %vm3056_vm0, %v8773_v13 }
 0x363   :  { %4704 = vmatpush.msk.msra.mxu3 %vm3231_vm3, %v8773_v13  ;;  %vm3227_vm3 = vcmp.eq.s32.totalorder %v8780_v29, %v7941_v60 }
 0x365   :  { %4705 = vmatpush.msk.msra.mxu3 %vm3230_vm7, %v8773_v13 }
 0x367   :  { %4706 = vmatpush.msk.msra.mxu3 %vm3229_vm11, %v8773_v13 }
 0x369   :  { %4707 = vmatpush.msk.msra.mxu3 %vm3228_vm15, %v8773_v13 }
 0x36b   :  { %4708 = vmatpush.msk.msra.mxu3 %vm3227_vm3, %v8773_v13 }
 0x3af   :  { %v7700_v49 = vpop.f32.mrf.mxu3 }
 0x3b0   :  { %2755 = vadd.xlane.f32.xlu2 %v7700_v49  ;;  %v2761_v45 = vmul.f32 %v7700_v49, %v7700_v49 }
 0x3b7   :  { %v7705_v40 = vpop.f32.mrf.mxu3 }
 0x3b8   :  { %2763 = vadd.xlane.f32.xlu2 %v2761_v45  ;;  %2757 = vadd.xlane.f32.xlu0 %v7705_v40  ;;  %v2762_v53 = vmul.f32 %v7705_v40, %v7705_v40 }
 0x3ba   :  { %2765 = vadd.xlane.f32.xlu1 %v2762_v53 }
 0x3cc   :  { %2813 = vperm.xlu0 %4866, %v4908_v35  }
 0x3d0   :  { %2802 = vperm.xlu2 %4865, %v4908_v35   ;;  %v8151_v35 = vld [vmem:[%s8734_s5 + $0x8] ss:$0 sm:$0xff] }
 0x3d1   :  { %vm3299_vm10 = vcmp.eq.s32.totalorder %v4992_v16, %v8151_v35  ;;  %vm3298_vm14 = vcmp.eq.s32.totalorder %v5001_v19, %v8151_v35  ;;  %vm3297_vm2 = vcmp.eq.s32.totalorder %v5010_v22, %v8151_v35 }
 0x3d8   :  { %2807 = vperm.xlu2 %4865, %v28_v38  }
 0x3e0   :  { %4867 = vset.pattern.permute.xlu2 %v4912_v28 }
 0x3e1   :  { %2817 = vperm.xlu2 %4867, %v28_v38  }
 0x423   :  { %v2756_v62 = vpop.xlane.xlu2 %2755 }
 0x424   :  { %v8081_v63 = vmul.f32 0.02, %v2756_v62 }
 0x426   :  { %v2769_v1 = vmul.f32 %v8081_v63, %v8081_v63  ;;  %v2775_v20 = vsub.f32 %v7700_v49, %v8081_v63  ;;  %v8156_v49 = vld [vmem:[%s8734_s5 + $0x9] ss:$0 sm:$0xff] }
 0x427   :  { %vm3356_vm11 = vcmp.eq.s32.totalorder %v4992_v16, %v8156_v49  ;;  %vm3355_vm15 = vcmp.eq.s32.totalorder %v5001_v19, %v8156_v49  ;;  %vm3354_vm3 = vcmp.eq.s32.totalorder %v5010_v22, %v8156_v49 }
 0x42b   :  { %v2764_v2 = vpop.xlane.xlu2 %2763  ;;  %v2758_v4 = vpop.xlane.xlu0 %2757 }
 0x42c   :  { %v2767_v5 = vmul.f32 0.02, %v2764_v2  ;;  %v2760_v8 = vmul.f32 0.02, %v2758_v4  ;;  %v8359_v2 = vld [vmem:[%s8734_s5 + $0xc] ss:$0 sm:$0xff] }
 0x42d   :  { %v2766_v50 = vpop.xlane.xlu1 %2765  ;;  %v8364_v4 = vld [vmem:[%s8734_s5 + $0xd] ss:$0 sm:$0xff] }
 0x42e   :  { %v2771_v48 = vsub.f32 %v2767_v5, %v2769_v1  ;;  %v2770_v24 = vmul.f32 %v2760_v8, %v2760_v8  ;;  %v2768_v7 = vmul.f32 0.02, %v2766_v50  ;;  %v2776_v55 = vsub.f32 %v7705_v40, %v2760_v8  ;;  %v8161_v40 = vld [vmem:[%s8734_s5 + $0xa] ss:$0 sm:$0xff]  ;;  %v8375_v5 = vld [vmem:[%s8734_s5 + $0xe] ss:$0 sm:$0xff] }
 0x42f   :  { %vm3413_vm12 = vcmp.eq.s32.totalorder %v4992_v16, %v8161_v40  ;;  %vm3412_vm0 = vcmp.eq.s32.totalorder %v5001_v19, %v8161_v40  ;;  %v8380_v8 = vld [vmem:[%s8734_s5 + $0xf] ss:$0 sm:$0xff] }
 0x430   :  { %v2773_v9 = vmax.f32 %v2771_v48, 0.0  ;;  %v2772_v11 = vsub.f32 %v2768_v7, %v2770_v24 }
 0x432   :  { %v2777_v12 = vadd.f32 1e-05, %v2773_v9  ;;  %v2774_v14 = vmax.f32 %v2772_v11, 0.0 }
 0x433   :  { %v2803_v54 = vpop.permute.xlu2 %2802 }
 0x434   :  { %4904 = vrsqrt.f32 %v2777_v12  ;;  %v2778_v36 = vadd.f32 1e-05, %v2774_v14  ;;  %vm2785_vm5 = vweird.f32 %v2777_v12 }
 0x436   :  { %4906 = vrsqrt.f32 %v2778_v36  ;;  %vm2795_vm8 = vweird.f32 %v2778_v36 }
 0x43a   :  { %v4905_v51 = vpop.eup %4904 }
 0x43b   :  { %v2780_v56 = vmul.f32 %v4905_v51, %v2777_v12  ;;  %vm2786_vm4 = vweird.f32 %v4905_v51  ;;  %v2808_v17 = vpop.permute.xlu2 %2807 }
 0x43c   :  { %v4907_v57 = vpop.eup %4906  ;;  %vm2787_vm7 = vmor %vm2785_vm5, %vm2786_vm4  ;;  %vm3411_vm4 = vcmp.eq.s32.totalorder %v5010_v22, %v8161_v40  ;;  %vm3468_vm5 = vcmp.eq.s32.totalorder %v5010_v22, %v8166_v42 }
 0x43d   :  { %v2781_v52 = vmul.f32 %v4905_v51, %v2780_v56  ;;  %v2790_v43 = vmul.f32 %v4907_v57, %v2778_v36  ;;  %vm2796_vm6 = vweird.f32 %v4907_v57 }
 0x43e   :  { %vm2797_vm9 = vmor %vm2795_vm8, %vm2796_vm6  ;;  %v2814_v15 = vpop.permute.xlu0 %2813  ;;  %vm3296_vm6 = vcmp.eq.s32.totalorder %v5039_v26, %v8151_v35  ;;  %vm3410_vm8 = vcmp.eq.s32.totalorder %v5039_v26, %v8161_v40 }
 0x43f   :  { %v2791_v47 = vmul.f32 %v4907_v57, %v2790_v43  ;;  %v2782_v59 = vmul.f32 0.5, %v2781_v52  ;;  %v29_v52 = vld [vmem:[%s8732_s6] sm:$0x1]  ;;  %v4914_v43 = vmov 4  }
 0x440   :  { %4868 = vset.pattern.permute.xlu2 %v4914_v43  ;;  %4869 = vset.pattern.permute.xlu0 %v4914_v43 }
 0x441   :  { %v2792_v21 = vmul.f32 0.5, %v2791_v47  ;;  %v2783_v25 = vsub.f32 1.5, %v2782_v59  ;;  %3741 = vperm.xlu2 %4868, %v29_v52  }
 0x443   :  { %v2784_v27 = vmul.f32 %v4905_v51, %v2783_v25  ;;  %v2793_v18 = vsub.f32 1.5, %v2792_v21  ;;  %v2818_v46 = vpop.permute.xlu2 %2817 }
 0x445   :  { %v2788_v23 = vsel %vm2787_vm7, %v4905_v51, %v2784_v27  ;;  %v2794_v28 = vmul.f32 %v4907_v57, %v2793_v18  ;;  %vm3353_vm7 = vcmp.eq.s32.totalorder %v5039_v26, %v8156_v49  ;;  %v3738_v51 = vld [vmem:[%s8735_s3] sm:$0x3] }
 0x446   :  { %v2799_v45 = vmul.f32 %v2788_v23, %v2775_v20  ;;  %v3745_v56 = vperm.slane %v3738_v51, 0  ;;  %v3746_v27 = vperm.slane %v3738_v51, 1 }
 0x447   :  { %v2798_v53 = vsel %vm2797_vm9, %v4907_v57, %v2794_v28  ;;  %vm3467_vm9 = vcmp.eq.s32.totalorder %v5039_v26, %v8166_v42 }
 0x448   :  { %v2810_v31 = vmul.f32 %v2803_v54, %v2799_v45  ;;  %v2800_v32 = vmul.f32 %v2798_v53, %v2776_v55 }
 0x44a   :  { %v2820_v34 = vadd.f32 %v2814_v15, %v2810_v31  ;;  %v2811_v38 = vmul.f32 %v2808_v17, %v2800_v32 }
 0x44c   :  { %v2822_v39 = vmul.f32 0.2, %v2820_v34  ;;  %v2821_v62 = vadd.f32 %v2818_v46, %v2811_v38 }
 0x44e   :  { %v8168_v60 = vmax.f32 %v2820_v34, %v2822_v39  ;;  %v2823_v63 = vmul.f32 0.2, %v2821_v62 }
 0x450   :  { %2876 = vmatmul.f32.vlgmr.msrb.gmra.mxu0 %v8168_v60  ;;  %2933 = vmatmul.f32.vlgmr.msrb.gmra.mxu1 %v8168_v60  ;;  %v8218_v1 = vmax.f32 %v2821_v62, %v2823_v63 }
 0x451   :  { %2990 = vmatmul.f32.vlgmr.msrb.gmra.mxu2 %v8168_v60  ;;  %3047 = vmatmul.f32.vlgmr.msrb.gmra.mxu3 %v8168_v60 }
 0x452   :  { %4709 = vmatpush.msk.msrb.mxu0 %vm3299_vm10, %v8773_v13  ;;  %4725 = vmatpush.msk.msrb.mxu1 %vm3356_vm11, %v8773_v13  ;;  %vm3295_vm10 = vcmp.eq.s32.totalorder %v5059_v30, %v8151_v35  ;;  %vm3352_vm11 = vcmp.eq.s32.totalorder %v5059_v30, %v8156_v49 }
 0x453   :  { %4741 = vmatpush.msk.msrb.mxu2 %vm3413_vm12, %v8773_v13  ;;  %4757 = vmatpush.msk.msrb.mxu3 %vm3470_vm13, %v8773_v13  ;;  %vm3409_vm12 = vcmp.eq.s32.totalorder %v5059_v30, %v8161_v40  ;;  %vm3466_vm13 = vcmp.eq.s32.totalorder %v5059_v30, %v8166_v42 }
 0x454   :  { %4710 = vmatpush.msk.msrb.mxu0 %vm3298_vm14, %v8773_v13  ;;  %4726 = vmatpush.msk.msrb.mxu1 %vm3355_vm15, %v8773_v13  ;;  %vm3294_vm14 = vcmp.eq.s32.totalorder %v5076_v33, %v8151_v35  ;;  %vm3351_vm15 = vcmp.eq.s32.totalorder %v5076_v33, %v8156_v49 }
 0x455   :  { %4742 = vmatpush.msk.msrb.mxu2 %vm3412_vm0, %v8773_v13  ;;  %4758 = vmatpush.msk.msrb.mxu3 %vm3469_vm1, %v8773_v13  ;;  %vm3408_vm0 = vcmp.eq.s32.totalorder %v5076_v33, %v8161_v40  ;;  %vm3465_vm1 = vcmp.eq.s32.totalorder %v5076_v33, %v8166_v42 }
 0x456   :  { %4711 = vmatpush.msk.msrb.mxu0 %vm3297_vm2, %v8773_v13  ;;  %4727 = vmatpush.msk.msrb.mxu1 %vm3354_vm3, %v8773_v13  ;;  %vm3293_vm2 = vcmp.eq.s32.totalorder %v5117_v37, %v8151_v35  ;;  %vm3350_vm3 = vcmp.eq.s32.totalorder %v5117_v37, %v8156_v49 }
 0x457   :  { %4743 = vmatpush.msk.msrb.mxu2 %vm3411_vm4, %v8773_v13  ;;  %4759 = vmatpush.msk.msrb.mxu3 %vm3468_vm5, %v8773_v13  ;;  %vm3407_vm4 = vcmp.eq.s32.totalorder %v5117_v37, %v8161_v40  ;;  %vm3464_vm5 = vcmp.eq.s32.totalorder %v5117_v37, %v8166_v42 }
 0x458   :  { %4712 = vmatpush.msk.msrb.mxu0 %vm3296_vm6, %v8773_v13  ;;  %4728 = vmatpush.msk.msrb.mxu1 %vm3353_vm7, %v8773_v13  ;;  %vm3292_vm6 = vcmp.eq.s32.totalorder %v5140_v41, %v8151_v35  ;;  %vm3349_vm7 = vcmp.eq.s32.totalorder %v5140_v41, %v8156_v49 }
 0x459   :  { %4744 = vmatpush.msk.msrb.mxu2 %vm3410_vm8, %v8773_v13  ;;  %4760 = vmatpush.msk.msrb.mxu3 %vm3467_vm9, %v8773_v13  ;;  %vm3406_vm8 = vcmp.eq.s32.totalorder %v5140_v41, %v8161_v40  ;;  %vm3463_vm9 = vcmp.eq.s32.totalorder %v5140_v41, %v8166_v42 }
 0x45a   :  { %2879 = vmatmul.f32.gmra.mxu0 %v8218_v1  ;;  %2936 = vmatmul.f32.gmra.mxu1 %v8218_v1 }
 0x45b   :  { %2993 = vmatmul.f32.gmra.mxu2 %v8218_v1  ;;  %3050 = vmatmul.f32.gmra.mxu3 %v8218_v1 }
 0x45c   :  { %4713 = vmatpush.msk.msrb.mxu0 %vm3295_vm10, %v8773_v13  ;;  %4729 = vmatpush.msk.msrb.mxu1 %vm3352_vm11, %v8773_v13  ;;  %vm3291_vm10 = vcmp.eq.s32.totalorder %v5173_v44, %v8151_v35  ;;  %vm3348_vm11 = vcmp.eq.s32.totalorder %v5173_v44, %v8156_v49 }
 0x45d   :  { %4745 = vmatpush.msk.msrb.mxu2 %vm3409_vm12, %v8773_v13  ;;  %4761 = vmatpush.msk.msrb.mxu3 %vm3466_vm13, %v8773_v13  ;;  %vm3405_vm12 = vcmp.eq.s32.totalorder %v5173_v44, %v8161_v40  ;;  %vm3462_vm13 = vcmp.eq.s32.totalorder %v5173_v44, %v8166_v42 }
 0x45e   :  { %4714 = vmatpush.msk.msrb.mxu0 %vm3294_vm14, %v8773_v13  ;;  %4730 = vmatpush.msk.msrb.mxu1 %vm3351_vm15, %v8773_v13  ;;  %vm3290_vm14 = vcmp.eq.s32.totalorder %v5229_v58, %v8151_v35  ;;  %vm3347_vm15 = vcmp.eq.s32.totalorder %v5229_v58, %v8156_v49 }
 0x45f   :  { %4746 = vmatpush.msk.msrb.mxu2 %vm3408_vm0, %v8773_v13  ;;  %4762 = vmatpush.msk.msrb.mxu3 %vm3465_vm1, %v8773_v13  ;;  %vm3404_vm0 = vcmp.eq.s32.totalorder %v5229_v58, %v8161_v40  ;;  %vm3461_vm1 = vcmp.eq.s32.totalorder %v5229_v58, %v8166_v42 }
 0x460   :  { %4715 = vmatpush.msk.msrb.mxu0 %vm3293_vm2, %v8773_v13  ;;  %4731 = vmatpush.msk.msrb.mxu1 %vm3350_vm3, %v8773_v13  ;;  %vm3289_vm2 = vcmp.eq.s32.totalorder %v5248_v61, %v8151_v35  ;;  %vm3346_vm3 = vcmp.eq.s32.totalorder %v5248_v61, %v8156_v49 }
 0x461   :  { %4747 = vmatpush.msk.msrb.mxu2 %vm3407_vm4, %v8773_v13  ;;  %4763 = vmatpush.msk.msrb.mxu3 %vm3464_vm5, %v8773_v13  ;;  %vm3403_vm4 = vcmp.eq.s32.totalorder %v5248_v61, %v8161_v40  ;;  %vm3460_vm5 = vcmp.eq.s32.totalorder %v5248_v61, %v8166_v42 }
 0x462   :  { %4716 = vmatpush.msk.msrb.mxu0 %vm3292_vm6, %v8773_v13  ;;  %4732 = vmatpush.msk.msrb.mxu1 %vm3349_vm7, %v8773_v13  ;;  %vm3288_vm6 = vcmp.eq.s32.totalorder %v5257_v0, %v8151_v35  ;;  %vm3345_vm7 = vcmp.eq.s32.totalorder %v5257_v0, %v8156_v49 }
 0x463   :  { %4748 = vmatpush.msk.msrb.mxu2 %vm3406_vm8, %v8773_v13  ;;  %4764 = vmatpush.msk.msrb.mxu3 %vm3463_vm9, %v8773_v13  ;;  %vm3402_vm8 = vcmp.eq.s32.totalorder %v5257_v0, %v8161_v40  ;;  %vm3459_vm9 = vcmp.eq.s32.totalorder %v5257_v0, %v8166_v42 }
 0x464   :  { %3104 = vmatmul.f32.vlgmr.msra.gmra.mxu0 %v8168_v60  ;;  %3161 = vmatmul.f32.vlgmr.msra.gmra.mxu1 %v8168_v60 }
 0x465   :  { %3218 = vmatmul.f32.vlgmr.msra.gmra.mxu2 %v8168_v60  ;;  %3275 = vmatmul.f32.vlgmr.msra.gmra.mxu3 %v8168_v60 }
 0x466   :  { %4717 = vmatpush.msk.msrb.mxu0 %vm3291_vm10, %v8773_v13  ;;  %4733 = vmatpush.msk.msrb.mxu1 %vm3348_vm11, %v8773_v13  ;;  %vm3287_vm10 = vcmp.eq.s32.totalorder %v5268_v3, %v8151_v35  ;;  %vm3344_vm11 = vcmp.eq.s32.totalorder %v5268_v3, %v8156_v49 }
 0x467   :  { %4749 = vmatpush.msk.msrb.mxu2 %vm3405_vm12, %v8773_v13  ;;  %4765 = vmatpush.msk.msrb.mxu3 %vm3462_vm13, %v8773_v13  ;;  %vm3401_vm12 = vcmp.eq.s32.totalorder %v5268_v3, %v8161_v40  ;;  %vm3458_vm13 = vcmp.eq.s32.totalorder %v5268_v3, %v8166_v42 }
 0x468   :  { %4718 = vmatpush.msk.msrb.mxu0 %vm3290_vm14, %v8773_v13  ;;  %4734 = vmatpush.msk.msrb.mxu1 %vm3347_vm15, %v8773_v13  ;;  %vm3286_vm14 = vcmp.eq.s32.totalorder %v8774_v6, %v8151_v35  ;;  %vm3343_vm15 = vcmp.eq.s32.totalorder %v8774_v6, %v8156_v49 }
 0x469   :  { %4750 = vmatpush.msk.msrb.mxu2 %vm3404_vm0, %v8773_v13  ;;  %4766 = vmatpush.msk.msrb.mxu3 %vm3461_vm1, %v8773_v13  ;;  %vm3400_vm0 = vcmp.eq.s32.totalorder %v8774_v6, %v8161_v40  ;;  %vm3457_vm1 = vcmp.eq.s32.totalorder %v8774_v6, %v8166_v42 }
 0x46a   :  { %4719 = vmatpush.msk.msrb.mxu0 %vm3289_vm2, %v8773_v13  ;;  %4735 = vmatpush.msk.msrb.mxu1 %vm3346_vm3, %v8773_v13  ;;  %vm3285_vm2 = vcmp.eq.s32.totalorder %v8777_v10, %v8151_v35  ;;  %vm3342_vm3 = vcmp.eq.s32.totalorder %v8777_v10, %v8156_v49 }
 0x46b   :  { %4751 = vmatpush.msk.msrb.mxu2 %vm3403_vm4, %v8773_v13  ;;  %4767 = vmatpush.msk.msrb.mxu3 %vm3460_vm5, %v8773_v13  ;;  %vm3399_vm4 = vcmp.eq.s32.totalorder %v8777_v10, %v8161_v40  ;;  %vm3456_vm5 = vcmp.eq.s32.totalorder %v8777_v10, %v8166_v42 }
 0x46c   :  { %4720 = vmatpush.msk.msrb.mxu0 %vm3288_vm6, %v8773_v13  ;;  %4736 = vmatpush.msk.msrb.mxu1 %vm3345_vm7, %v8773_v13  ;;  %vm3284_vm6 = vcmp.eq.s32.totalorder %v8780_v29, %v8151_v35  ;;  %vm3341_vm7 = vcmp.eq.s32.totalorder %v8780_v29, %v8156_v49 }
 0x46d   :  { %4752 = vmatpush.msk.msrb.mxu2 %vm3402_vm8, %v8773_v13  ;;  %4768 = vmatpush.msk.msrb.mxu3 %vm3459_vm9, %v8773_v13  ;;  %vm3398_vm8 = vcmp.eq.s32.totalorder %v8780_v29, %v8161_v40  ;;  %vm3455_vm9 = vcmp.eq.s32.totalorder %v8780_v29, %v8166_v42 }
 0x46e   :  { %3107 = vmatmul.f32.gmra.mxu0 %v8218_v1  ;;  %3164 = vmatmul.f32.gmra.mxu1 %v8218_v1 }
 0x46f   :  { %3221 = vmatmul.f32.gmra.mxu2 %v8218_v1  ;;  %3278 = vmatmul.f32.gmra.mxu3 %v8218_v1 }
 0x470   :  { %4721 = vmatpush.msk.msrb.mxu0 %vm3287_vm10, %v8773_v13  ;;  %4737 = vmatpush.msk.msrb.mxu1 %vm3344_vm11, %v8773_v13  ;;  %vm3527_vm10 = vcmp.eq.s32.totalorder %v4992_v16, %v8359_v2  ;;  %vm3584_vm11 = vcmp.eq.s32.totalorder %v4992_v16, %v8364_v4 }
 0x471   :  { %4753 = vmatpush.msk.msrb.mxu2 %vm3401_vm12, %v8773_v13  ;;  %4769 = vmatpush.msk.msrb.mxu3 %vm3458_vm13, %v8773_v13  ;;  %vm3641_vm12 = vcmp.eq.s32.totalorder %v4992_v16, %v8375_v5  ;;  %vm3698_vm13 = vcmp.eq.s32.totalorder %v4992_v16, %v8380_v8 }
 0x472   :  { %4722 = vmatpush.msk.msrb.mxu0 %vm3286_vm14, %v8773_v13  ;;  %4738 = vmatpush.msk.msrb.mxu1 %vm3343_vm15, %v8773_v13  ;;  %vm3526_vm14 = vcmp.eq.s32.totalorder %v5001_v19, %v8359_v2  ;;  %vm3583_vm15 = vcmp.eq.s32.totalorder %v5001_v19, %v8364_v4 }
 0x473   :  { %4754 = vmatpush.msk.msrb.mxu2 %vm3400_vm0, %v8773_v13  ;;  %4770 = vmatpush.msk.msrb.mxu3 %vm3457_vm1, %v8773_v13  ;;  %vm3640_vm0 = vcmp.eq.s32.totalorder %v5001_v19, %v8375_v5  ;;  %vm3697_vm1 = vcmp.eq.s32.totalorder %v5001_v19, %v8380_v8 }
 0x474   :  { %4723 = vmatpush.msk.msrb.mxu0 %vm3285_vm2, %v8773_v13  ;;  %4739 = vmatpush.msk.msrb.mxu1 %vm3342_vm3, %v8773_v13  ;;  %vm3525_vm2 = vcmp.eq.s32.totalorder %v5010_v22, %v8359_v2  ;;  %vm3582_vm3 = vcmp.eq.s32.totalorder %v5010_v22, %v8364_v4 }
 0x475   :  { %4755 = vmatpush.msk.msrb.mxu2 %vm3399_vm4, %v8773_v13  ;;  %4771 = vmatpush.msk.msrb.mxu3 %vm3456_vm5, %v8773_v13  ;;  %vm3639_vm4 = vcmp.eq.s32.totalorder %v5010_v22, %v8375_v5  ;;  %vm3696_vm5 = vcmp.eq.s32.totalorder %v5010_v22, %v8380_v8 }
 0x476   :  { %4724 = vmatpush.msk.msrb.mxu0 %vm3284_vm6, %v8773_v13  ;;  %4740 = vmatpush.msk.msrb.mxu1 %vm3341_vm7, %v8773_v13  ;;  %vm3524_vm6 = vcmp.eq.s32.totalorder %v5039_v26, %v8359_v2  ;;  %vm3581_vm7 = vcmp.eq.s32.totalorder %v5039_v26, %v8364_v4 }
 0x477   :  { %4756 = vmatpush.msk.msrb.mxu2 %vm3398_vm8, %v8773_v13  ;;  %4772 = vmatpush.msk.msrb.mxu3 %vm3455_vm9, %v8773_v13  ;;  %vm3638_vm8 = vcmp.eq.s32.totalorder %v5039_v26, %v8375_v5  ;;  %vm3695_vm9 = vcmp.eq.s32.totalorder %v5039_v26, %v8380_v8 }
 0x478   :  { %4773 = vmatpush.msk.msra.mxu0 %vm3527_vm10, %v8773_v13  ;;  %4789 = vmatpush.msk.msra.mxu1 %vm3584_vm11, %v8773_v13  ;;  %vm3523_vm10 = vcmp.eq.s32.totalorder %v5059_v30, %v8359_v2  ;;  %vm3580_vm11 = vcmp.eq.s32.totalorder %v5059_v30, %v8364_v4 }
 0x479   :  { %4805 = vmatpush.msk.msra.mxu2 %vm3641_vm12, %v8773_v13  ;;  %4841 = vmatpush.msk.msra.mxu3 %vm3698_vm13, %v8773_v13  ;;  %vm3637_vm12 = vcmp.eq.s32.totalorder %v5059_v30, %v8375_v5 }
 0x47a   :  { %3332 = vmatmul.f32.vlgmr.msrb.gmra.mxu0 %v8168_v60  ;;  %3389 = vmatmul.f32.vlgmr.msrb.gmra.mxu1 %v8168_v60 }
 0x47b   :  { %3446 = vmatmul.f32.vlgmr.msrb.gmra.mxu2 %v8168_v60  ;;  %3503 = vmatmul.f32.vlgmr.msrb.gmra.mxu3 %v8168_v60 }
 0x47c   :  { %4774 = vmatpush.msk.msra.mxu0 %vm3526_vm14, %v8773_v13  ;;  %4790 = vmatpush.msk.msra.mxu1 %vm3583_vm15, %v8773_v13  ;;  %vm3694_vm14 = vcmp.eq.s32.totalorder %v5059_v30, %v8380_v8  ;;  %vm3522_vm15 = vcmp.eq.s32.totalorder %v5076_v33, %v8359_v2 }
 0x47d   :  { %4806 = vmatpush.msk.msra.mxu2 %vm3640_vm0, %v8773_v13  ;;  %4842 = vmatpush.msk.msra.mxu3 %vm3697_vm1, %v8773_v13  ;;  %vm3579_vm0 = vcmp.eq.s32.totalorder %v5076_v33, %v8364_v4 }
 0x47e   :  { %4775 = vmatpush.msk.msra.mxu0 %vm3525_vm2, %v8773_v13  ;;  %4791 = vmatpush.msk.msra.mxu1 %vm3582_vm3, %v8773_v13  ;;  %vm3636_vm2 = vcmp.eq.s32.totalorder %v5076_v33, %v8375_v5  ;;  %vm3693_vm3 = vcmp.eq.s32.totalorder %v5076_v33, %v8380_v8 }
 0x47f   :  { %4807 = vmatpush.msk.msra.mxu2 %vm3639_vm4, %v8773_v13  ;;  %4843 = vmatpush.msk.msra.mxu3 %vm3696_vm5, %v8773_v13  ;;  %vm3521_vm4 = vcmp.eq.s32.totalorder %v5117_v37, %v8359_v2 }
 0x480   :  { %4776 = vmatpush.msk.msra.mxu0 %vm3524_vm6, %v8773_v13  ;;  %4792 = vmatpush.msk.msra.mxu1 %vm3581_vm7, %v8773_v13  ;;  %vm3578_vm6 = vcmp.eq.s32.totalorder %v5117_v37, %v8364_v4  ;;  %vm3635_vm7 = vcmp.eq.s32.totalorder %v5117_v37, %v8375_v5 }
 0x481   :  { %4808 = vmatpush.msk.msra.mxu2 %vm3638_vm8, %v8773_v13  ;;  %4844 = vmatpush.msk.msra.mxu3 %vm3695_vm9, %v8773_v13  ;;  %vm3692_vm8 = vcmp.eq.s32.totalorder %v5117_v37, %v8380_v8 }
 0x482   :  { %4777 = vmatpush.msk.msra.mxu0 %vm3523_vm10, %v8773_v13  ;;  %4793 = vmatpush.msk.msra.mxu1 %vm3580_vm11, %v8773_v13  ;;  %vm3520_vm10 = vcmp.eq.s32.totalorder %v5140_v41, %v8359_v2  ;;  %vm3577_vm11 = vcmp.eq.s32.totalorder %v5140_v41, %v8364_v4 }
 0x483   :  { %4809 = vmatpush.msk.msra.mxu2 %vm3637_vm12, %v8773_v13  ;;  %4845 = vmatpush.msk.msra.mxu3 %vm3694_vm14, %v8773_v13  ;;  %vm3634_vm12 = vcmp.eq.s32.totalorder %v5140_v41, %v8375_v5 }
 0x484   :  { %3335 = vmatmul.f32.gmra.mxu0 %v8218_v1  ;;  %3392 = vmatmul.f32.gmra.mxu1 %v8218_v1 }
 0x485   :  { %3449 = vmatmul.f32.gmra.mxu2 %v8218_v1  ;;  %3506 = vmatmul.f32.gmra.mxu3 %v8218_v1 }
 0x486   :  { %4778 = vmatpush.msk.msra.mxu0 %vm3522_vm15, %v8773_v13  ;;  %4794 = vmatpush.msk.msra.mxu1 %vm3579_vm0, %v8773_v13  ;;  %vm8759_vm15 = vcmp.eq.s32.totalorder %v5140_v41, %v8380_v8  ;;  %vm3519_vm0 = vcmp.eq.s32.totalorder %v5173_v44, %v8359_v2 }
 0x487   :  { %4810 = vmatpush.msk.msra.mxu2 %vm3636_vm2, %v8773_v13  ;;  %4846 = vmatpush.msk.msra.mxu3 %vm3693_vm3, %v8773_v13  ;;  %vm3576_vm2 = vcmp.eq.s32.totalorder %v5173_v44, %v8364_v4 }
 0x488   :  { %4779 = vmatpush.msk.msra.mxu0 %vm3521_vm4, %v8773_v13  ;;  %4795 = vmatpush.msk.msra.mxu1 %vm3578_vm6, %v8773_v13  ;;  %vm3633_vm4 = vcmp.eq.s32.totalorder %v5173_v44, %v8375_v5  ;;  %vm8760_vm6 = vcmp.eq.s32.totalorder %v5173_v44, %v8380_v8 }
 0x489   :  { %4811 = vmatpush.msk.msra.mxu2 %vm3635_vm7, %v8773_v13  ;;  %4847 = vmatpush.msk.msra.mxu3 %vm3692_vm8, %v8773_v13  ;;  %vm3518_vm7 = vcmp.eq.s32.totalorder %v5229_v58, %v8359_v2 }
 0x48a   :  { %4780 = vmatpush.msk.msra.mxu0 %vm3520_vm10, %v8773_v13  ;;  %4796 = vmatpush.msk.msra.mxu1 %vm3577_vm11, %v8773_v13  ;;  %vm3575_vm10 = vcmp.eq.s32.totalorder %v5229_v58, %v8364_v4  ;;  %vm3632_vm11 = vcmp.eq.s32.totalorder %v5229_v58, %v8375_v5 }
 0x48b   :  { %4812 = vmatpush.msk.msra.mxu2 %vm3634_vm12, %v8773_v13  ;;  %4848 = vmatpush.msk.msra.mxu3 %vm8759_vm15, %v8773_v13  ;;  %vm8761_vm12 = vcmp.eq.s32.totalorder %v5229_v58, %v8380_v8  ;;  %vm3517_vm15 = vcmp.eq.s32.totalorder %v5248_v61, %v8359_v2 }
 0x48c   :  { %4781 = vmatpush.msk.msra.mxu0 %vm3519_vm0, %v8773_v13  ;;  %4797 = vmatpush.msk.msra.mxu1 %vm3576_vm2, %v8773_v13  ;;  %vm3574_vm0 = vcmp.eq.s32.totalorder %v5248_v61, %v8364_v4  ;;  %vm3631_vm2 = vcmp.eq.s32.totalorder %v5248_v61, %v8375_v5 }
 0x48d   :  { %4813 = vmatpush.msk.msra.mxu2 %vm3633_vm4, %v8773_v13  ;;  %4849 = vmatpush.msk.msra.mxu3 %vm8760_vm6, %v8773_v13  ;;  %vm8762_vm4 = vcmp.eq.s32.totalorder %v5248_v61, %v8380_v8  ;;  %vm3516_vm6 = vcmp.eq.s32.totalorder %v5257_v0, %v8359_v2 }
 0x48e   :  { %4782 = vmatpush.msk.msra.mxu0 %vm3518_vm7, %v8773_v13  ;;  %4798 = vmatpush.msk.msra.mxu1 %vm3575_vm10, %v8773_v13  ;;  %vm3573_vm7 = vcmp.eq.s32.totalorder %v5257_v0, %v8364_v4  ;;  %vm3630_vm10 = vcmp.eq.s32.totalorder %v5257_v0, %v8375_v5 }
 0x48f   :  { %4814 = vmatpush.msk.msra.mxu2 %vm3632_vm11, %v8773_v13  ;;  %4850 = vmatpush.msk.msra.mxu3 %vm8761_vm12, %v8773_v13  ;;  %vm8763_vm11 = vcmp.eq.s32.totalorder %v5257_v0, %v8380_v8  ;;  %vm3515_vm12 = vcmp.eq.s32.totalorder %v5268_v3, %v8359_v2 }
 0x490   :  { %4783 = vmatpush.msk.msra.mxu0 %vm3517_vm15, %v8773_v13  ;;  %4799 = vmatpush.msk.msra.mxu1 %vm3574_vm0, %v8773_v13  ;;  %vm3572_vm15 = vcmp.eq.s32.totalorder %v5268_v3, %v8364_v4  ;;  %vm3629_vm0 = vcmp.eq.s32.totalorder %v5268_v3, %v8375_v5 }
 0x491   :  { %4815 = vmatpush.msk.msra.mxu2 %vm3631_vm2, %v8773_v13  ;;  %4851 = vmatpush.msk.msra.mxu3 %vm8762_vm4, %v8773_v13  ;;  %vm8764_vm2 = vcmp.eq.s32.totalorder %v5268_v3, %v8380_v8  ;;  %vm3514_vm4 = vcmp.eq.s32.totalorder %v8774_v6, %v8359_v2 }
 0x492   :  { %4784 = vmatpush.msk.msra.mxu0 %vm3516_vm6, %v8773_v13  ;;  %4800 = vmatpush.msk.msra.mxu1 %vm3573_vm7, %v8773_v13  ;;  %vm3571_vm6 = vcmp.eq.s32.totalorder %v8774_v6, %v8364_v4  ;;  %vm3628_vm7 = vcmp.eq.s32.totalorder %v8774_v6, %v8375_v5 }
 0x493   :  { %4816 = vmatpush.msk.msra.mxu2 %vm3630_vm10, %v8773_v13  ;;  %4852 = vmatpush.msk.msra.mxu3 %vm8763_vm11, %v8773_v13  ;;  %vm3685_vm10 = vcmp.eq.s32.totalorder %v8774_v6, %v8380_v8  ;;  %vm3513_vm11 = vcmp.eq.s32.totalorder %v8777_v10, %v8359_v2 }
 0x494   :  { %4785 = vmatpush.msk.msra.mxu0 %vm3515_vm12, %v8773_v13  ;;  %4801 = vmatpush.msk.msra.mxu1 %vm3572_vm15, %v8773_v13  ;;  %vm3570_vm12 = vcmp.eq.s32.totalorder %v8777_v10, %v8364_v4  ;;  %vm3627_vm15 = vcmp.eq.s32.totalorder %v8777_v10, %v8375_v5 }
 0x495   :  { %4817 = vmatpush.msk.msra.mxu2 %vm3629_vm0, %v8773_v13  ;;  %4853 = vmatpush.msk.msra.mxu3 %vm8764_vm2, %v8773_v13  ;;  %vm3684_vm0 = vcmp.eq.s32.totalorder %v8777_v10, %v8380_v8  ;;  %vm3512_vm2 = vcmp.eq.s32.totalorder %v8780_v29, %v8359_v2 }
 0x496   :  { %4786 = vmatpush.msk.msra.mxu0 %vm3514_vm4, %v8773_v13  ;;  %4802 = vmatpush.msk.msra.mxu1 %vm3571_vm6, %v8773_v13  ;;  %vm3569_vm4 = vcmp.eq.s32.totalorder %v8780_v29, %v8364_v4  ;;  %vm3626_vm6 = vcmp.eq.s32.totalorder %v8780_v29, %v8375_v5 }
 0x497   :  { %4818 = vmatpush.msk.msra.mxu2 %vm3628_vm7, %v8773_v13  ;;  %4854 = vmatpush.msk.msra.mxu3 %vm3685_vm10, %v8773_v13  ;;  %vm3683_vm7 = vcmp.eq.s32.totalorder %v8780_v29, %v8380_v8 }
 0x498   :  { %4787 = vmatpush.msk.msra.mxu0 %vm3513_vm11, %v8773_v13  ;;  %4803 = vmatpush.msk.msra.mxu1 %vm3570_vm12, %v8773_v13 }
 0x499   :  { %4819 = vmatpush.msk.msra.mxu2 %vm3627_vm15, %v8773_v13  ;;  %4855 = vmatpush.msk.msra.mxu3 %vm3684_vm0, %v8773_v13 }
 0x49a   :  { %4788 = vmatpush.msk.msra.mxu0 %vm3512_vm2, %v8773_v13  ;;  %4804 = vmatpush.msk.msra.mxu1 %vm3569_vm4, %v8773_v13 }
 0x49b   :  { %4820 = vmatpush.msk.msra.mxu2 %vm3626_vm6, %v8773_v13  ;;  %4856 = vmatpush.msk.msra.mxu3 %vm3683_vm7, %v8773_v13  ;;  %v3742_v17 = vpop.permute.xlu2 %3741 }
 0x49c   :  { %3560 = vmatmul.f32.vlgmr.msra.gmra.mxu0 %v8168_v60  ;;  %3617 = vmatmul.f32.vlgmr.msra.gmra.mxu1 %v8168_v60 }
 0x49d   :  { %3674 = vmatmul.f32.vlgmr.msra.gmra.mxu2 %v8168_v60  ;;  %3734 = vmatmul.f32.vlgmr.msra.gmra.mxu3 %v8218_v1 }
 0x49e   :  { %4821 = vmatpush.msk.msrb.mxu2 %vm3698_vm13, %v8773_v13  ;;  %vm8792_vm13 = vcmp.eq.s32.totalorder %v5140_v41, %v8380_v8 }
 0x4a0   :  { %4822 = vmatpush.msk.msrb.mxu2 %vm3697_vm1, %v8773_v13  ;;  %vm8793_vm1 = vcmp.eq.s32.totalorder %v5173_v44, %v8380_v8 }
 0x4a2   :  { %4823 = vmatpush.msk.msrb.mxu2 %vm3696_vm5, %v8773_v13  ;;  %vm8794_vm5 = vcmp.eq.s32.totalorder %v5229_v58, %v8380_v8 }
 0x4a4   :  { %4824 = vmatpush.msk.msrb.mxu2 %vm3695_vm9, %v8773_v13  ;;  %3563 = vmatmul.f32.gmra.mxu0 %v8218_v1  ;;  %vm8795_vm9 = vcmp.eq.s32.totalorder %v5248_v61, %v8380_v8 }
 0x4a5   :  { %3620 = vmatmul.f32.gmra.mxu1 %v8218_v1  ;;  %3677 = vmatmul.f32.gmra.mxu2 %v8218_v1 }
 0x4a6   :  { %4825 = vmatpush.msk.msrb.mxu2 %vm3694_vm14, %v8773_v13  ;;  %vm8796_vm14 = vcmp.eq.s32.totalorder %v5257_v0, %v8380_v8 }
 0x4a8   :  { %4826 = vmatpush.msk.msrb.mxu2 %vm3693_vm3, %v8773_v13  ;;  %vm8797_vm3 = vcmp.eq.s32.totalorder %v5268_v3, %v8380_v8 }
 0x4aa   :  { %4827 = vmatpush.msk.msrb.mxu2 %vm3692_vm8, %v8773_v13 }
 0x4ac   :  { %4828 = vmatpush.msk.msrb.mxu2 %vm8792_vm13, %v8773_v13 }
 0x4ae   :  { %4829 = vmatpush.msk.msrb.mxu2 %vm8793_vm1, %v8773_v13 }
 0x4b0   :  { %4830 = vmatpush.msk.msrb.mxu2 %vm8794_vm5, %v8773_v13 }
 0x4b2   :  { %4831 = vmatpush.msk.msrb.mxu2 %vm8795_vm9, %v8773_v13 }
 0x4b4   :  { %4832 = vmatpush.msk.msrb.mxu2 %vm8796_vm14, %v8773_v13 }
 0x4b6   :  { %4833 = vmatpush.msk.msrb.mxu2 %vm8797_vm3, %v8773_v13 }
 0x4b8   :  { %4834 = vmatpush.msk.msrb.mxu2 %vm3685_vm10, %v8773_v13 }
 0x4ba   :  { %4835 = vmatpush.msk.msrb.mxu2 %vm3684_vm0, %v8773_v13 }
 0x4bc   :  { %4836 = vmatpush.msk.msrb.mxu2 %vm3683_vm7, %v8773_v13 }
 0x4bd   :  { %3731 = vmatmul.f32.vlgmr.msrb.gmra.mxu2 %v8168_v60 }
 0x4cd   :  { %v2934_v22 = vpop.f32.mrf.mxu1  ;;  %v2877_v30 = vpop.f32.mrf.mxu0 }
 0x4d4   :  { %v3048_v16 = vpop.f32.mrf.mxu3  ;;  %v2991_v19 = vpop.f32.mrf.mxu2 }
 0x4d7   :  { %v2937_v37 = vpop.f32.mrf.mxu1  ;;  %v2880_v44 = vpop.f32.mrf.mxu0 }
 0x4de   :  { %v3051_v26 = vpop.f32.mrf.mxu3  ;;  %v2994_v33 = vpop.f32.mrf.mxu2 }
 0x4e1   :  { %v3162_v61 = vpop.f32.mrf.mxu1  ;;  %v3105_v3 = vpop.f32.mrf.mxu0 }
 0x4e8   :  { %v3276_v41 = vpop.f32.mrf.mxu3  ;;  %v3219_v58 = vpop.f32.mrf.mxu2 }
 0x4eb   :  { %v3165_v13 = vpop.f32.mrf.mxu1  ;;  %v3108_v10 = vpop.f32.mrf.mxu0 }
 0x4f2   :  { %v3279_v0 = vpop.f32.mrf.mxu3  ;;  %v3222_v6 = vpop.f32.mrf.mxu2 }
 0x4f3   :  { %3749 = vmatpush.msrb.mxu0 %v3279_v0 }
 0x4f5   :  { %3750 = vmatpush.msrb.mxu0 %v3276_v41 }
 0x4f7   :  { %3751 = vmatpush.msrb.mxu0 %v3222_v6  ;;  %v3390_v9 = vpop.f32.mrf.mxu1  ;;  %v3333_v11 = vpop.f32.mrf.mxu0 }
 0x4f9   :  { %3752 = vmatpush.msrb.mxu0 %v3219_v58 }
 0x4fb   :  { %3753 = vmatpush.msrb.mxu0 %v3165_v13 }
 0x4fd   :  { %3754 = vmatpush.msrb.mxu0 %v3162_v61 }
 0x4fe   :  { %v3504_v29 = vpop.f32.mrf.mxu3  ;;  %v3447_v48 = vpop.f32.mrf.mxu2 }
 0x4ff   :  { %3755 = vmatpush.msrb.mxu0 %v3108_v10 }
 0x501   :  { %3756 = vmatpush.msrb.mxu0 %v3105_v3  ;;  %v3393_v14 = vpop.f32.mrf.mxu1  ;;  %v3336_v36 = vpop.f32.mrf.mxu0 }
 0x503   :  { %3757 = vmatpush.msrb.mxu0 %v3051_v26 }
 0x505   :  { %3758 = vmatpush.msrb.mxu0 %v3048_v16 }
 0x507   :  { %3759 = vmatpush.msrb.mxu0 %v2994_v33 }
 0x508   :  { %v3507_v50 = vpop.f32.mrf.mxu3  ;;  %v3450_v7 = vpop.f32.mrf.mxu2 }
 0x509   :  { %3760 = vmatpush.msrb.mxu0 %v2991_v19 }
 0x50b   :  { %3761 = vmatpush.msrb.mxu0 %v2937_v37 }
 0x50d   :  { %3762 = vmatpush.msrb.mxu0 %v2934_v22 }
 0x50f   :  { %3763 = vmatpush.msrb.mxu0 %v2880_v44 }
 0x511   :  { %3764 = vmatpush.msrb.mxu0 %v2877_v30 }
 0x512   :  { %3765 = vmatmul.f32.vlgmr.msrb.gmra.mxu0 %v3745_v56 }
 0x519   :  { %v3618_v57 = vpop.f32.mrf.mxu1  ;;  %v3561_v47 = vpop.f32.mrf.mxu0 }
 0x520   :  { %v3735_v24 = vpop.f32.mrf.mxu3  ;;  %v3675_v12 = vpop.f32.mrf.mxu2 }
 0x521   :  { %3769 = vmatpush.msrb.mxu1 %v3735_v24  ;;  %v3564_v25 = vpop.f32.mrf.mxu0 }
 0x522   :  { %v3621_v21 = vpop.f32.mrf.mxu1 }
 0x528   :  { %v3678_v54 = vpop.f32.mrf.mxu2 }
 0x540   :  { %v3732_v59 = vpop.f32.mrf.mxu2 }
 0x541   :  { %3770 = vmatpush.msrb.mxu1 %v3732_v59 }
 0x543   :  { %3771 = vmatpush.msrb.mxu1 %v3678_v54 }
 0x545   :  { %3772 = vmatpush.msrb.mxu1 %v3675_v12 }
 0x547   :  { %3773 = vmatpush.msrb.mxu1 %v3621_v21 }
 0x549   :  { %3774 = vmatpush.msrb.mxu1 %v3618_v57 }
 0x54b   :  { %3775 = vmatpush.msrb.mxu1 %v3564_v25 }
 0x54d   :  { %3776 = vmatpush.msrb.mxu1 %v3561_v47 }
 0x54f   :  { %3777 = vmatpush.msrb.mxu1 %v3507_v50 }
 0x551   :  { %3778 = vmatpush.msrb.mxu1 %v3504_v29 }
 0x553   :  { %3779 = vmatpush.msrb.mxu1 %v3450_v7 }
 0x555   :  { %3780 = vmatpush.msrb.mxu1 %v3447_v48 }
 0x557   :  { %3781 = vmatpush.msrb.mxu1 %v3393_v14 }
 0x559   :  { %3782 = vmatpush.msrb.mxu1 %v3390_v9 }
 0x55b   :  { %3783 = vmatpush.msrb.mxu1 %v3336_v36 }
 0x55d   :  { %3784 = vmatpush.msrb.mxu1 %v3333_v11 }
 0x55e   :  { %3785 = vmatmul.f32.vlgmr.msrb.gmra.mxu1 %v3746_v27 }
 0x58f   :  { %v3766_v18 = vpop.f32.mrf.mxu0 }
 0x590   :  { %v3767_v20 = vadd.f32 %v3766_v18, %v3742_v17 }
 0x5db   :  { %v3786_v23 = vpop.f32.mrf.mxu1 }
 0x5dc   :  { %v3787_v28 = vadd.f32 %v3786_v23, %v3767_v20 }
 0x5de   :  { %3789 = vst [vmem:[%s8736_s7] sm:$0x1] %v3787_v28 }

</bundles_post_ra>
